<compile_context>
chip_gen: v7x
topology: tpu7x:2x2x1
jax: 0.10.0
libtpu: 0.0.40
codegen_flags: <defaults>
</compile_context>

<pallas_src>
import functools

import jax
import jax.numpy as jnp
import numpy as np
from jax.experimental import pallas as pl
from jax.experimental.pallas import tpu as pltpu


def _sam_kernel(w_ref, x_ref, o_ref, pad_ref, att_ref, *, H, W, K, PAD, LANES):
    # w_ref  : SMEM (2*K*K,) f32  -- conv weight (already scaled by 1/factor)
    # x_ref  : VMEM (1, C, H*W)   -- lane-dense input block
    # o_ref  : VMEM (1, C, H*W)   -- lane-dense output block
    # pad_ref: VMEM (2, H+2*PAD, LANES) f32 -- zero-padded reduced maps
    # att_ref: VMEM (1, H*W) f32  -- flattened attention logits
    HW = H * W
    n_in = 2  # mean map + max map

    # ---- channel reduction, lane-dense ------------------------------------
    xr = x_ref[0].astype(jnp.float32)                     # (C, HW)
    mean_map = jnp.mean(xr, axis=0, keepdims=True)        # (1, HW)
    max_map = jnp.max(xr, axis=0, keepdims=True)          # (1, HW)

    # ---- scatter reduced maps into the zero-padded conv scratch -----------
    # Full small-scratch zero each step keeps the halo correct on every core
    # even when the "parallel" batch axis is sharded across TensorCores.
    pad_ref[...] = jnp.zeros_like(pad_ref)
    for h in range(H):
        pad_ref[0, PAD + h:PAD + h + 1, PAD:PAD + W] = mean_map[:, h * W:(h + 1) * W]
        pad_ref[1, PAD + h:PAD + h + 1, PAD:PAD + W] = max_map[:, h * W:(h + 1) * W]

    # ---- KxK conv: per-(ci,kh) band loads + lane rolls for kw shifts -------
    n_acc = 4
    accs = [jnp.zeros((H, LANES), jnp.float32) for _ in range(n_acc)]
    t = 0
    for ci in range(n_in):
        for kh in range(K):
            band = pad_ref[ci, kh:kh + H, :]              # (H, LANES), aligned lanes
            for kw in range(K):
                w = w_ref[ci * K * K + kh * K + kw]       # scalar from SMEM
                # rolled[:, j] == band[:, j + kw] for the lanes we keep (j < W)
                sh = band if kw == 0 else pltpu.roll(band, shift=LANES - kw, axis=1)
                accs[t % n_acc] = accs[t % n_acc] + w * sh
                t += 1
    att = (accs[0] + accs[1]) + (accs[2] + accs[3])       # (H, LANES); lanes >= W unused

    # ---- flatten attention logits to lane-dense (1, H*W) via scratch ------
    for h in range(H):
        att_ref[0:1, h * W:(h + 1) * W] = att[h:h + 1, :W]

    # ---- sigmoid (1/factor already folded into weights) + final scale -----
    scale = 1.0 + jax.nn.sigmoid(att_ref[...])            # (1, HW)
    xv = x_ref[0].astype(jnp.float32)                     # re-read, lane-dense
    o_ref[0, :, :] = (xv * scale).astype(o_ref.dtype)     # one dense (C, HW) store


def sam_forward(x, conv_w, factor=1.0):
    """x: (B, C, H, W); conv_w: (1, 2, K, K) PyTorch-style OIHW conv weight."""
    B, C, H, W = x.shape
    K = conv_w.shape[-1]
    PAD = (K - 1) // 2
    HW = H * W
    LANES = max(128, ((W + 2 * PAD + 127) // 128) * 128)

    # Fold 1/factor into the (bias-free) conv weights: sigmoid(conv(red)/f)
    # == sigmoid(conv_{w/f}(red)). Removes one per-element VPU op in-kernel.
    w_flat = (conv_w.astype(jnp.float32) / float(factor)).reshape(-1)   # (2*K*K,)

    x_flat = x.reshape(B, C, HW)    # lane-dense layout for the streaming path

    kernel = functools.partial(_sam_kernel, H=H, W=W, K=K, PAD=PAD, LANES=LANES)

    out_flat = pl.pallas_call(
        kernel,
        out_shape=jax.ShapeDtypeStruct((B, C, HW), x.dtype),
        grid_spec=pltpu.PrefetchScalarGridSpec(
            num_scalar_prefetch=0,
            grid=(B,),
            in_specs=[
                pl.BlockSpec(memory_space=pltpu.MemorySpace.SMEM),      # conv weights
                pl.BlockSpec((1, C, HW), lambda b: (b, 0, 0)),
            ],
            out_specs=pl.BlockSpec((1, C, HW), lambda b: (b, 0, 0)),
            scratch_shapes=[
                pltpu.VMEM((2, H + 2 * PAD, LANES), jnp.float32),  # padded reduced maps
                pltpu.VMEM((1, HW), jnp.float32),                  # flat attention logits
            ],
        ),
        # Batch axis is independent -> shard across TensorCores on megacore
        # parts (B=2 keeps both v7x cores busy). Per-step VMEM footprint is a
        # few tens of KiB, far under the default scoped limit on all of
        # v5e/v6e/v7x, so vmem_limit_bytes is left at its default.
        compiler_params=pltpu.CompilerParams(dimension_semantics=("parallel",)),
    )(w_flat, x_flat)
    return out_flat.reshape(B, C, H, W)


def _reference(x, conv_w, factor=1.0):
    """Pure-JAX reference matching the PyTorch module."""
    x32 = x.astype(jnp.float32)
    mean_map = jnp.mean(x32, axis=1, keepdims=True)        # (B,1,H,W)
    max_map = jnp.max(x32, axis=1, keepdims=True)          # (B,1,H,W)
    red = jnp.concatenate([mean_map, max_map], axis=1)     # (B,2,H,W)
    K = conv_w.shape[-1]
    att = jax.lax.conv_general_dilated(
        red, conv_w.astype(jnp.float32),
        window_strides=(1, 1), padding=[(K // 2, K // 2)] * 2,
        dimension_numbers=("NCHW", "OIHW", "NCHW"))        # (B,1,H,W)
    y = jax.nn.sigmoid(att / factor)
    return ((y + 1.0) * x32).astype(x.dtype)


if __name__ == "__main__":
    B, C, H, W = 2, 4, 16, 16
    K = 7
    factor = 2.0

    key = jax.random.PRNGKey(0)
    kx, kw = jax.random.split(key)
    x = jax.random.normal(kx, (B, C, H, W), dtype=jnp.float32)
    # Deterministic synthetic Conv2d(in=2, out=1, k=7, bias=False) weight (OIHW).
    conv_w = 0.05 * jax.random.normal(kw, (1, 2, K, K), dtype=jnp.float32)

    out = sam_forward(x, conv_w, factor=factor)
    out = jax.block_until_ready(out)

    ref = jax.block_until_ready(_reference(x, conv_w, factor=factor))
    np.testing.assert_allclose(np.asarray(out), np.asarray(ref),
                               rtol=1e-4, atol=1e-4)
    print("KERNEL_OK")
</pallas_src>

<mosaic_0001>
module attributes {stable_mosaic.version = 11 : i64} {
  func.func @_sam_kernel(%arg0: i32, %arg1: memref<98xf32, #tpu.memory_space<smem>>, %arg2: memref<1x4x256xf32, #tpu.memory_space<vmem>>, %arg3: memref<1x4x256xf32, #tpu.memory_space<vmem>>, %arg4: memref<2x22x128xf32, #tpu.memory_space<vmem>>, %arg5: memref<1x256xf32, #tpu.memory_space<vmem>>) attributes {dimension_semantics = [#tpu.dimension_semantics<parallel>], iteration_bounds = array<i64: 2>, scalar_prefetch = 0 : i64, scratch_operands = 2 : i64, tpu.core_type = #tpu.core_type<tc>, window_params = [{transform_indices = @transform_0, window_bounds = array<i64: 98>}, {transform_indices = @transform_1, window_bounds = array<i64: 1, 4, 256>}, {transform_indices = @transform_2, window_bounds = array<i64: 1, 4, 256>}]} {
    %c0 = arith.constant 0 : index
    %c0_0 = arith.constant 0 : index
    %c0_1 = arith.constant 0 : index
    %0 = vector.load %arg2[%c0, %c0_0, %c0_1] : memref<1x4x256xf32, #tpu.memory_space<vmem>>, vector<1x4x256xf32>
    %1 = vector.shape_cast %0 : vector<1x4x256xf32> to vector<4x256xf32>
    %cst = arith.constant dense<0.000000e+00> : vector<256xf32>
    %2 = vector.multi_reduction <add>, %1, %cst [0] : vector<4x256xf32> to vector<256xf32>
    %3 = vector.shape_cast %2 : vector<256xf32> to vector<1x256xf32>
    %cst_2 = arith.constant 4.000000e+00 : f32
    %4 = vector.broadcast %cst_2 : f32 to vector<1x256xf32>
    %5 = arith.divf %3, %4 : vector<1x256xf32>
    %cst_3 = arith.constant dense<0xFF800000> : vector<256xf32>
    %6 = vector.multi_reduction <maximumf>, %1, %cst_3 [0] : vector<4x256xf32> to vector<256xf32>
    %7 = vector.shape_cast %6 : vector<256xf32> to vector<1x256xf32>
    %cst_4 = arith.constant 0.000000e+00 : f32
    %8 = vector.broadcast %cst_4 : f32 to vector<2x22x128xf32>
    %c0_5 = arith.constant 0 : index
    %c0_6 = arith.constant 0 : index
    %c0_7 = arith.constant 0 : index
    %9 = vector.load %arg4[%c0_5, %c0_6, %c0_7] : memref<2x22x128xf32, #tpu.memory_space<vmem>>, vector<2x22x128xf32>
    tpu.vector_store %arg4[%c0_5, %c0_6, %c0_7], %8 {strides = array<i32>} : memref<2x22x128xf32, #tpu.memory_space<vmem>>, vector<2x22x128xf32>,
    %10 = vector.extract_strided_slice %5 {offsets = [0, 0], sizes = [1, 16], strides = [1, 1]} : vector<1x256xf32> to vector<1x16xf32>
    %c0_8 = arith.constant 0 : index
    %c3 = arith.constant 3 : index
    %c3_9 = arith.constant 3 : index
    %11 = vector.load %arg4[%c0_8, %c3, %c3_9] : memref<2x22x128xf32, #tpu.memory_space<vmem>>, vector<1x1x16xf32>
    %12 = vector.shape_cast %11 : vector<1x1x16xf32> to vector<1x16xf32>
    %13 = vector.shape_cast %10 : vector<1x16xf32> to vector<1x1x16xf32>
    tpu.vector_store %arg4[%c0_8, %c3, %c3_9], %13 {strides = array<i32>} : memref<2x22x128xf32, #tpu.memory_space<vmem>>, vector<1x1x16xf32>,
    %14 = vector.extract_strided_slice %7 {offsets = [0, 0], sizes = [1, 16], strides = [1, 1]} : vector<1x256xf32> to vector<1x16xf32>
    %c1 = arith.constant 1 : index
    %c3_10 = arith.constant 3 : index
    %c3_11 = arith.constant 3 : index
    %15 = vector.load %arg4[%c1, %c3_10, %c3_11] : memref<2x22x128xf32, #tpu.memory_space<vmem>>, vector<1x1x16xf32>
    %16 = vector.shape_cast %15 : vector<1x1x16xf32> to vector<1x16xf32>
    %17 = vector.shape_cast %14 : vector<1x16xf32> to vector<1x1x16xf32>
    tpu.vector_store %arg4[%c1, %c3_10, %c3_11], %17 {strides = array<i32>} : memref<2x22x128xf32, #tpu.memory_space<vmem>>, vector<1x1x16xf32>,
    %18 = vector.extract_strided_slice %5 {offsets = [0, 16], sizes = [1, 16], strides = [1, 1]} : vector<1x256xf32> to vector<1x16xf32>
    %c0_12 = arith.constant 0 : index
    %c4 = arith.constant 4 : index
    %c3_13 = arith.constant 3 : index
    %19 = vector.load %arg4[%c0_12, %c4, %c3_13] : memref<2x22x128xf32, #tpu.memory_space<vmem>>, vector<1x1x16xf32>
    %20 = vector.shape_cast %19 : vector<1x1x16xf32> to vector<1x16xf32>
    %21 = vector.shape_cast %18 : vector<1x16xf32> to vector<1x1x16xf32>
    tpu.vector_store %arg4[%c0_12, %c4, %c3_13], %21 {strides = array<i32>} : memref<2x22x128xf32, #tpu.memory_space<vmem>>, vector<1x1x16xf32>,
    %22 = vector.extract_strided_slice %7 {offsets = [0, 16], sizes = [1, 16], strides = [1, 1]} : vector<1x256xf32> to vector<1x16xf32>
    %c1_14 = arith.constant 1 : index
    %c4_15 = arith.constant 4 : index
    %c3_16 = arith.constant 3 : index
    %23 = vector.load %arg4[%c1_14, %c4_15, %c3_16] : memref<2x22x128xf32, #tpu.memory_space<vmem>>, vector<1x1x16xf32>
    %24 = vector.shape_cast %23 : vector<1x1x16xf32> to vector<1x16xf32>
    %25 = vector.shape_cast %22 : vector<1x16xf32> to vector<1x1x16xf32>
    tpu.vector_store %arg4[%c1_14, %c4_15, %c3_16], %25 {strides = array<i32>} : memref<2x22x128xf32, #tpu.memory_space<vmem>>, vector<1x1x16xf32>,
    %26 = vector.extract_strided_slice %5 {offsets = [0, 32], sizes = [1, 16], strides = [1, 1]} : vector<1x256xf32> to vector<1x16xf32>
    %c0_17 = arith.constant 0 : index
    %c5 = arith.constant 5 : index
    %c3_18 = arith.constant 3 : index
    %27 = vector.load %arg4[%c0_17, %c5, %c3_18] : memref<2x22x128xf32, #tpu.memory_space<vmem>>, vector<1x1x16xf32>
    %28 = vector.shape_cast %27 : vector<1x1x16xf32> to vector<1x16xf32>
    %29 = vector.shape_cast %26 : vector<1x16xf32> to vector<1x1x16xf32>
    tpu.vector_store %arg4[%c0_17, %c5, %c3_18], %29 {strides = array<i32>} : memref<2x22x128xf32, #tpu.memory_space<vmem>>, vector<1x1x16xf32>,
    %30 = vector.extract_strided_slice %7 {offsets = [0, 32], sizes = [1, 16], strides = [1, 1]} : vector<1x256xf32> to vector<1x16xf32>
    %c1_19 = arith.constant 1 : index
    %c5_20 = arith.constant 5 : index
    %c3_21 = arith.constant 3 : index
    %31 = vector.load %arg4[%c1_19, %c5_20, %c3_21] : memref<2x22x128xf32, #tpu.memory_space<vmem>>, vector<1x1x16xf32>
    %32 = vector.shape_cast %31 : vector<1x1x16xf32> to vector<1x16xf32>
    %33 = vector.shape_cast %30 : vector<1x16xf32> to vector<1x1x16xf32>
    tpu.vector_store %arg4[%c1_19, %c5_20, %c3_21], %33 {strides = array<i32>} : memref<2x22x128xf32, #tpu.memory_space<vmem>>, vector<1x1x16xf32>,
    %34 = vector.extract_strided_slice %5 {offsets = [0, 48], sizes = [1, 16], strides = [1, 1]} : vector<1x256xf32> to vector<1x16xf32>
    %c0_22 = arith.constant 0 : index
    %c6 = arith.constant 6 : index
    %c3_23 = arith.constant 3 : index
    %35 = vector.load %arg4[%c0_22, %c6, %c3_23] : memref<2x22x128xf32, #tpu.memory_space<vmem>>, vector<1x1x16xf32>
    %36 = vector.shape_cast %35 : vector<1x1x16xf32> to vector<1x16xf32>
    %37 = vector.shape_cast %34 : vector<1x16xf32> to vector<1x1x16xf32>
    tpu.vector_store %arg4[%c0_22, %c6, %c3_23], %37 {strides = array<i32>} : memref<2x22x128xf32, #tpu.memory_space<vmem>>, vector<1x1x16xf32>,
    %38 = vector.extract_strided_slice %7 {offsets = [0, 48], sizes = [1, 16], strides = [1, 1]} : vector<1x256xf32> to vector<1x16xf32>
    %c1_24 = arith.constant 1 : index
    %c6_25 = arith.constant 6 : index
    %c3_26 = arith.constant 3 : index
    %39 = vector.load %arg4[%c1_24, %c6_25, %c3_26] : memref<2x22x128xf32, #tpu.memory_space<vmem>>, vector<1x1x16xf32>
    %40 = vector.shape_cast %39 : vector<1x1x16xf32> to vector<1x16xf32>
    %41 = vector.shape_cast %38 : vector<1x16xf32> to vector<1x1x16xf32>
    tpu.vector_store %arg4[%c1_24, %c6_25, %c3_26], %41 {strides = array<i32>} : memref<2x22x128xf32, #tpu.memory_space<vmem>>, vector<1x1x16xf32>,
    %42 = vector.extract_strided_slice %5 {offsets = [0, 64], sizes = [1, 16], strides = [1, 1]} : vector<1x256xf32> to vector<1x16xf32>
    %c0_27 = arith.constant 0 : index
    %c7 = arith.constant 7 : index
    %c3_28 = arith.constant 3 : index
    %43 = vector.load %arg4[%c0_27, %c7, %c3_28] : memref<2x22x128xf32, #tpu.memory_space<vmem>>, vector<1x1x16xf32>
    %44 = vector.shape_cast %43 : vector<1x1x16xf32> to vector<1x16xf32>
    %45 = vector.shape_cast %42 : vector<1x16xf32> to vector<1x1x16xf32>
    tpu.vector_store %arg4[%c0_27, %c7, %c3_28], %45 {strides = array<i32>} : memref<2x22x128xf32, #tpu.memory_space<vmem>>, vector<1x1x16xf32>,
    %46 = vector.extract_strided_slice %7 {offsets = [0, 64], sizes = [1, 16], strides = [1, 1]} : vector<1x256xf32> to vector<1x16xf32>
    %c1_29 = arith.constant 1 : index
    %c7_30 = arith.constant 7 : index
    %c3_31 = arith.constant 3 : index
    %47 = vector.load %arg4[%c1_29, %c7_30, %c3_31] : memref<2x22x128xf32, #tpu.memory_space<vmem>>, vector<1x1x16xf32>
    %48 = vector.shape_cast %47 : vector<1x1x16xf32> to vector<1x16xf32>
    %49 = vector.shape_cast %46 : vector<1x16xf32> to vector<1x1x16xf32>
    tpu.vector_store %arg4[%c1_29, %c7_30, %c3_31], %49 {strides = array<i32>} : memref<2x22x128xf32, #tpu.memory_space<vmem>>, vector<1x1x16xf32>,
    %50 = vector.extract_strided_slice %5 {offsets = [0, 80], sizes = [1, 16], strides = [1, 1]} : vector<1x256xf32> to vector<1x16xf32>
    %c0_32 = arith.constant 0 : index
    %c8 = arith.constant 8 : index
    %c3_33 = arith.constant 3 : index
    %51 = vector.load %arg4[%c0_32, %c8, %c3_33] : memref<2x22x128xf32, #tpu.memory_space<vmem>>, vector<1x1x16xf32>
    %52 = vector.shape_cast %51 : vector<1x1x16xf32> to vector<1x16xf32>
    %53 = vector.shape_cast %50 : vector<1x16xf32> to vector<1x1x16xf32>
    tpu.vector_store %arg4[%c0_32, %c8, %c3_33], %53 {strides = array<i32>} : memref<2x22x128xf32, #tpu.memory_space<vmem>>, vector<1x1x16xf32>,
    %54 = vector.extract_strided_slice %7 {offsets = [0, 80], sizes = [1, 16], strides = [1, 1]} : vector<1x256xf32> to vector<1x16xf32>
    %c1_34 = arith.constant 1 : index
    %c8_35 = arith.constant 8 : index
    %c3_36 = arith.constant 3 : index
    %55 = vector.load %arg4[%c1_34, %c8_35, %c3_36] : memref<2x22x128xf32, #tpu.memory_space<vmem>>, vector<1x1x16xf32>
    %56 = vector.shape_cast %55 : vector<1x1x16xf32> to vector<1x16xf32>
    %57 = vector.shape_cast %54 : vector<1x16xf32> to vector<1x1x16xf32>
    tpu.vector_store %arg4[%c1_34, %c8_35, %c3_36], %57 {strides = array<i32>} : memref<2x22x128xf32, #tpu.memory_space<vmem>>, vector<1x1x16xf32>,
    %58 = vector.extract_strided_slice %5 {offsets = [0, 96], sizes = [1, 16], strides = [1, 1]} : vector<1x256xf32> to vector<1x16xf32>
    %c0_37 = arith.constant 0 : index
    %c9 = arith.constant 9 : index
    %c3_38 = arith.constant 3 : index
    %59 = vector.load %arg4[%c0_37, %c9, %c3_38] : memref<2x22x128xf32, #tpu.memory_space<vmem>>, vector<1x1x16xf32>
    %60 = vector.shape_cast %59 : vector<1x1x16xf32> to vector<1x16xf32>
    %61 = vector.shape_cast %58 : vector<1x16xf32> to vector<1x1x16xf32>
    tpu.vector_store %arg4[%c0_37, %c9, %c3_38], %61 {strides = array<i32>} : memref<2x22x128xf32, #tpu.memory_space<vmem>>, vector<1x1x16xf32>,
    %62 = vector.extract_strided_slice %7 {offsets = [0, 96], sizes = [1, 16], strides = [1, 1]} : vector<1x256xf32> to vector<1x16xf32>
    %c1_39 = arith.constant 1 : index
    %c9_40 = arith.constant 9 : index
    %c3_41 = arith.constant 3 : index
    %63 = vector.load %arg4[%c1_39, %c9_40, %c3_41] : memref<2x22x128xf32, #tpu.memory_space<vmem>>, vector<1x1x16xf32>
    %64 = vector.shape_cast %63 : vector<1x1x16xf32> to vector<1x16xf32>
    %65 = vector.shape_cast %62 : vector<1x16xf32> to vector<1x1x16xf32>
    tpu.vector_store %arg4[%c1_39, %c9_40, %c3_41], %65 {strides = array<i32>} : memref<2x22x128xf32, #tpu.memory_space<vmem>>, vector<1x1x16xf32>,
    %66 = vector.extract_strided_slice %5 {offsets = [0, 112], sizes = [1, 16], strides = [1, 1]} : vector<1x256xf32> to vector<1x16xf32>
    %c0_42 = arith.constant 0 : index
    %c10 = arith.constant 10 : index
    %c3_43 = arith.constant 3 : index
    %67 = vector.load %arg4[%c0_42, %c10, %c3_43] : memref<2x22x128xf32, #tpu.memory_space<vmem>>, vector<1x1x16xf32>
    %68 = vector.shape_cast %67 : vector<1x1x16xf32> to vector<1x16xf32>
    %69 = vector.shape_cast %66 : vector<1x16xf32> to vector<1x1x16xf32>
    tpu.vector_store %arg4[%c0_42, %c10, %c3_43], %69 {strides = array<i32>} : memref<2x22x128xf32, #tpu.memory_space<vmem>>, vector<1x1x16xf32>,
    %70 = vector.extract_strided_slice %7 {offsets = [0, 112], sizes = [1, 16], strides = [1, 1]} : vector<1x256xf32> to vector<1x16xf32>
    %c1_44 = arith.constant 1 : index
    %c10_45 = arith.constant 10 : index
    %c3_46 = arith.constant 3 : index
    %71 = vector.load %arg4[%c1_44, %c10_45, %c3_46] : memref<2x22x128xf32, #tpu.memory_space<vmem>>, vector<1x1x16xf32>
    %72 = vector.shape_cast %71 : vector<1x1x16xf32> to vector<1x16xf32>
    %73 = vector.shape_cast %70 : vector<1x16xf32> to vector<1x1x16xf32>
    tpu.vector_store %arg4[%c1_44, %c10_45, %c3_46], %73 {strides = array<i32>} : memref<2x22x128xf32, #tpu.memory_space<vmem>>, vector<1x1x16xf32>,
    %74 = vector.extract_strided_slice %5 {offsets = [0, 128], sizes = [1, 16], strides = [1, 1]} : vector<1x256xf32> to vector<1x16xf32>
    %c0_47 = arith.constant 0 : index
    %c11 = arith.constant 11 : index
    %c3_48 = arith.constant 3 : index
    %75 = vector.load %arg4[%c0_47, %c11, %c3_48] : memref<2x22x128xf32, #tpu.memory_space<vmem>>, vector<1x1x16xf32>
    %76 = vector.shape_cast %75 : vector<1x1x16xf32> to vector<1x16xf32>
    %77 = vector.shape_cast %74 : vector<1x16xf32> to vector<1x1x16xf32>
    tpu.vector_store %arg4[%c0_47, %c11, %c3_48], %77 {strides = array<i32>} : memref<2x22x128xf32, #tpu.memory_space<vmem>>, vector<1x1x16xf32>,
    %78 = vector.extract_strided_slice %7 {offsets = [0, 128], sizes = [1, 16], strides = [1, 1]} : vector<1x256xf32> to vector<1x16xf32>
    %c1_49 = arith.constant 1 : index
    %c11_50 = arith.constant 11 : index
    %c3_51 = arith.constant 3 : index
    %79 = vector.load %arg4[%c1_49, %c11_50, %c3_51] : memref<2x22x128xf32, #tpu.memory_space<vmem>>, vector<1x1x16xf32>
    %80 = vector.shape_cast %79 : vector<1x1x16xf32> to vector<1x16xf32>
    %81 = vector.shape_cast %78 : vector<1x16xf32> to vector<1x1x16xf32>
    tpu.vector_store %arg4[%c1_49, %c11_50, %c3_51], %81 {strides = array<i32>} : memref<2x22x128xf32, #tpu.memory_space<vmem>>, vector<1x1x16xf32>,
    %82 = vector.extract_strided_slice %5 {offsets = [0, 144], sizes = [1, 16], strides = [1, 1]} : vector<1x256xf32> to vector<1x16xf32>
    %c0_52 = arith.constant 0 : index
    %c12 = arith.constant 12 : index
    %c3_53 = arith.constant 3 : index
    %83 = vector.load %arg4[%c0_52, %c12, %c3_53] : memref<2x22x128xf32, #tpu.memory_space<vmem>>, vector<1x1x16xf32>
    %84 = vector.shape_cast %83 : vector<1x1x16xf32> to vector<1x16xf32>
    %85 = vector.shape_cast %82 : vector<1x16xf32> to vector<1x1x16xf32>
    tpu.vector_store %arg4[%c0_52, %c12, %c3_53], %85 {strides = array<i32>} : memref<2x22x128xf32, #tpu.memory_space<vmem>>, vector<1x1x16xf32>,
    %86 = vector.extract_strided_slice %7 {offsets = [0, 144], sizes = [1, 16], strides = [1, 1]} : vector<1x256xf32> to vector<1x16xf32>
    %c1_54 = arith.constant 1 : index
    %c12_55 = arith.constant 12 : index
    %c3_56 = arith.constant 3 : index
    %87 = vector.load %arg4[%c1_54, %c12_55, %c3_56] : memref<2x22x128xf32, #tpu.memory_space<vmem>>, vector<1x1x16xf32>
    %88 = vector.shape_cast %87 : vector<1x1x16xf32> to vector<1x16xf32>
    %89 = vector.shape_cast %86 : vector<1x16xf32> to vector<1x1x16xf32>
    tpu.vector_store %arg4[%c1_54, %c12_55, %c3_56], %89 {strides = array<i32>} : memref<2x22x128xf32, #tpu.memory_space<vmem>>, vector<1x1x16xf32>,
    %90 = vector.extract_strided_slice %5 {offsets = [0, 160], sizes = [1, 16], strides = [1, 1]} : vector<1x256xf32> to vector<1x16xf32>
    %c0_57 = arith.constant 0 : index
    %c13 = arith.constant 13 : index
    %c3_58 = arith.constant 3 : index
    %91 = vector.load %arg4[%c0_57, %c13, %c3_58] : memref<2x22x128xf32, #tpu.memory_space<vmem>>, vector<1x1x16xf32>
    %92 = vector.shape_cast %91 : vector<1x1x16xf32> to vector<1x16xf32>
    %93 = vector.shape_cast %90 : vector<1x16xf32> to vector<1x1x16xf32>
    tpu.vector_store %arg4[%c0_57, %c13, %c3_58], %93 {strides = array<i32>} : memref<2x22x128xf32, #tpu.memory_space<vmem>>, vector<1x1x16xf32>,
    %94 = vector.extract_strided_slice %7 {offsets = [0, 160], sizes = [1, 16], strides = [1, 1]} : vector<1x256xf32> to vector<1x16xf32>
    %c1_59 = arith.constant 1 : index
    %c13_60 = arith.constant 13 : index
    %c3_61 = arith.constant 3 : index
    %95 = vector.load %arg4[%c1_59, %c13_60, %c3_61] : memref<2x22x128xf32, #tpu.memory_space<vmem>>, vector<1x1x16xf32>
    %96 = vector.shape_cast %95 : vector<1x1x16xf32> to vector<1x16xf32>
    %97 = vector.shape_cast %94 : vector<1x16xf32> to vector<1x1x16xf32>
    tpu.vector_store %arg4[%c1_59, %c13_60, %c3_61], %97 {strides = array<i32>} : memref<2x22x128xf32, #tpu.memory_space<vmem>>, vector<1x1x16xf32>,
    %98 = vector.extract_strided_slice %5 {offsets = [0, 176], sizes = [1, 16], strides = [1, 1]} : vector<1x256xf32> to vector<1x16xf32>
    %c0_62 = arith.constant 0 : index
    %c14 = arith.constant 14 : index
    %c3_63 = arith.constant 3 : index
    %99 = vector.load %arg4[%c0_62, %c14, %c3_63] : memref<2x22x128xf32, #tpu.memory_space<vmem>>, vector<1x1x16xf32>
    %100 = vector.shape_cast %99 : vector<1x1x16xf32> to vector<1x16xf32>
    %101 = vector.shape_cast %98 : vector<1x16xf32> to vector<1x1x16xf32>
    tpu.vector_store %arg4[%c0_62, %c14, %c3_63], %101 {strides = array<i32>} : memref<2x22x128xf32, #tpu.memory_space<vmem>>, vector<1x1x16xf32>,
    %102 = vector.extract_strided_slice %7 {offsets = [0, 176], sizes = [1, 16], strides = [1, 1]} : vector<1x256xf32> to vector<1x16xf32>
    %c1_64 = arith.constant 1 : index
    %c14_65 = arith.constant 14 : index
    %c3_66 = arith.constant 3 : index
    %103 = vector.load %arg4[%c1_64, %c14_65, %c3_66] : memref<2x22x128xf32, #tpu.memory_space<vmem>>, vector<1x1x16xf32>
    %104 = vector.shape_cast %103 : vector<1x1x16xf32> to vector<1x16xf32>
    %105 = vector.shape_cast %102 : vector<1x16xf32> to vector<1x1x16xf32>
    tpu.vector_store %arg4[%c1_64, %c14_65, %c3_66], %105 {strides = array<i32>} : memref<2x22x128xf32, #tpu.memory_space<vmem>>, vector<1x1x16xf32>,
    %106 = vector.extract_strided_slice %5 {offsets = [0, 192], sizes = [1, 16], strides = [1, 1]} : vector<1x256xf32> to vector<1x16xf32>
    %c0_67 = arith.constant 0 : index
    %c15 = arith.constant 15 : index
    %c3_68 = arith.constant 3 : index
    %107 = vector.load %arg4[%c0_67, %c15, %c3_68] : memref<2x22x128xf32, #tpu.memory_space<vmem>>, vector<1x1x16xf32>
    %108 = vector.shape_cast %107 : vector<1x1x16xf32> to vector<1x16xf32>
    %109 = vector.shape_cast %106 : vector<1x16xf32> to vector<1x1x16xf32>
    tpu.vector_store %arg4[%c0_67, %c15, %c3_68], %109 {strides = array<i32>} : memref<2x22x128xf32, #tpu.memory_space<vmem>>, vector<1x1x16xf32>,
    %110 = vector.extract_strided_slice %7 {offsets = [0, 192], sizes = [1, 16], strides = [1, 1]} : vector<1x256xf32> to vector<1x16xf32>
    %c1_69 = arith.constant 1 : index
    %c15_70 = arith.constant 15 : index
    %c3_71 = arith.constant 3 : index
    %111 = vector.load %arg4[%c1_69, %c15_70, %c3_71] : memref<2x22x128xf32, #tpu.memory_space<vmem>>, vector<1x1x16xf32>
    %112 = vector.shape_cast %111 : vector<1x1x16xf32> to vector<1x16xf32>
    %113 = vector.shape_cast %110 : vector<1x16xf32> to vector<1x1x16xf32>
    tpu.vector_store %arg4[%c1_69, %c15_70, %c3_71], %113 {strides = array<i32>} : memref<2x22x128xf32, #tpu.memory_space<vmem>>, vector<1x1x16xf32>,
    %114 = vector.extract_strided_slice %5 {offsets = [0, 208], sizes = [1, 16], strides = [1, 1]} : vector<1x256xf32> to vector<1x16xf32>
    %c0_72 = arith.constant 0 : index
    %c16 = arith.constant 16 : index
    %c3_73 = arith.constant 3 : index
    %115 = vector.load %arg4[%c0_72, %c16, %c3_73] : memref<2x22x128xf32, #tpu.memory_space<vmem>>, vector<1x1x16xf32>
    %116 = vector.shape_cast %115 : vector<1x1x16xf32> to vector<1x16xf32>
    %117 = vector.shape_cast %114 : vector<1x16xf32> to vector<1x1x16xf32>
    tpu.vector_store %arg4[%c0_72, %c16, %c3_73], %117 {strides = array<i32>} : memref<2x22x128xf32, #tpu.memory_space<vmem>>, vector<1x1x16xf32>,
    %118 = vector.extract_strided_slice %7 {offsets = [0, 208], sizes = [1, 16], strides = [1, 1]} : vector<1x256xf32> to vector<1x16xf32>
    %c1_74 = arith.constant 1 : index
    %c16_75 = arith.constant 16 : index
    %c3_76 = arith.constant 3 : index
    %119 = vector.load %arg4[%c1_74, %c16_75, %c3_76] : memref<2x22x128xf32, #tpu.memory_space<vmem>>, vector<1x1x16xf32>
    %120 = vector.shape_cast %119 : vector<1x1x16xf32> to vector<1x16xf32>
    %121 = vector.shape_cast %118 : vector<1x16xf32> to vector<1x1x16xf32>
    tpu.vector_store %arg4[%c1_74, %c16_75, %c3_76], %121 {strides = array<i32>} : memref<2x22x128xf32, #tpu.memory_space<vmem>>, vector<1x1x16xf32>,
    %122 = vector.extract_strided_slice %5 {offsets = [0, 224], sizes = [1, 16], strides = [1, 1]} : vector<1x256xf32> to vector<1x16xf32>
    %c0_77 = arith.constant 0 : index
    %c17 = arith.constant 17 : index
    %c3_78 = arith.constant 3 : index
    %123 = vector.load %arg4[%c0_77, %c17, %c3_78] : memref<2x22x128xf32, #tpu.memory_space<vmem>>, vector<1x1x16xf32>
    %124 = vector.shape_cast %123 : vector<1x1x16xf32> to vector<1x16xf32>
    %125 = vector.shape_cast %122 : vector<1x16xf32> to vector<1x1x16xf32>
    tpu.vector_store %arg4[%c0_77, %c17, %c3_78], %125 {strides = array<i32>} : memref<2x22x128xf32, #tpu.memory_space<vmem>>, vector<1x1x16xf32>,
    %126 = vector.extract_strided_slice %7 {offsets = [0, 224], sizes = [1, 16], strides = [1, 1]} : vector<1x256xf32> to vector<1x16xf32>
    %c1_79 = arith.constant 1 : index
    %c17_80 = arith.constant 17 : index
    %c3_81 = arith.constant 3 : index
    %127 = vector.load %arg4[%c1_79, %c17_80, %c3_81] : memref<2x22x128xf32, #tpu.memory_space<vmem>>, vector<1x1x16xf32>
    %128 = vector.shape_cast %127 : vector<1x1x16xf32> to vector<1x16xf32>
    %129 = vector.shape_cast %126 : vector<1x16xf32> to vector<1x1x16xf32>
    tpu.vector_store %arg4[%c1_79, %c17_80, %c3_81], %129 {strides = array<i32>} : memref<2x22x128xf32, #tpu.memory_space<vmem>>, vector<1x1x16xf32>,
    %130 = vector.extract_strided_slice %5 {offsets = [0, 240], sizes = [1, 16], strides = [1, 1]} : vector<1x256xf32> to vector<1x16xf32>
    %c0_82 = arith.constant 0 : index
    %c18 = arith.constant 18 : index
    %c3_83 = arith.constant 3 : index
    %131 = vector.load %arg4[%c0_82, %c18, %c3_83] : memref<2x22x128xf32, #tpu.memory_space<vmem>>, vector<1x1x16xf32>
    %132 = vector.shape_cast %131 : vector<1x1x16xf32> to vector<1x16xf32>
    %133 = vector.shape_cast %130 : vector<1x16xf32> to vector<1x1x16xf32>
    tpu.vector_store %arg4[%c0_82, %c18, %c3_83], %133 {strides = array<i32>} : memref<2x22x128xf32, #tpu.memory_space<vmem>>, vector<1x1x16xf32>,
    %134 = vector.extract_strided_slice %7 {offsets = [0, 240], sizes = [1, 16], strides = [1, 1]} : vector<1x256xf32> to vector<1x16xf32>
    %c1_84 = arith.constant 1 : index
    %c18_85 = arith.constant 18 : index
    %c3_86 = arith.constant 3 : index
    %135 = vector.load %arg4[%c1_84, %c18_85, %c3_86] : memref<2x22x128xf32, #tpu.memory_space<vmem>>, vector<1x1x16xf32>
    %136 = vector.shape_cast %135 : vector<1x1x16xf32> to vector<1x16xf32>
    %137 = vector.shape_cast %134 : vector<1x16xf32> to vector<1x1x16xf32>
    tpu.vector_store %arg4[%c1_84, %c18_85, %c3_86], %137 {strides = array<i32>} : memref<2x22x128xf32, #tpu.memory_space<vmem>>, vector<1x1x16xf32>,
    %cst_87 = arith.constant 0.000000e+00 : f32
    %138 = vector.broadcast %cst_87 : f32 to vector<16x128xf32>
    %cst_88 = arith.constant 0.000000e+00 : f32
    %139 = vector.broadcast %cst_88 : f32 to vector<16x128xf32>
    %cst_89 = arith.constant 0.000000e+00 : f32
    %140 = vector.broadcast %cst_89 : f32 to vector<16x128xf32>
    %cst_90 = arith.constant 0.000000e+00 : f32
    %141 = vector.broadcast %cst_90 : f32 to vector<16x128xf32>
    %c0_91 = arith.constant 0 : index
    %c0_92 = arith.constant 0 : index
    %c0_93 = arith.constant 0 : index
    %142 = vector.load %arg4[%c0_91, %c0_92, %c0_93] : memref<2x22x128xf32, #tpu.memory_space<vmem>>, vector<1x16x128xf32>
    %143 = vector.shape_cast %142 : vector<1x16x128xf32> to vector<16x128xf32>
    %c0_94 = arith.constant 0 : index
    %144 = memref.load %arg1[%c0_94] : memref<98xf32, #tpu.memory_space<smem>>
    %145 = vector.broadcast %144 : f32 to vector<16x128xf32>
    %146 = arith.mulf %145, %143 : vector<16x128xf32>
    %147 = arith.addf %138, %146 : vector<16x128xf32>
    %c1_95 = arith.constant 1 : index
    %148 = memref.load %arg1[%c1_95] : memref<98xf32, #tpu.memory_space<smem>>
    %c127_i32 = arith.constant 127 : i32
    %149 = tpu.dynamic_rotate %143 by %c127_i32 dim 1 : vector<16x128xf32>, i32 -> vector<16x128xf32>
    %150 = vector.broadcast %148 : f32 to vector<16x128xf32>
    %151 = arith.mulf %150, %149 : vector<16x128xf32>
    %152 = arith.addf %139, %151 : vector<16x128xf32>
    %c2 = arith.constant 2 : index
    %153 = memref.load %arg1[%c2] : memref<98xf32, #tpu.memory_space<smem>>
    %c126_i32 = arith.constant 126 : i32
    %154 = tpu.dynamic_rotate %143 by %c126_i32 dim 1 : vector<16x128xf32>, i32 -> vector<16x128xf32>
    %155 = vector.broadcast %153 : f32 to vector<16x128xf32>
    %156 = arith.mulf %155, %154 : vector<16x128xf32>
    %157 = arith.addf %140, %156 : vector<16x128xf32>
    %c3_96 = arith.constant 3 : index
    %158 = memref.load %arg1[%c3_96] : memref<98xf32, #tpu.memory_space<smem>>
    %c125_i32 = arith.constant 125 : i32
    %159 = tpu.dynamic_rotate %143 by %c125_i32 dim 1 : vector<16x128xf32>, i32 -> vector<16x128xf32>
    %160 = vector.broadcast %158 : f32 to vector<16x128xf32>
    %161 = arith.mulf %160, %159 : vector<16x128xf32>
    %162 = arith.addf %141, %161 : vector<16x128xf32>
    %c4_97 = arith.constant 4 : index
    %163 = memref.load %arg1[%c4_97] : memref<98xf32, #tpu.memory_space<smem>>
    %c124_i32 = arith.constant 124 : i32
    %164 = tpu.dynamic_rotate %143 by %c124_i32 dim 1 : vector<16x128xf32>, i32 -> vector<16x128xf32>
    %165 = vector.broadcast %163 : f32 to vector<16x128xf32>
    %166 = arith.mulf %165, %164 : vector<16x128xf32>
    %167 = arith.addf %147, %166 : vector<16x128xf32>
    %c5_98 = arith.constant 5 : index
    %168 = memref.load %arg1[%c5_98] : memref<98xf32, #tpu.memory_space<smem>>
    %c123_i32 = arith.constant 123 : i32
    %169 = tpu.dynamic_rotate %143 by %c123_i32 dim 1 : vector<16x128xf32>, i32 -> vector<16x128xf32>
    %170 = vector.broadcast %168 : f32 to vector<16x128xf32>
    %171 = arith.mulf %170, %169 : vector<16x128xf32>
    %172 = arith.addf %152, %171 : vector<16x128xf32>
    %c6_99 = arith.constant 6 : index
    %173 = memref.load %arg1[%c6_99] : memref<98xf32, #tpu.memory_space<smem>>
    %c122_i32 = arith.constant 122 : i32
    %174 = tpu.dynamic_rotate %143 by %c122_i32 dim 1 : vector<16x128xf32>, i32 -> vector<16x128xf32>
    %175 = vector.broadcast %173 : f32 to vector<16x128xf32>
    %176 = arith.mulf %175, %174 : vector<16x128xf32>
    %177 = arith.addf %157, %176 : vector<16x128xf32>
    %c0_100 = arith.constant 0 : index
    %c1_101 = arith.constant 1 : index
    %c0_102 = arith.constant 0 : index
    %178 = vector.load %arg4[%c0_100, %c1_101, %c0_102] : memref<2x22x128xf32, #tpu.memory_space<vmem>>, vector<1x16x128xf32>
    %179 = vector.shape_cast %178 : vector<1x16x128xf32> to vector<16x128xf32>
    %c7_103 = arith.constant 7 : index
    %180 = memref.load %arg1[%c7_103] : memref<98xf32, #tpu.memory_space<smem>>
    %181 = vector.broadcast %180 : f32 to vector<16x128xf32>
    %182 = arith.mulf %181, %179 : vector<16x128xf32>
    %183 = arith.addf %162, %182 : vector<16x128xf32>
    %c8_104 = arith.constant 8 : index
    %184 = memref.load %arg1[%c8_104] : memref<98xf32, #tpu.memory_space<smem>>
    %c127_i32_105 = arith.constant 127 : i32
    %185 = tpu.dynamic_rotate %179 by %c127_i32_105 dim 1 : vector<16x128xf32>, i32 -> vector<16x128xf32>
    %186 = vector.broadcast %184 : f32 to vector<16x128xf32>
    %187 = arith.mulf %186, %185 : vector<16x128xf32>
    %188 = arith.addf %167, %187 : vector<16x128xf32>
    %c9_106 = arith.constant 9 : index
    %189 = memref.load %arg1[%c9_106] : memref<98xf32, #tpu.memory_space<smem>>
    %c126_i32_107 = arith.constant 126 : i32
    %190 = tpu.dynamic_rotate %179 by %c126_i32_107 dim 1 : vector<16x128xf32>, i32 -> vector<16x128xf32>
    %191 = vector.broadcast %189 : f32 to vector<16x128xf32>
    %192 = arith.mulf %191, %190 : vector<16x128xf32>
    %193 = arith.addf %172, %192 : vector<16x128xf32>
    %c10_108 = arith.constant 10 : index
    %194 = memref.load %arg1[%c10_108] : memref<98xf32, #tpu.memory_space<smem>>
    %c125_i32_109 = arith.constant 125 : i32
    %195 = tpu.dynamic_rotate %179 by %c125_i32_109 dim 1 : vector<16x128xf32>, i32 -> vector<16x128xf32>
    %196 = vector.broadcast %194 : f32 to vector<16x128xf32>
    %197 = arith.mulf %196, %195 : vector<16x128xf32>
    %198 = arith.addf %177, %197 : vector<16x128xf32>
    %c11_110 = arith.constant 11 : index
    %199 = memref.load %arg1[%c11_110] : memref<98xf32, #tpu.memory_space<smem>>
    %c124_i32_111 = arith.constant 124 : i32
    %200 = tpu.dynamic_rotate %179 by %c124_i32_111 dim 1 : vector<16x128xf32>, i32 -> vector<16x128xf32>
    %201 = vector.broadcast %199 : f32 to vector<16x128xf32>
    %202 = arith.mulf %201, %200 : vector<16x128xf32>
    %203 = arith.addf %183, %202 : vector<16x128xf32>
    %c12_112 = arith.constant 12 : index
    %204 = memref.load %arg1[%c12_112] : memref<98xf32, #tpu.memory_space<smem>>
    %c123_i32_113 = arith.constant 123 : i32
    %205 = tpu.dynamic_rotate %179 by %c123_i32_113 dim 1 : vector<16x128xf32>, i32 -> vector<16x128xf32>
    %206 = vector.broadcast %204 : f32 to vector<16x128xf32>
    %207 = arith.mulf %206, %205 : vector<16x128xf32>
    %208 = arith.addf %188, %207 : vector<16x128xf32>
    %c13_114 = arith.constant 13 : index
    %209 = memref.load %arg1[%c13_114] : memref<98xf32, #tpu.memory_space<smem>>
    %c122_i32_115 = arith.constant 122 : i32
    %210 = tpu.dynamic_rotate %179 by %c122_i32_115 dim 1 : vector<16x128xf32>, i32 -> vector<16x128xf32>
    %211 = vector.broadcast %209 : f32 to vector<16x128xf32>
    %212 = arith.mulf %211, %210 : vector<16x128xf32>
    %213 = arith.addf %193, %212 : vector<16x128xf32>
    %c0_116 = arith.constant 0 : index
    %c2_117 = arith.constant 2 : index
    %c0_118 = arith.constant 0 : index
    %214 = vector.load %arg4[%c0_116, %c2_117, %c0_118] : memref<2x22x128xf32, #tpu.memory_space<vmem>>, vector<1x16x128xf32>
    %215 = vector.shape_cast %214 : vector<1x16x128xf32> to vector<16x128xf32>
    %c14_119 = arith.constant 14 : index
    %216 = memref.load %arg1[%c14_119] : memref<98xf32, #tpu.memory_space<smem>>
    %217 = vector.broadcast %216 : f32 to vector<16x128xf32>
    %218 = arith.mulf %217, %215 : vector<16x128xf32>
    %219 = arith.addf %198, %218 : vector<16x128xf32>
    %c15_120 = arith.constant 15 : index
    %220 = memref.load %arg1[%c15_120] : memref<98xf32, #tpu.memory_space<smem>>
    %c127_i32_121 = arith.constant 127 : i32
    %221 = tpu.dynamic_rotate %215 by %c127_i32_121 dim 1 : vector<16x128xf32>, i32 -> vector<16x128xf32>
    %222 = vector.broadcast %220 : f32 to vector<16x128xf32>
    %223 = arith.mulf %222, %221 : vector<16x128xf32>
    %224 = arith.addf %203, %223 : vector<16x128xf32>
    %c16_122 = arith.constant 16 : index
    %225 = memref.load %arg1[%c16_122] : memref<98xf32, #tpu.memory_space<smem>>
    %c126_i32_123 = arith.constant 126 : i32
    %226 = tpu.dynamic_rotate %215 by %c126_i32_123 dim 1 : vector<16x128xf32>, i32 -> vector<16x128xf32>
    %227 = vector.broadcast %225 : f32 to vector<16x128xf32>
    %228 = arith.mulf %227, %226 : vector<16x128xf32>
    %229 = arith.addf %208, %228 : vector<16x128xf32>
    %c17_124 = arith.constant 17 : index
    %230 = memref.load %arg1[%c17_124] : memref<98xf32, #tpu.memory_space<smem>>
    %c125_i32_125 = arith.constant 125 : i32
    %231 = tpu.dynamic_rotate %215 by %c125_i32_125 dim 1 : vector<16x128xf32>, i32 -> vector<16x128xf32>
    %232 = vector.broadcast %230 : f32 to vector<16x128xf32>
    %233 = arith.mulf %232, %231 : vector<16x128xf32>
    %234 = arith.addf %213, %233 : vector<16x128xf32>
    %c18_126 = arith.constant 18 : index
    %235 = memref.load %arg1[%c18_126] : memref<98xf32, #tpu.memory_space<smem>>
    %c124_i32_127 = arith.constant 124 : i32
    %236 = tpu.dynamic_rotate %215 by %c124_i32_127 dim 1 : vector<16x128xf32>, i32 -> vector<16x128xf32>
    %237 = vector.broadcast %235 : f32 to vector<16x128xf32>
    %238 = arith.mulf %237, %236 : vector<16x128xf32>
    %239 = arith.addf %219, %238 : vector<16x128xf32>
    %c19 = arith.constant 19 : index
    %240 = memref.load %arg1[%c19] : memref<98xf32, #tpu.memory_space<smem>>
    %c123_i32_128 = arith.constant 123 : i32
    %241 = tpu.dynamic_rotate %215 by %c123_i32_128 dim 1 : vector<16x128xf32>, i32 -> vector<16x128xf32>
    %242 = vector.broadcast %240 : f32 to vector<16x128xf32>
    %243 = arith.mulf %242, %241 : vector<16x128xf32>
    %244 = arith.addf %224, %243 : vector<16x128xf32>
    %c20 = arith.constant 20 : index
    %245 = memref.load %arg1[%c20] : memref<98xf32, #tpu.memory_space<smem>>
    %c122_i32_129 = arith.constant 122 : i32
    %246 = tpu.dynamic_rotate %215 by %c122_i32_129 dim 1 : vector<16x128xf32>, i32 -> vector<16x128xf32>
    %247 = vector.broadcast %245 : f32 to vector<16x128xf32>
    %248 = arith.mulf %247, %246 : vector<16x128xf32>
    %249 = arith.addf %229, %248 : vector<16x128xf32>
    %c0_130 = arith.constant 0 : index
    %c3_131 = arith.constant 3 : index
    %c0_132 = arith.constant 0 : index
    %250 = vector.load %arg4[%c0_130, %c3_131, %c0_132] : memref<2x22x128xf32, #tpu.memory_space<vmem>>, vector<1x16x128xf32>
    %251 = vector.shape_cast %250 : vector<1x16x128xf32> to vector<16x128xf32>
    %c21 = arith.constant 21 : index
    %252 = memref.load %arg1[%c21] : memref<98xf32, #tpu.memory_space<smem>>
    %253 = vector.broadcast %252 : f32 to vector<16x128xf32>
    %254 = arith.mulf %253, %251 : vector<16x128xf32>
    %255 = arith.addf %234, %254 : vector<16x128xf32>
    %c22 = arith.constant 22 : index
    %256 = memref.load %arg1[%c22] : memref<98xf32, #tpu.memory_space<smem>>
    %c127_i32_133 = arith.constant 127 : i32
    %257 = tpu.dynamic_rotate %251 by %c127_i32_133 dim 1 : vector<16x128xf32>, i32 -> vector<16x128xf32>
    %258 = vector.broadcast %256 : f32 to vector<16x128xf32>
    %259 = arith.mulf %258, %257 : vector<16x128xf32>
    %260 = arith.addf %239, %259 : vector<16x128xf32>
    %c23 = arith.constant 23 : index
    %261 = memref.load %arg1[%c23] : memref<98xf32, #tpu.memory_space<smem>>
    %c126_i32_134 = arith.constant 126 : i32
    %262 = tpu.dynamic_rotate %251 by %c126_i32_134 dim 1 : vector<16x128xf32>, i32 -> vector<16x128xf32>
    %263 = vector.broadcast %261 : f32 to vector<16x128xf32>
    %264 = arith.mulf %263, %262 : vector<16x128xf32>
    %265 = arith.addf %244, %264 : vector<16x128xf32>
    %c24 = arith.constant 24 : index
    %266 = memref.load %arg1[%c24] : memref<98xf32, #tpu.memory_space<smem>>
    %c125_i32_135 = arith.constant 125 : i32
    %267 = tpu.dynamic_rotate %251 by %c125_i32_135 dim 1 : vector<16x128xf32>, i32 -> vector<16x128xf32>
    %268 = vector.broadcast %266 : f32 to vector<16x128xf32>
    %269 = arith.mulf %268, %267 : vector<16x128xf32>
    %270 = arith.addf %249, %269 : vector<16x128xf32>
    %c25 = arith.constant 25 : index
    %271 = memref.load %arg1[%c25] : memref<98xf32, #tpu.memory_space<smem>>
    %c124_i32_136 = arith.constant 124 : i32
    %272 = tpu.dynamic_rotate %251 by %c124_i32_136 dim 1 : vector<16x128xf32>, i32 -> vector<16x128xf32>
    %273 = vector.broadcast %271 : f32 to vector<16x128xf32>
    %274 = arith.mulf %273, %272 : vector<16x128xf32>
    %275 = arith.addf %255, %274 : vector<16x128xf32>
    %c26 = arith.constant 26 : index
    %276 = memref.load %arg1[%c26] : memref<98xf32, #tpu.memory_space<smem>>
    %c123_i32_137 = arith.constant 123 : i32
    %277 = tpu.dynamic_rotate %251 by %c123_i32_137 dim 1 : vector<16x128xf32>, i32 -> vector<16x128xf32>
    %278 = vector.broadcast %276 : f32 to vector<16x128xf32>
    %279 = arith.mulf %278, %277 : vector<16x128xf32>
    %280 = arith.addf %260, %279 : vector<16x128xf32>
    %c27 = arith.constant 27 : index
    %281 = memref.load %arg1[%c27] : memref<98xf32, #tpu.memory_space<smem>>
    %c122_i32_138 = arith.constant 122 : i32
    %282 = tpu.dynamic_rotate %251 by %c122_i32_138 dim 1 : vector<16x128xf32>, i32 -> vector<16x128xf32>
    %283 = vector.broadcast %281 : f32 to vector<16x128xf32>
    %284 = arith.mulf %283, %282 : vector<16x128xf32>
    %285 = arith.addf %265, %284 : vector<16x128xf32>
    %c0_139 = arith.constant 0 : index
    %c4_140 = arith.constant 4 : index
    %c0_141 = arith.constant 0 : index
    %286 = vector.load %arg4[%c0_139, %c4_140, %c0_141] : memref<2x22x128xf32, #tpu.memory_space<vmem>>, vector<1x16x128xf32>
    %287 = vector.shape_cast %286 : vector<1x16x128xf32> to vector<16x128xf32>
    %c28 = arith.constant 28 : index
    %288 = memref.load %arg1[%c28] : memref<98xf32, #tpu.memory_space<smem>>
    %289 = vector.broadcast %288 : f32 to vector<16x128xf32>
    %290 = arith.mulf %289, %287 : vector<16x128xf32>
    %291 = arith.addf %270, %290 : vector<16x128xf32>
    %c29 = arith.constant 29 : index
    %292 = memref.load %arg1[%c29] : memref<98xf32, #tpu.memory_space<smem>>
    %c127_i32_142 = arith.constant 127 : i32
    %293 = tpu.dynamic_rotate %287 by %c127_i32_142 dim 1 : vector<16x128xf32>, i32 -> vector<16x128xf32>
    %294 = vector.broadcast %292 : f32 to vector<16x128xf32>
    %295 = arith.mulf %294, %293 : vector<16x128xf32>
    %296 = arith.addf %275, %295 : vector<16x128xf32>
    %c30 = arith.constant 30 : index
    %297 = memref.load %arg1[%c30] : memref<98xf32, #tpu.memory_space<smem>>
    %c126_i32_143 = arith.constant 126 : i32
    %298 = tpu.dynamic_rotate %287 by %c126_i32_143 dim 1 : vector<16x128xf32>, i32 -> vector<16x128xf32>
    %299 = vector.broadcast %297 : f32 to vector<16x128xf32>
    %300 = arith.mulf %299, %298 : vector<16x128xf32>
    %301 = arith.addf %280, %300 : vector<16x128xf32>
    %c31 = arith.constant 31 : index
    %302 = memref.load %arg1[%c31] : memref<98xf32, #tpu.memory_space<smem>>
    %c125_i32_144 = arith.constant 125 : i32
    %303 = tpu.dynamic_rotate %287 by %c125_i32_144 dim 1 : vector<16x128xf32>, i32 -> vector<16x128xf32>
    %304 = vector.broadcast %302 : f32 to vector<16x128xf32>
    %305 = arith.mulf %304, %303 : vector<16x128xf32>
    %306 = arith.addf %285, %305 : vector<16x128xf32>
    %c32 = arith.constant 32 : index
    %307 = memref.load %arg1[%c32] : memref<98xf32, #tpu.memory_space<smem>>
    %c124_i32_145 = arith.constant 124 : i32
    %308 = tpu.dynamic_rotate %287 by %c124_i32_145 dim 1 : vector<16x128xf32>, i32 -> vector<16x128xf32>
    %309 = vector.broadcast %307 : f32 to vector<16x128xf32>
    %310 = arith.mulf %309, %308 : vector<16x128xf32>
    %311 = arith.addf %291, %310 : vector<16x128xf32>
    %c33 = arith.constant 33 : index
    %312 = memref.load %arg1[%c33] : memref<98xf32, #tpu.memory_space<smem>>
    %c123_i32_146 = arith.constant 123 : i32
    %313 = tpu.dynamic_rotate %287 by %c123_i32_146 dim 1 : vector<16x128xf32>, i32 -> vector<16x128xf32>
    %314 = vector.broadcast %312 : f32 to vector<16x128xf32>
    %315 = arith.mulf %314, %313 : vector<16x128xf32>
    %316 = arith.addf %296, %315 : vector<16x128xf32>
    %c34 = arith.constant 34 : index
    %317 = memref.load %arg1[%c34] : memref<98xf32, #tpu.memory_space<smem>>
    %c122_i32_147 = arith.constant 122 : i32
    %318 = tpu.dynamic_rotate %287 by %c122_i32_147 dim 1 : vector<16x128xf32>, i32 -> vector<16x128xf32>
    %319 = vector.broadcast %317 : f32 to vector<16x128xf32>
    %320 = arith.mulf %319, %318 : vector<16x128xf32>
    %321 = arith.addf %301, %320 : vector<16x128xf32>
    %c0_148 = arith.constant 0 : index
    %c5_149 = arith.constant 5 : index
    %c0_150 = arith.constant 0 : index
    %322 = vector.load %arg4[%c0_148, %c5_149, %c0_150] : memref<2x22x128xf32, #tpu.memory_space<vmem>>, vector<1x16x128xf32>
    %323 = vector.shape_cast %322 : vector<1x16x128xf32> to vector<16x128xf32>
    %c35 = arith.constant 35 : index
    %324 = memref.load %arg1[%c35] : memref<98xf32, #tpu.memory_space<smem>>
    %325 = vector.broadcast %324 : f32 to vector<16x128xf32>
    %326 = arith.mulf %325, %323 : vector<16x128xf32>
    %327 = arith.addf %306, %326 : vector<16x128xf32>
    %c36 = arith.constant 36 : index
    %328 = memref.load %arg1[%c36] : memref<98xf32, #tpu.memory_space<smem>>
    %c127_i32_151 = arith.constant 127 : i32
    %329 = tpu.dynamic_rotate %323 by %c127_i32_151 dim 1 : vector<16x128xf32>, i32 -> vector<16x128xf32>
    %330 = vector.broadcast %328 : f32 to vector<16x128xf32>
    %331 = arith.mulf %330, %329 : vector<16x128xf32>
    %332 = arith.addf %311, %331 : vector<16x128xf32>
    %c37 = arith.constant 37 : index
    %333 = memref.load %arg1[%c37] : memref<98xf32, #tpu.memory_space<smem>>
    %c126_i32_152 = arith.constant 126 : i32
    %334 = tpu.dynamic_rotate %323 by %c126_i32_152 dim 1 : vector<16x128xf32>, i32 -> vector<16x128xf32>
    %335 = vector.broadcast %333 : f32 to vector<16x128xf32>
    %336 = arith.mulf %335, %334 : vector<16x128xf32>
    %337 = arith.addf %316, %336 : vector<16x128xf32>
    %c38 = arith.constant 38 : index
    %338 = memref.load %arg1[%c38] : memref<98xf32, #tpu.memory_space<smem>>
    %c125_i32_153 = arith.constant 125 : i32
    %339 = tpu.dynamic_rotate %323 by %c125_i32_153 dim 1 : vector<16x128xf32>, i32 -> vector<16x128xf32>
    %340 = vector.broadcast %338 : f32 to vector<16x128xf32>
    %341 = arith.mulf %340, %339 : vector<16x128xf32>
    %342 = arith.addf %321, %341 : vector<16x128xf32>
    %c39 = arith.constant 39 : index
    %343 = memref.load %arg1[%c39] : memref<98xf32, #tpu.memory_space<smem>>
    %c124_i32_154 = arith.constant 124 : i32
    %344 = tpu.dynamic_rotate %323 by %c124_i32_154 dim 1 : vector<16x128xf32>, i32 -> vector<16x128xf32>
    %345 = vector.broadcast %343 : f32 to vector<16x128xf32>
    %346 = arith.mulf %345, %344 : vector<16x128xf32>
    %347 = arith.addf %327, %346 : vector<16x128xf32>
    %c40 = arith.constant 40 : index
    %348 = memref.load %arg1[%c40] : memref<98xf32, #tpu.memory_space<smem>>
    %c123_i32_155 = arith.constant 123 : i32
    %349 = tpu.dynamic_rotate %323 by %c123_i32_155 dim 1 : vector<16x128xf32>, i32 -> vector<16x128xf32>
    %350 = vector.broadcast %348 : f32 to vector<16x128xf32>
    %351 = arith.mulf %350, %349 : vector<16x128xf32>
    %352 = arith.addf %332, %351 : vector<16x128xf32>
    %c41 = arith.constant 41 : index
    %353 = memref.load %arg1[%c41] : memref<98xf32, #tpu.memory_space<smem>>
    %c122_i32_156 = arith.constant 122 : i32
    %354 = tpu.dynamic_rotate %323 by %c122_i32_156 dim 1 : vector<16x128xf32>, i32 -> vector<16x128xf32>
    %355 = vector.broadcast %353 : f32 to vector<16x128xf32>
    %356 = arith.mulf %355, %354 : vector<16x128xf32>
    %357 = arith.addf %337, %356 : vector<16x128xf32>
    %c0_157 = arith.constant 0 : index
    %c6_158 = arith.constant 6 : index
    %c0_159 = arith.constant 0 : index
    %358 = vector.load %arg4[%c0_157, %c6_158, %c0_159] : memref<2x22x128xf32, #tpu.memory_space<vmem>>, vector<1x16x128xf32>
    %359 = vector.shape_cast %358 : vector<1x16x128xf32> to vector<16x128xf32>
    %c42 = arith.constant 42 : index
    %360 = memref.load %arg1[%c42] : memref<98xf32, #tpu.memory_space<smem>>
    %361 = vector.broadcast %360 : f32 to vector<16x128xf32>
    %362 = arith.mulf %361, %359 : vector<16x128xf32>
    %363 = arith.addf %342, %362 : vector<16x128xf32>
    %c43 = arith.constant 43 : index
    %364 = memref.load %arg1[%c43] : memref<98xf32, #tpu.memory_space<smem>>
    %c127_i32_160 = arith.constant 127 : i32
    %365 = tpu.dynamic_rotate %359 by %c127_i32_160 dim 1 : vector<16x128xf32>, i32 -> vector<16x128xf32>
    %366 = vector.broadcast %364 : f32 to vector<16x128xf32>
    %367 = arith.mulf %366, %365 : vector<16x128xf32>
    %368 = arith.addf %347, %367 : vector<16x128xf32>
    %c44 = arith.constant 44 : index
    %369 = memref.load %arg1[%c44] : memref<98xf32, #tpu.memory_space<smem>>
    %c126_i32_161 = arith.constant 126 : i32
    %370 = tpu.dynamic_rotate %359 by %c126_i32_161 dim 1 : vector<16x128xf32>, i32 -> vector<16x128xf32>
    %371 = vector.broadcast %369 : f32 to vector<16x128xf32>
    %372 = arith.mulf %371, %370 : vector<16x128xf32>
    %373 = arith.addf %352, %372 : vector<16x128xf32>
    %c45 = arith.constant 45 : index
    %374 = memref.load %arg1[%c45] : memref<98xf32, #tpu.memory_space<smem>>
    %c125_i32_162 = arith.constant 125 : i32
    %375 = tpu.dynamic_rotate %359 by %c125_i32_162 dim 1 : vector<16x128xf32>, i32 -> vector<16x128xf32>
    %376 = vector.broadcast %374 : f32 to vector<16x128xf32>
    %377 = arith.mulf %376, %375 : vector<16x128xf32>
    %378 = arith.addf %357, %377 : vector<16x128xf32>
    %c46 = arith.constant 46 : index
    %379 = memref.load %arg1[%c46] : memref<98xf32, #tpu.memory_space<smem>>
    %c124_i32_163 = arith.constant 124 : i32
    %380 = tpu.dynamic_rotate %359 by %c124_i32_163 dim 1 : vector<16x128xf32>, i32 -> vector<16x128xf32>
    %381 = vector.broadcast %379 : f32 to vector<16x128xf32>
    %382 = arith.mulf %381, %380 : vector<16x128xf32>
    %383 = arith.addf %363, %382 : vector<16x128xf32>
    %c47 = arith.constant 47 : index
    %384 = memref.load %arg1[%c47] : memref<98xf32, #tpu.memory_space<smem>>
    %c123_i32_164 = arith.constant 123 : i32
    %385 = tpu.dynamic_rotate %359 by %c123_i32_164 dim 1 : vector<16x128xf32>, i32 -> vector<16x128xf32>
    %386 = vector.broadcast %384 : f32 to vector<16x128xf32>
    %387 = arith.mulf %386, %385 : vector<16x128xf32>
    %388 = arith.addf %368, %387 : vector<16x128xf32>
    %c48 = arith.constant 48 : index
    %389 = memref.load %arg1[%c48] : memref<98xf32, #tpu.memory_space<smem>>
    %c122_i32_165 = arith.constant 122 : i32
    %390 = tpu.dynamic_rotate %359 by %c122_i32_165 dim 1 : vector<16x128xf32>, i32 -> vector<16x128xf32>
    %391 = vector.broadcast %389 : f32 to vector<16x128xf32>
    %392 = arith.mulf %391, %390 : vector<16x128xf32>
    %393 = arith.addf %373, %392 : vector<16x128xf32>
    %c1_166 = arith.constant 1 : index
    %c0_167 = arith.constant 0 : index
    %c0_168 = arith.constant 0 : index
    %394 = vector.load %arg4[%c1_166, %c0_167, %c0_168] : memref<2x22x128xf32, #tpu.memory_space<vmem>>, vector<1x16x128xf32>
    %395 = vector.shape_cast %394 : vector<1x16x128xf32> to vector<16x128xf32>
    %c49 = arith.constant 49 : index
    %396 = memref.load %arg1[%c49] : memref<98xf32, #tpu.memory_space<smem>>
    %397 = vector.broadcast %396 : f32 to vector<16x128xf32>
    %398 = arith.mulf %397, %395 : vector<16x128xf32>
    %399 = arith.addf %378, %398 : vector<16x128xf32>
    %c50 = arith.constant 50 : index
    %400 = memref.load %arg1[%c50] : memref<98xf32, #tpu.memory_space<smem>>
    %c127_i32_169 = arith.constant 127 : i32
    %401 = tpu.dynamic_rotate %395 by %c127_i32_169 dim 1 : vector<16x128xf32>, i32 -> vector<16x128xf32>
    %402 = vector.broadcast %400 : f32 to vector<16x128xf32>
    %403 = arith.mulf %402, %401 : vector<16x128xf32>
    %404 = arith.addf %383, %403 : vector<16x128xf32>
    %c51 = arith.constant 51 : index
    %405 = memref.load %arg1[%c51] : memref<98xf32, #tpu.memory_space<smem>>
    %c126_i32_170 = arith.constant 126 : i32
    %406 = tpu.dynamic_rotate %395 by %c126_i32_170 dim 1 : vector<16x128xf32>, i32 -> vector<16x128xf32>
    %407 = vector.broadcast %405 : f32 to vector<16x128xf32>
    %408 = arith.mulf %407, %406 : vector<16x128xf32>
    %409 = arith.addf %388, %408 : vector<16x128xf32>
    %c52 = arith.constant 52 : index
    %410 = memref.load %arg1[%c52] : memref<98xf32, #tpu.memory_space<smem>>
    %c125_i32_171 = arith.constant 125 : i32
    %411 = tpu.dynamic_rotate %395 by %c125_i32_171 dim 1 : vector<16x128xf32>, i32 -> vector<16x128xf32>
    %412 = vector.broadcast %410 : f32 to vector<16x128xf32>
    %413 = arith.mulf %412, %411 : vector<16x128xf32>
    %414 = arith.addf %393, %413 : vector<16x128xf32>
    %c53 = arith.constant 53 : index
    %415 = memref.load %arg1[%c53] : memref<98xf32, #tpu.memory_space<smem>>
    %c124_i32_172 = arith.constant 124 : i32
    %416 = tpu.dynamic_rotate %395 by %c124_i32_172 dim 1 : vector<16x128xf32>, i32 -> vector<16x128xf32>
    %417 = vector.broadcast %415 : f32 to vector<16x128xf32>
    %418 = arith.mulf %417, %416 : vector<16x128xf32>
    %419 = arith.addf %399, %418 : vector<16x128xf32>
    %c54 = arith.constant 54 : index
    %420 = memref.load %arg1[%c54] : memref<98xf32, #tpu.memory_space<smem>>
    %c123_i32_173 = arith.constant 123 : i32
    %421 = tpu.dynamic_rotate %395 by %c123_i32_173 dim 1 : vector<16x128xf32>, i32 -> vector<16x128xf32>
    %422 = vector.broadcast %420 : f32 to vector<16x128xf32>
    %423 = arith.mulf %422, %421 : vector<16x128xf32>
    %424 = arith.addf %404, %423 : vector<16x128xf32>
    %c55 = arith.constant 55 : index
    %425 = memref.load %arg1[%c55] : memref<98xf32, #tpu.memory_space<smem>>
    %c122_i32_174 = arith.constant 122 : i32
    %426 = tpu.dynamic_rotate %395 by %c122_i32_174 dim 1 : vector<16x128xf32>, i32 -> vector<16x128xf32>
    %427 = vector.broadcast %425 : f32 to vector<16x128xf32>
    %428 = arith.mulf %427, %426 : vector<16x128xf32>
    %429 = arith.addf %409, %428 : vector<16x128xf32>
    %c1_175 = arith.constant 1 : index
    %c1_176 = arith.constant 1 : index
    %c0_177 = arith.constant 0 : index
    %430 = vector.load %arg4[%c1_175, %c1_176, %c0_177] : memref<2x22x128xf32, #tpu.memory_space<vmem>>, vector<1x16x128xf32>
    %431 = vector.shape_cast %430 : vector<1x16x128xf32> to vector<16x128xf32>
    %c56 = arith.constant 56 : index
    %432 = memref.load %arg1[%c56] : memref<98xf32, #tpu.memory_space<smem>>
    %433 = vector.broadcast %432 : f32 to vector<16x128xf32>
    %434 = arith.mulf %433, %431 : vector<16x128xf32>
    %435 = arith.addf %414, %434 : vector<16x128xf32>
    %c57 = arith.constant 57 : index
    %436 = memref.load %arg1[%c57] : memref<98xf32, #tpu.memory_space<smem>>
    %c127_i32_178 = arith.constant 127 : i32
    %437 = tpu.dynamic_rotate %431 by %c127_i32_178 dim 1 : vector<16x128xf32>, i32 -> vector<16x128xf32>
    %438 = vector.broadcast %436 : f32 to vector<16x128xf32>
    %439 = arith.mulf %438, %437 : vector<16x128xf32>
    %440 = arith.addf %419, %439 : vector<16x128xf32>
    %c58 = arith.constant 58 : index
    %441 = memref.load %arg1[%c58] : memref<98xf32, #tpu.memory_space<smem>>
    %c126_i32_179 = arith.constant 126 : i32
    %442 = tpu.dynamic_rotate %431 by %c126_i32_179 dim 1 : vector<16x128xf32>, i32 -> vector<16x128xf32>
    %443 = vector.broadcast %441 : f32 to vector<16x128xf32>
    %444 = arith.mulf %443, %442 : vector<16x128xf32>
    %445 = arith.addf %424, %444 : vector<16x128xf32>
    %c59 = arith.constant 59 : index
    %446 = memref.load %arg1[%c59] : memref<98xf32, #tpu.memory_space<smem>>
    %c125_i32_180 = arith.constant 125 : i32
    %447 = tpu.dynamic_rotate %431 by %c125_i32_180 dim 1 : vector<16x128xf32>, i32 -> vector<16x128xf32>
    %448 = vector.broadcast %446 : f32 to vector<16x128xf32>
    %449 = arith.mulf %448, %447 : vector<16x128xf32>
    %450 = arith.addf %429, %449 : vector<16x128xf32>
    %c60 = arith.constant 60 : index
    %451 = memref.load %arg1[%c60] : memref<98xf32, #tpu.memory_space<smem>>
    %c124_i32_181 = arith.constant 124 : i32
    %452 = tpu.dynamic_rotate %431 by %c124_i32_181 dim 1 : vector<16x128xf32>, i32 -> vector<16x128xf32>
    %453 = vector.broadcast %451 : f32 to vector<16x128xf32>
    %454 = arith.mulf %453, %452 : vector<16x128xf32>
    %455 = arith.addf %435, %454 : vector<16x128xf32>
    %c61 = arith.constant 61 : index
    %456 = memref.load %arg1[%c61] : memref<98xf32, #tpu.memory_space<smem>>
    %c123_i32_182 = arith.constant 123 : i32
    %457 = tpu.dynamic_rotate %431 by %c123_i32_182 dim 1 : vector<16x128xf32>, i32 -> vector<16x128xf32>
    %458 = vector.broadcast %456 : f32 to vector<16x128xf32>
    %459 = arith.mulf %458, %457 : vector<16x128xf32>
    %460 = arith.addf %440, %459 : vector<16x128xf32>
    %c62 = arith.constant 62 : index
    %461 = memref.load %arg1[%c62] : memref<98xf32, #tpu.memory_space<smem>>
    %c122_i32_183 = arith.constant 122 : i32
    %462 = tpu.dynamic_rotate %431 by %c122_i32_183 dim 1 : vector<16x128xf32>, i32 -> vector<16x128xf32>
    %463 = vector.broadcast %461 : f32 to vector<16x128xf32>
    %464 = arith.mulf %463, %462 : vector<16x128xf32>
    %465 = arith.addf %445, %464 : vector<16x128xf32>
    %c1_184 = arith.constant 1 : index
    %c2_185 = arith.constant 2 : index
    %c0_186 = arith.constant 0 : index
    %466 = vector.load %arg4[%c1_184, %c2_185, %c0_186] : memref<2x22x128xf32, #tpu.memory_space<vmem>>, vector<1x16x128xf32>
    %467 = vector.shape_cast %466 : vector<1x16x128xf32> to vector<16x128xf32>
    %c63 = arith.constant 63 : index
    %468 = memref.load %arg1[%c63] : memref<98xf32, #tpu.memory_space<smem>>
    %469 = vector.broadcast %468 : f32 to vector<16x128xf32>
    %470 = arith.mulf %469, %467 : vector<16x128xf32>
    %471 = arith.addf %450, %470 : vector<16x128xf32>
    %c64 = arith.constant 64 : index
    %472 = memref.load %arg1[%c64] : memref<98xf32, #tpu.memory_space<smem>>
    %c127_i32_187 = arith.constant 127 : i32
    %473 = tpu.dynamic_rotate %467 by %c127_i32_187 dim 1 : vector<16x128xf32>, i32 -> vector<16x128xf32>
    %474 = vector.broadcast %472 : f32 to vector<16x128xf32>
    %475 = arith.mulf %474, %473 : vector<16x128xf32>
    %476 = arith.addf %455, %475 : vector<16x128xf32>
    %c65 = arith.constant 65 : index
    %477 = memref.load %arg1[%c65] : memref<98xf32, #tpu.memory_space<smem>>
    %c126_i32_188 = arith.constant 126 : i32
    %478 = tpu.dynamic_rotate %467 by %c126_i32_188 dim 1 : vector<16x128xf32>, i32 -> vector<16x128xf32>
    %479 = vector.broadcast %477 : f32 to vector<16x128xf32>
    %480 = arith.mulf %479, %478 : vector<16x128xf32>
    %481 = arith.addf %460, %480 : vector<16x128xf32>
    %c66 = arith.constant 66 : index
    %482 = memref.load %arg1[%c66] : memref<98xf32, #tpu.memory_space<smem>>
    %c125_i32_189 = arith.constant 125 : i32
    %483 = tpu.dynamic_rotate %467 by %c125_i32_189 dim 1 : vector<16x128xf32>, i32 -> vector<16x128xf32>
    %484 = vector.broadcast %482 : f32 to vector<16x128xf32>
    %485 = arith.mulf %484, %483 : vector<16x128xf32>
    %486 = arith.addf %465, %485 : vector<16x128xf32>
    %c67 = arith.constant 67 : index
    %487 = memref.load %arg1[%c67] : memref<98xf32, #tpu.memory_space<smem>>
    %c124_i32_190 = arith.constant 124 : i32
    %488 = tpu.dynamic_rotate %467 by %c124_i32_190 dim 1 : vector<16x128xf32>, i32 -> vector<16x128xf32>
    %489 = vector.broadcast %487 : f32 to vector<16x128xf32>
    %490 = arith.mulf %489, %488 : vector<16x128xf32>
    %491 = arith.addf %471, %490 : vector<16x128xf32>
    %c68 = arith.constant 68 : index
    %492 = memref.load %arg1[%c68] : memref<98xf32, #tpu.memory_space<smem>>
    %c123_i32_191 = arith.constant 123 : i32
    %493 = tpu.dynamic_rotate %467 by %c123_i32_191 dim 1 : vector<16x128xf32>, i32 -> vector<16x128xf32>
    %494 = vector.broadcast %492 : f32 to vector<16x128xf32>
    %495 = arith.mulf %494, %493 : vector<16x128xf32>
    %496 = arith.addf %476, %495 : vector<16x128xf32>
    %c69 = arith.constant 69 : index
    %497 = memref.load %arg1[%c69] : memref<98xf32, #tpu.memory_space<smem>>
    %c122_i32_192 = arith.constant 122 : i32
    %498 = tpu.dynamic_rotate %467 by %c122_i32_192 dim 1 : vector<16x128xf32>, i32 -> vector<16x128xf32>
    %499 = vector.broadcast %497 : f32 to vector<16x128xf32>
    %500 = arith.mulf %499, %498 : vector<16x128xf32>
    %501 = arith.addf %481, %500 : vector<16x128xf32>
    %c1_193 = arith.constant 1 : index
    %c3_194 = arith.constant 3 : index
    %c0_195 = arith.constant 0 : index
    %502 = vector.load %arg4[%c1_193, %c3_194, %c0_195] : memref<2x22x128xf32, #tpu.memory_space<vmem>>, vector<1x16x128xf32>
    %503 = vector.shape_cast %502 : vector<1x16x128xf32> to vector<16x128xf32>
    %c70 = arith.constant 70 : index
    %504 = memref.load %arg1[%c70] : memref<98xf32, #tpu.memory_space<smem>>
    %505 = vector.broadcast %504 : f32 to vector<16x128xf32>
    %506 = arith.mulf %505, %503 : vector<16x128xf32>
    %507 = arith.addf %486, %506 : vector<16x128xf32>
    %c71 = arith.constant 71 : index
    %508 = memref.load %arg1[%c71] : memref<98xf32, #tpu.memory_space<smem>>
    %c127_i32_196 = arith.constant 127 : i32
    %509 = tpu.dynamic_rotate %503 by %c127_i32_196 dim 1 : vector<16x128xf32>, i32 -> vector<16x128xf32>
    %510 = vector.broadcast %508 : f32 to vector<16x128xf32>
    %511 = arith.mulf %510, %509 : vector<16x128xf32>
    %512 = arith.addf %491, %511 : vector<16x128xf32>
    %c72 = arith.constant 72 : index
    %513 = memref.load %arg1[%c72] : memref<98xf32, #tpu.memory_space<smem>>
    %c126_i32_197 = arith.constant 126 : i32
    %514 = tpu.dynamic_rotate %503 by %c126_i32_197 dim 1 : vector<16x128xf32>, i32 -> vector<16x128xf32>
    %515 = vector.broadcast %513 : f32 to vector<16x128xf32>
    %516 = arith.mulf %515, %514 : vector<16x128xf32>
    %517 = arith.addf %496, %516 : vector<16x128xf32>
    %c73 = arith.constant 73 : index
    %518 = memref.load %arg1[%c73] : memref<98xf32, #tpu.memory_space<smem>>
    %c125_i32_198 = arith.constant 125 : i32
    %519 = tpu.dynamic_rotate %503 by %c125_i32_198 dim 1 : vector<16x128xf32>, i32 -> vector<16x128xf32>
    %520 = vector.broadcast %518 : f32 to vector<16x128xf32>
    %521 = arith.mulf %520, %519 : vector<16x128xf32>
    %522 = arith.addf %501, %521 : vector<16x128xf32>
    %c74 = arith.constant 74 : index
    %523 = memref.load %arg1[%c74] : memref<98xf32, #tpu.memory_space<smem>>
    %c124_i32_199 = arith.constant 124 : i32
    %524 = tpu.dynamic_rotate %503 by %c124_i32_199 dim 1 : vector<16x128xf32>, i32 -> vector<16x128xf32>
    %525 = vector.broadcast %523 : f32 to vector<16x128xf32>
    %526 = arith.mulf %525, %524 : vector<16x128xf32>
    %527 = arith.addf %507, %526 : vector<16x128xf32>
    %c75 = arith.constant 75 : index
    %528 = memref.load %arg1[%c75] : memref<98xf32, #tpu.memory_space<smem>>
    %c123_i32_200 = arith.constant 123 : i32
    %529 = tpu.dynamic_rotate %503 by %c123_i32_200 dim 1 : vector<16x128xf32>, i32 -> vector<16x128xf32>
    %530 = vector.broadcast %528 : f32 to vector<16x128xf32>
    %531 = arith.mulf %530, %529 : vector<16x128xf32>
    %532 = arith.addf %512, %531 : vector<16x128xf32>
    %c76 = arith.constant 76 : index
    %533 = memref.load %arg1[%c76] : memref<98xf32, #tpu.memory_space<smem>>
    %c122_i32_201 = arith.constant 122 : i32
    %534 = tpu.dynamic_rotate %503 by %c122_i32_201 dim 1 : vector<16x128xf32>, i32 -> vector<16x128xf32>
    %535 = vector.broadcast %533 : f32 to vector<16x128xf32>
    %536 = arith.mulf %535, %534 : vector<16x128xf32>
    %537 = arith.addf %517, %536 : vector<16x128xf32>
    %c1_202 = arith.constant 1 : index
    %c4_203 = arith.constant 4 : index
    %c0_204 = arith.constant 0 : index
    %538 = vector.load %arg4[%c1_202, %c4_203, %c0_204] : memref<2x22x128xf32, #tpu.memory_space<vmem>>, vector<1x16x128xf32>
    %539 = vector.shape_cast %538 : vector<1x16x128xf32> to vector<16x128xf32>
    %c77 = arith.constant 77 : index
    %540 = memref.load %arg1[%c77] : memref<98xf32, #tpu.memory_space<smem>>
    %541 = vector.broadcast %540 : f32 to vector<16x128xf32>
    %542 = arith.mulf %541, %539 : vector<16x128xf32>
    %543 = arith.addf %522, %542 : vector<16x128xf32>
    %c78 = arith.constant 78 : index
    %544 = memref.load %arg1[%c78] : memref<98xf32, #tpu.memory_space<smem>>
    %c127_i32_205 = arith.constant 127 : i32
    %545 = tpu.dynamic_rotate %539 by %c127_i32_205 dim 1 : vector<16x128xf32>, i32 -> vector<16x128xf32>
    %546 = vector.broadcast %544 : f32 to vector<16x128xf32>
    %547 = arith.mulf %546, %545 : vector<16x128xf32>
    %548 = arith.addf %527, %547 : vector<16x128xf32>
    %c79 = arith.constant 79 : index
    %549 = memref.load %arg1[%c79] : memref<98xf32, #tpu.memory_space<smem>>
    %c126_i32_206 = arith.constant 126 : i32
    %550 = tpu.dynamic_rotate %539 by %c126_i32_206 dim 1 : vector<16x128xf32>, i32 -> vector<16x128xf32>
    %551 = vector.broadcast %549 : f32 to vector<16x128xf32>
    %552 = arith.mulf %551, %550 : vector<16x128xf32>
    %553 = arith.addf %532, %552 : vector<16x128xf32>
    %c80 = arith.constant 80 : index
    %554 = memref.load %arg1[%c80] : memref<98xf32, #tpu.memory_space<smem>>
    %c125_i32_207 = arith.constant 125 : i32
    %555 = tpu.dynamic_rotate %539 by %c125_i32_207 dim 1 : vector<16x128xf32>, i32 -> vector<16x128xf32>
    %556 = vector.broadcast %554 : f32 to vector<16x128xf32>
    %557 = arith.mulf %556, %555 : vector<16x128xf32>
    %558 = arith.addf %537, %557 : vector<16x128xf32>
    %c81 = arith.constant 81 : index
    %559 = memref.load %arg1[%c81] : memref<98xf32, #tpu.memory_space<smem>>
    %c124_i32_208 = arith.constant 124 : i32
    %560 = tpu.dynamic_rotate %539 by %c124_i32_208 dim 1 : vector<16x128xf32>, i32 -> vector<16x128xf32>
    %561 = vector.broadcast %559 : f32 to vector<16x128xf32>
    %562 = arith.mulf %561, %560 : vector<16x128xf32>
    %563 = arith.addf %543, %562 : vector<16x128xf32>
    %c82 = arith.constant 82 : index
    %564 = memref.load %arg1[%c82] : memref<98xf32, #tpu.memory_space<smem>>
    %c123_i32_209 = arith.constant 123 : i32
    %565 = tpu.dynamic_rotate %539 by %c123_i32_209 dim 1 : vector<16x128xf32>, i32 -> vector<16x128xf32>
    %566 = vector.broadcast %564 : f32 to vector<16x128xf32>
    %567 = arith.mulf %566, %565 : vector<16x128xf32>
    %568 = arith.addf %548, %567 : vector<16x128xf32>
    %c83 = arith.constant 83 : index
    %569 = memref.load %arg1[%c83] : memref<98xf32, #tpu.memory_space<smem>>
    %c122_i32_210 = arith.constant 122 : i32
    %570 = tpu.dynamic_rotate %539 by %c122_i32_210 dim 1 : vector<16x128xf32>, i32 -> vector<16x128xf32>
    %571 = vector.broadcast %569 : f32 to vector<16x128xf32>
    %572 = arith.mulf %571, %570 : vector<16x128xf32>
    %573 = arith.addf %553, %572 : vector<16x128xf32>
    %c1_211 = arith.constant 1 : index
    %c5_212 = arith.constant 5 : index
    %c0_213 = arith.constant 0 : index
    %574 = vector.load %arg4[%c1_211, %c5_212, %c0_213] : memref<2x22x128xf32, #tpu.memory_space<vmem>>, vector<1x16x128xf32>
    %575 = vector.shape_cast %574 : vector<1x16x128xf32> to vector<16x128xf32>
    %c84 = arith.constant 84 : index
    %576 = memref.load %arg1[%c84] : memref<98xf32, #tpu.memory_space<smem>>
    %577 = vector.broadcast %576 : f32 to vector<16x128xf32>
    %578 = arith.mulf %577, %575 : vector<16x128xf32>
    %579 = arith.addf %558, %578 : vector<16x128xf32>
    %c85 = arith.constant 85 : index
    %580 = memref.load %arg1[%c85] : memref<98xf32, #tpu.memory_space<smem>>
    %c127_i32_214 = arith.constant 127 : i32
    %581 = tpu.dynamic_rotate %575 by %c127_i32_214 dim 1 : vector<16x128xf32>, i32 -> vector<16x128xf32>
    %582 = vector.broadcast %580 : f32 to vector<16x128xf32>
    %583 = arith.mulf %582, %581 : vector<16x128xf32>
    %584 = arith.addf %563, %583 : vector<16x128xf32>
    %c86 = arith.constant 86 : index
    %585 = memref.load %arg1[%c86] : memref<98xf32, #tpu.memory_space<smem>>
    %c126_i32_215 = arith.constant 126 : i32
    %586 = tpu.dynamic_rotate %575 by %c126_i32_215 dim 1 : vector<16x128xf32>, i32 -> vector<16x128xf32>
    %587 = vector.broadcast %585 : f32 to vector<16x128xf32>
    %588 = arith.mulf %587, %586 : vector<16x128xf32>
    %589 = arith.addf %568, %588 : vector<16x128xf32>
    %c87 = arith.constant 87 : index
    %590 = memref.load %arg1[%c87] : memref<98xf32, #tpu.memory_space<smem>>
    %c125_i32_216 = arith.constant 125 : i32
    %591 = tpu.dynamic_rotate %575 by %c125_i32_216 dim 1 : vector<16x128xf32>, i32 -> vector<16x128xf32>
    %592 = vector.broadcast %590 : f32 to vector<16x128xf32>
    %593 = arith.mulf %592, %591 : vector<16x128xf32>
    %594 = arith.addf %573, %593 : vector<16x128xf32>
    %c88 = arith.constant 88 : index
    %595 = memref.load %arg1[%c88] : memref<98xf32, #tpu.memory_space<smem>>
    %c124_i32_217 = arith.constant 124 : i32
    %596 = tpu.dynamic_rotate %575 by %c124_i32_217 dim 1 : vector<16x128xf32>, i32 -> vector<16x128xf32>
    %597 = vector.broadcast %595 : f32 to vector<16x128xf32>
    %598 = arith.mulf %597, %596 : vector<16x128xf32>
    %599 = arith.addf %579, %598 : vector<16x128xf32>
    %c89 = arith.constant 89 : index
    %600 = memref.load %arg1[%c89] : memref<98xf32, #tpu.memory_space<smem>>
    %c123_i32_218 = arith.constant 123 : i32
    %601 = tpu.dynamic_rotate %575 by %c123_i32_218 dim 1 : vector<16x128xf32>, i32 -> vector<16x128xf32>
    %602 = vector.broadcast %600 : f32 to vector<16x128xf32>
    %603 = arith.mulf %602, %601 : vector<16x128xf32>
    %604 = arith.addf %584, %603 : vector<16x128xf32>
    %c90 = arith.constant 90 : index
    %605 = memref.load %arg1[%c90] : memref<98xf32, #tpu.memory_space<smem>>
    %c122_i32_219 = arith.constant 122 : i32
    %606 = tpu.dynamic_rotate %575 by %c122_i32_219 dim 1 : vector<16x128xf32>, i32 -> vector<16x128xf32>
    %607 = vector.broadcast %605 : f32 to vector<16x128xf32>
    %608 = arith.mulf %607, %606 : vector<16x128xf32>
    %609 = arith.addf %589, %608 : vector<16x128xf32>
    %c1_220 = arith.constant 1 : index
    %c6_221 = arith.constant 6 : index
    %c0_222 = arith.constant 0 : index
    %610 = vector.load %arg4[%c1_220, %c6_221, %c0_222] : memref<2x22x128xf32, #tpu.memory_space<vmem>>, vector<1x16x128xf32>
    %611 = vector.shape_cast %610 : vector<1x16x128xf32> to vector<16x128xf32>
    %c91 = arith.constant 91 : index
    %612 = memref.load %arg1[%c91] : memref<98xf32, #tpu.memory_space<smem>>
    %613 = vector.broadcast %612 : f32 to vector<16x128xf32>
    %614 = arith.mulf %613, %611 : vector<16x128xf32>
    %615 = arith.addf %594, %614 : vector<16x128xf32>
    %c92 = arith.constant 92 : index
    %616 = memref.load %arg1[%c92] : memref<98xf32, #tpu.memory_space<smem>>
    %c127_i32_223 = arith.constant 127 : i32
    %617 = tpu.dynamic_rotate %611 by %c127_i32_223 dim 1 : vector<16x128xf32>, i32 -> vector<16x128xf32>
    %618 = vector.broadcast %616 : f32 to vector<16x128xf32>
    %619 = arith.mulf %618, %617 : vector<16x128xf32>
    %620 = arith.addf %599, %619 : vector<16x128xf32>
    %c93 = arith.constant 93 : index
    %621 = memref.load %arg1[%c93] : memref<98xf32, #tpu.memory_space<smem>>
    %c126_i32_224 = arith.constant 126 : i32
    %622 = tpu.dynamic_rotate %611 by %c126_i32_224 dim 1 : vector<16x128xf32>, i32 -> vector<16x128xf32>
    %623 = vector.broadcast %621 : f32 to vector<16x128xf32>
    %624 = arith.mulf %623, %622 : vector<16x128xf32>
    %625 = arith.addf %604, %624 : vector<16x128xf32>
    %c94 = arith.constant 94 : index
    %626 = memref.load %arg1[%c94] : memref<98xf32, #tpu.memory_space<smem>>
    %c125_i32_225 = arith.constant 125 : i32
    %627 = tpu.dynamic_rotate %611 by %c125_i32_225 dim 1 : vector<16x128xf32>, i32 -> vector<16x128xf32>
    %628 = vector.broadcast %626 : f32 to vector<16x128xf32>
    %629 = arith.mulf %628, %627 : vector<16x128xf32>
    %630 = arith.addf %609, %629 : vector<16x128xf32>
    %c95 = arith.constant 95 : index
    %631 = memref.load %arg1[%c95] : memref<98xf32, #tpu.memory_space<smem>>
    %c124_i32_226 = arith.constant 124 : i32
    %632 = tpu.dynamic_rotate %611 by %c124_i32_226 dim 1 : vector<16x128xf32>, i32 -> vector<16x128xf32>
    %633 = vector.broadcast %631 : f32 to vector<16x128xf32>
    %634 = arith.mulf %633, %632 : vector<16x128xf32>
    %635 = arith.addf %615, %634 : vector<16x128xf32>
    %c96 = arith.constant 96 : index
    %636 = memref.load %arg1[%c96] : memref<98xf32, #tpu.memory_space<smem>>
    %c123_i32_227 = arith.constant 123 : i32
    %637 = tpu.dynamic_rotate %611 by %c123_i32_227 dim 1 : vector<16x128xf32>, i32 -> vector<16x128xf32>
    %638 = vector.broadcast %636 : f32 to vector<16x128xf32>
    %639 = arith.mulf %638, %637 : vector<16x128xf32>
    %640 = arith.addf %620, %639 : vector<16x128xf32>
    %c97 = arith.constant 97 : index
    %641 = memref.load %arg1[%c97] : memref<98xf32, #tpu.memory_space<smem>>
    %c122_i32_228 = arith.constant 122 : i32
    %642 = tpu.dynamic_rotate %611 by %c122_i32_228 dim 1 : vector<16x128xf32>, i32 -> vector<16x128xf32>
    %643 = vector.broadcast %641 : f32 to vector<16x128xf32>
    %644 = arith.mulf %643, %642 : vector<16x128xf32>
    %645 = arith.addf %625, %644 : vector<16x128xf32>
    %646 = arith.addf %640, %645 : vector<16x128xf32>
    %647 = arith.addf %630, %635 : vector<16x128xf32>
    %648 = arith.addf %646, %647 : vector<16x128xf32>
    %649 = vector.extract_strided_slice %648 {offsets = [0, 0], sizes = [1, 16], strides = [1, 1]} : vector<16x128xf32> to vector<1x16xf32>
    %c0_229 = arith.constant 0 : index
    %c0_230 = arith.constant 0 : index
    %650 = vector.load %arg5[%c0_229, %c0_230] : memref<1x256xf32, #tpu.memory_space<vmem>>, vector<1x16xf32>
    tpu.vector_store %arg5[%c0_229, %c0_230], %649 {strides = array<i32>} : memref<1x256xf32, #tpu.memory_space<vmem>>, vector<1x16xf32>,
    %651 = vector.extract_strided_slice %648 {offsets = [1, 0], sizes = [1, 16], strides = [1, 1]} : vector<16x128xf32> to vector<1x16xf32>
    %c0_231 = arith.constant 0 : index
    %c16_232 = arith.constant 16 : index
    %652 = vector.load %arg5[%c0_231, %c16_232] : memref<1x256xf32, #tpu.memory_space<vmem>>, vector<1x16xf32>
    tpu.vector_store %arg5[%c0_231, %c16_232], %651 {strides = array<i32>} : memref<1x256xf32, #tpu.memory_space<vmem>>, vector<1x16xf32>,
    %653 = vector.extract_strided_slice %648 {offsets = [2, 0], sizes = [1, 16], strides = [1, 1]} : vector<16x128xf32> to vector<1x16xf32>
    %c0_233 = arith.constant 0 : index
    %c32_234 = arith.constant 32 : index
    %654 = vector.load %arg5[%c0_233, %c32_234] : memref<1x256xf32, #tpu.memory_space<vmem>>, vector<1x16xf32>
    tpu.vector_store %arg5[%c0_233, %c32_234], %653 {strides = array<i32>} : memref<1x256xf32, #tpu.memory_space<vmem>>, vector<1x16xf32>,
    %655 = vector.extract_strided_slice %648 {offsets = [3, 0], sizes = [1, 16], strides = [1, 1]} : vector<16x128xf32> to vector<1x16xf32>
    %c0_235 = arith.constant 0 : index
    %c48_236 = arith.constant 48 : index
    %656 = vector.load %arg5[%c0_235, %c48_236] : memref<1x256xf32, #tpu.memory_space<vmem>>, vector<1x16xf32>
    tpu.vector_store %arg5[%c0_235, %c48_236], %655 {strides = array<i32>} : memref<1x256xf32, #tpu.memory_space<vmem>>, vector<1x16xf32>,
    %657 = vector.extract_strided_slice %648 {offsets = [4, 0], sizes = [1, 16], strides = [1, 1]} : vector<16x128xf32> to vector<1x16xf32>
    %c0_237 = arith.constant 0 : index
    %c64_238 = arith.constant 64 : index
    %658 = vector.load %arg5[%c0_237, %c64_238] : memref<1x256xf32, #tpu.memory_space<vmem>>, vector<1x16xf32>
    tpu.vector_store %arg5[%c0_237, %c64_238], %657 {strides = array<i32>} : memref<1x256xf32, #tpu.memory_space<vmem>>, vector<1x16xf32>,
    %659 = vector.extract_strided_slice %648 {offsets = [5, 0], sizes = [1, 16], strides = [1, 1]} : vector<16x128xf32> to vector<1x16xf32>
    %c0_239 = arith.constant 0 : index
    %c80_240 = arith.constant 80 : index
    %660 = vector.load %arg5[%c0_239, %c80_240] : memref<1x256xf32, #tpu.memory_space<vmem>>, vector<1x16xf32>
    tpu.vector_store %arg5[%c0_239, %c80_240], %659 {strides = array<i32>} : memref<1x256xf32, #tpu.memory_space<vmem>>, vector<1x16xf32>,
    %661 = vector.extract_strided_slice %648 {offsets = [6, 0], sizes = [1, 16], strides = [1, 1]} : vector<16x128xf32> to vector<1x16xf32>
    %c0_241 = arith.constant 0 : index
    %c96_242 = arith.constant 96 : index
    %662 = vector.load %arg5[%c0_241, %c96_242] : memref<1x256xf32, #tpu.memory_space<vmem>>, vector<1x16xf32>
    tpu.vector_store %arg5[%c0_241, %c96_242], %661 {strides = array<i32>} : memref<1x256xf32, #tpu.memory_space<vmem>>, vector<1x16xf32>,
    %663 = vector.extract_strided_slice %648 {offsets = [7, 0], sizes = [1, 16], strides = [1, 1]} : vector<16x128xf32> to vector<1x16xf32>
    %c0_243 = arith.constant 0 : index
    %c112 = arith.constant 112 : index
    %664 = vector.load %arg5[%c0_243, %c112] : memref<1x256xf32, #tpu.memory_space<vmem>>, vector<1x16xf32>
    tpu.vector_store %arg5[%c0_243, %c112], %663 {strides = array<i32>} : memref<1x256xf32, #tpu.memory_space<vmem>>, vector<1x16xf32>,
    %665 = vector.extract_strided_slice %648 {offsets = [8, 0], sizes = [1, 16], strides = [1, 1]} : vector<16x128xf32> to vector<1x16xf32>
    %c0_244 = arith.constant 0 : index
    %c128 = arith.constant 128 : index
    %666 = vector.load %arg5[%c0_244, %c128] : memref<1x256xf32, #tpu.memory_space<vmem>>, vector<1x16xf32>
    tpu.vector_store %arg5[%c0_244, %c128], %665 {strides = array<i32>} : memref<1x256xf32, #tpu.memory_space<vmem>>, vector<1x16xf32>,
    %667 = vector.extract_strided_slice %648 {offsets = [9, 0], sizes = [1, 16], strides = [1, 1]} : vector<16x128xf32> to vector<1x16xf32>
    %c0_245 = arith.constant 0 : index
    %c144 = arith.constant 144 : index
    %668 = vector.load %arg5[%c0_245, %c144] : memref<1x256xf32, #tpu.memory_space<vmem>>, vector<1x16xf32>
    tpu.vector_store %arg5[%c0_245, %c144], %667 {strides = array<i32>} : memref<1x256xf32, #tpu.memory_space<vmem>>, vector<1x16xf32>,
    %669 = vector.extract_strided_slice %648 {offsets = [10, 0], sizes = [1, 16], strides = [1, 1]} : vector<16x128xf32> to vector<1x16xf32>
    %c0_246 = arith.constant 0 : index
    %c160 = arith.constant 160 : index
    %670 = vector.load %arg5[%c0_246, %c160] : memref<1x256xf32, #tpu.memory_space<vmem>>, vector<1x16xf32>
    tpu.vector_store %arg5[%c0_246, %c160], %669 {strides = array<i32>} : memref<1x256xf32, #tpu.memory_space<vmem>>, vector<1x16xf32>,
    %671 = vector.extract_strided_slice %648 {offsets = [11, 0], sizes = [1, 16], strides = [1, 1]} : vector<16x128xf32> to vector<1x16xf32>
    %c0_247 = arith.constant 0 : index
    %c176 = arith.constant 176 : index
    %672 = vector.load %arg5[%c0_247, %c176] : memref<1x256xf32, #tpu.memory_space<vmem>>, vector<1x16xf32>
    tpu.vector_store %arg5[%c0_247, %c176], %671 {strides = array<i32>} : memref<1x256xf32, #tpu.memory_space<vmem>>, vector<1x16xf32>,
    %673 = vector.extract_strided_slice %648 {offsets = [12, 0], sizes = [1, 16], strides = [1, 1]} : vector<16x128xf32> to vector<1x16xf32>
    %c0_248 = arith.constant 0 : index
    %c192 = arith.constant 192 : index
    %674 = vector.load %arg5[%c0_248, %c192] : memref<1x256xf32, #tpu.memory_space<vmem>>, vector<1x16xf32>
    tpu.vector_store %arg5[%c0_248, %c192], %673 {strides = array<i32>} : memref<1x256xf32, #tpu.memory_space<vmem>>, vector<1x16xf32>,
    %675 = vector.extract_strided_slice %648 {offsets = [13, 0], sizes = [1, 16], strides = [1, 1]} : vector<16x128xf32> to vector<1x16xf32>
    %c0_249 = arith.constant 0 : index
    %c208 = arith.constant 208 : index
    %676 = vector.load %arg5[%c0_249, %c208] : memref<1x256xf32, #tpu.memory_space<vmem>>, vector<1x16xf32>
    tpu.vector_store %arg5[%c0_249, %c208], %675 {strides = array<i32>} : memref<1x256xf32, #tpu.memory_space<vmem>>, vector<1x16xf32>,
    %677 = vector.extract_strided_slice %648 {offsets = [14, 0], sizes = [1, 16], strides = [1, 1]} : vector<16x128xf32> to vector<1x16xf32>
    %c0_250 = arith.constant 0 : index
    %c224 = arith.constant 224 : index
    %678 = vector.load %arg5[%c0_250, %c224] : memref<1x256xf32, #tpu.memory_space<vmem>>, vector<1x16xf32>
    tpu.vector_store %arg5[%c0_250, %c224], %677 {strides = array<i32>} : memref<1x256xf32, #tpu.memory_space<vmem>>, vector<1x16xf32>,
    %679 = vector.extract_strided_slice %648 {offsets = [15, 0], sizes = [1, 16], strides = [1, 1]} : vector<16x128xf32> to vector<1x16xf32>
    %c0_251 = arith.constant 0 : index
    %c240 = arith.constant 240 : index
    %680 = vector.load %arg5[%c0_251, %c240] : memref<1x256xf32, #tpu.memory_space<vmem>>, vector<1x16xf32>
    tpu.vector_store %arg5[%c0_251, %c240], %679 {strides = array<i32>} : memref<1x256xf32, #tpu.memory_space<vmem>>, vector<1x16xf32>,
    %c0_252 = arith.constant 0 : index
    %c0_253 = arith.constant 0 : index
    %681 = vector.load %arg5[%c0_252, %c0_253] : memref<1x256xf32, #tpu.memory_space<vmem>>, vector<1x256xf32>
    %682 = arith.negf %681 : vector<1x256xf32>
    %683 = math.exp %682 : vector<1x256xf32>
    %cst_254 = arith.constant 1.000000e+00 : f32
    %684 = vector.broadcast %cst_254 : f32 to vector<1x256xf32>
    %685 = arith.addf %684, %683 : vector<1x256xf32>
    %686 = arith.divf %684, %685 : vector<1x256xf32>
    %cst_255 = arith.constant 1.000000e+00 : f32
    %687 = vector.broadcast %cst_255 : f32 to vector<1x256xf32>
    %688 = arith.addf %687, %686 : vector<1x256xf32>
    %c0_256 = arith.constant 0 : index
    %c0_257 = arith.constant 0 : index
    %c0_258 = arith.constant 0 : index
    %689 = vector.load %arg2[%c0_256, %c0_257, %c0_258] : memref<1x4x256xf32, #tpu.memory_space<vmem>>, vector<1x4x256xf32>
    %690 = vector.shape_cast %689 : vector<1x4x256xf32> to vector<4x256xf32>
    %691 = vector.broadcast %688 : vector<1x256xf32> to vector<4x256xf32>
    %692 = arith.mulf %690, %691 : vector<4x256xf32>
    %c0_259 = arith.constant 0 : index
    %c0_260 = arith.constant 0 : index
    %c0_261 = arith.constant 0 : index
    %693 = vector.load %arg3[%c0_259, %c0_260, %c0_261] : memref<1x4x256xf32, #tpu.memory_space<vmem>>, vector<1x4x256xf32>
    %694 = vector.shape_cast %693 : vector<1x4x256xf32> to vector<4x256xf32>
    %695 = vector.shape_cast %692 : vector<4x256xf32> to vector<1x4x256xf32>
    tpu.vector_store %arg3[%c0_259, %c0_260, %c0_261], %695 {strides = array<i32>} : memref<1x4x256xf32, #tpu.memory_space<vmem>>, vector<1x4x256xf32>,
    return
  }
  func.func @transform_0(%arg0: i32) -> i32 {
    %c0_i32 = arith.constant 0 : i32
    %c0_i32_0 = arith.constant 0 : i32
    return %c0_i32 : i32
  }
  func.func @transform_1(%arg0: i32) -> (i32, i32, i32) {
    %c0_i32 = arith.constant 0 : i32
    %c0_i32_0 = arith.constant 0 : i32
    %c0_i32_1 = arith.constant 0 : i32
    return %arg0, %c0_i32, %c0_i32_0 : i32, i32, i32
  }
  func.func @transform_2(%arg0: i32) -> (i32, i32, i32) {
    %c0_i32 = arith.constant 0 : i32
    %c0_i32_0 = arith.constant 0 : i32
    %c0_i32_1 = arith.constant 0 : i32
    return %arg0, %c0_i32, %c0_i32_0 : i32, i32, i32
  }
}

</mosaic_0001>

<bundles_post_ra>
// kernel: tpu_custom_call.1
= control target key start
LH: loop header
LB: loop body
LE: loop exit
PB: predicated region body
PF: predicated region fallthrough
CT: control target
= control target key end

     0   :  { %s3859_s0 = inlined_call_operand.hbm [shape: f32[98], index: 0, kind: input, shape index: {}]   ;;  %s3860_s1 = inlined_call_operand.hbm [shape: f32[2,4,256], index: 1, kind: input, shape index: {}]   ;;  %s3861_s2 = inlined_call_operand.hbm [shape: f32[2,4,256], index: 2, kind: output, shape index: {}]  }
   0x1   :  { %3961 = sst [smem:[#allocation91_spill]] %s3859_s0 }
   0x2   :  { %3962 = sst [smem:[#allocation92_spill]] %s3860_s1 }
   0x3   :  { %3963 = sst [smem:[#allocation93_spill]] %s3861_s2 }
   0x4   :  { %7 = vsyncpa [#allocation7], 0 }
   0x5   :  { %8 = vsyncpa [#allocation5], 0 }
   0x6   :  { %10 = vsyncpa [#allocation5 + $0x1], 0 }
   0x7   :  { %11 = vsyncpa [#allocation6], 0 }
   0x8   :  { %13 = vsyncpa [#allocation6 + $0x1], 0  ;;  %s1970_s9 = smov 0   ;;  %s1972_s10 = smov 0  }
   0x9   :  { %s1974_s11 = smov 0   ;;  %s1976_s12 = smov 0  }
   0xa LB: > { %3964 = sst [smem:[#allocation13_spill]] %s1915_s9  ;;  %s1991_s13 = sadd.s32 4294967295, %s1927_s12   ;;  %s1927_s12 = sphi %s1976_s12, %s4236_s12   ;;  %s1923_s11 = sphi %s1974_s11, %s4239_s11   ;;  %s1919_s10 = sphi %s1972_s10, %s4238_s10   ;;  %s1915_s9 = sphi %s1970_s9, %s4237_s9  }
   0xb   : > { %3965 = sst [smem:[#allocation14_spill]] %s1919_s10  ;;  %s1608_s14 = sadd.s32 4294967294, %s1927_s12  }
   0xc   : > { %3966 = sst [smem:[#allocation15_spill]] %s1923_s11  ;;  %p60_p0 = scmp.ne.s32.totalorder %s1919_s10, %s1915_s9 }
   0xd   : > { %3967 = sst [smem:[#allocation16_spill]] %s1927_s12  ;;  %p3862_p1 = scmp.eq.s32.totalorder %s1991_s13, 0 }
   0xe   : > { %3968 = sst [smem:[#allocation17_spill]] %s1991_s13  ;;  %p90_p3 = scmp.eq.s32.totalorder %s1608_s14, 1 }
   0xf   : > { %p2000_p4 = por %p3862_p1, %p60_p0  ;;  %p1609_p5 = scmp.ge.s32.totalorder %s1927_s12, 1 }
  0x10   : > { %p2005_p6 = por %p90_p3, %p60_p0  ;;  %p97_p7 = scmp.lt.s32.totalorder %s1927_s12, 3 }
  0x11   : > { %s3969_s15 = scalar_select %p2000_p4, 1, 0 }
  0x12   : > { %s3970_s16 = scalar_select %p2005_p6, 1, 0 }
  0x13   : > { %p2010_p8 = pnand %p1609_p5, %p97_p7  ;;  %s2016_s18 = sadd.s32 1, %s1927_s12  }
  0x14   : > { %3971 = sst [smem:[#allocation18_spill]] %s3970_s16  ;;  %s44_s19 = ssub.s32 %s1927_s12, %s2016_s18 }
  0x15   : > { %3973 = sst [smem:[#allocation19_spill]] %s2016_s18  ;;  %p1732_p10 = pneg %p2010_p8 }
  0x16   : > { %s47_s20 = sadd.s32 1, %s1923_s11  ;;  %p2029_p12 = scmp.eq.s32.totalorder %s44_s19, 0 }
  0x17   : > { %p2025_p11 = pnand %p1732_p10, %p3862_p1  ;;  %p54_p13 = scmp.ne.s32.totalorder %s1923_s11, %s1919_s10 }
  0x18   : > { %p55_p0 = scmp.eq.s32.totalorder %s1927_s12, 0  ;;  %p1745_p3 = scmp.lt.s32.totalorder %s1927_s12, 2 }
  0x19   : > { %s3976_s0 = sld [smem:[#allocation91_spill]]  ;;  %p1816_p7 = pneg %p2025_p11 }
  0x1f   : > { %s1814_s25 = scalar_lea.hbm %s3976_s0, 16 }
  0x20   : > { %p1815_p5 = scmp.ne.s32.totalorder %s3976_s0, %s1814_s25  ;;  %p1821_p1 = scmp.lt.u32.totalorder %s1814_s25, %s3976_s0 }
  0x22   : > { %p1817_p10 = pnand %p1816_p7, %p1815_p5 }
  0x24   : > { %p1818_p9 = pneg %p1817_p10 }
  0x26   : > { %p1823_p2 = pnand %p1821_p1, %p1818_p9 }
  0x28   : > { %1826 = shalt.err (!%p1823_p2)
}
  0x29   : > { %s1929_s30 = smov [#allocation4]   ;;  %p56_p1 = por %p55_p0, %p54_p13 }
  0x2a   : > { %1735 = dma.hbm_to_smem (!%p2025_p11), %s3976_s0, 16, %s1929_s30, [#allocation7]  }
  0x2b   : > { %s2056_s5 = scalar_select %p2029_p12, %s1923_s11, %s47_s20  }
  0x2c   : > { %p3978_p2 = scmp.eq.s32.totalorder %s1991_s13, 1  ;;  %s119_s7 = sand.u32 1, %s1923_s11  }
  0x2d   : > { %3977 = sst [smem:[#allocation20_spill]] %s2056_s5  ;;  %s1722_s8 = sshll.u32 %s1927_s12, 7 }
  0x2e   : > { %p2068_p9 = por %p3978_p2, %p54_p13  ;;  %s1612_s14 = sshll.u32 %s119_s7, 3 }
  0x2f   : > { %s3981_s1 = sld [smem:[#allocation92_spill]]  ;;  %s123_s20 = scalar_lea.vmem [#allocation8], %s1612_s14 }
  0x30   : > { %s3979_s6 = scalar_select %p2068_p9, 1, 0 }
  0x31   : > { %s131_s22 = sshll.u32 %s123_s20, 4  ;;  %p2081_p11 = pnand %p1745_p3, %p56_p1  ;;  %s2085_s22 = int_to_ptr.vmem [resolvable:$true] %s131_s22 }
  0x32   : > { %3980 = sst [smem:[#allocation21_spill]] %s3979_s6  ;;  %s120_s25 = scalar_lea.sflag [#allocation5], %s119_s7 }
  0x33   : > { %p1829_p13 = pneg %p2081_p11 }
  0x35   : > { %s2077_s23 = scalar_lea.hbm %s3981_s1, %s1722_s8  ;;  %s1832_s29 = scalar_lea.hbm %s3981_s1, 256 }
  0x36   : > { %s1827_s26 = scalar_lea.hbm %s2077_s23, 128  ;;  %p1833_p3 = scmp.lt.u32.totalorder %s2077_s23, %s3981_s1 }
  0x37   : > { %p1828_p12 = scmp.ne.s32.totalorder %s2077_s23, %s1827_s26  ;;  %p1834_p7 = scmp.lt.u32.totalorder %s1832_s29, %s1827_s26 }
  0x38   : > { %p1836_p1 = scmp.lt.u32.totalorder %s1827_s26, %s2077_s23 }
  0x39   : > { %p1830_p0 = pnand %p1829_p13, %p1828_p12  ;;  %p1835_p10 = por %p1834_p7, %p1833_p3 }
  0x3b   : > { %p1831_p5 = pneg %p1830_p0  ;;  %p1837_p2 = por %p1836_p1, %p1835_p10 }
  0x3d   : > { %p1838_p6 = pnand %p1837_p2, %p1831_p5 }
  0x3f   : > { %1841 = shalt.err (!%p1838_p6)
}
  0x40   : > { %s1842_s4 = scalar_lea.vmem %s2085_s22, 128  ;;  %s1930_s7 = smov [#allocation8]  }
  0x41   : > { %p1843_p12 = scmp.ne.s32.totalorder %s2085_s22, %s1842_s4  ;;  %s1847_s8 = sshll.u32 %s1930_s7, 4  ;;  %s1848_s8 = int_to_ptr.vmem [resolvable:$false] %s1847_s8 }
  0x42   : > { %s1849_s14 = scalar_lea.vmem %s1848_s8, 256  ;;  %p1850_p4 = scmp.lt.s32.totalorder %s2085_s22, %s1848_s8 }
  0x43   : > { %p1845_p0 = pnand %p1843_p12, %p1829_p13  ;;  %p1851_p3 = scmp.lt.s32.totalorder %s1849_s14, %s1842_s4 }
  0x45   : > { %p1846_p9 = pneg %p1845_p0  ;;  %p1852_p7 = por %p1851_p3, %p1850_p4 }
  0x47   : > { %p1853_p10 = pnand %p1852_p7, %p1846_p9 }
  0x49   : > { %1856 = shalt.err (!%p1853_p10)
}
  0x4a   : > { %1739 = dma.hbm_to_vmem [thread:$0]  (!%p2081_p11), %s2077_s23, 128, %s2085_s22, %s120_s25  }
  0x4b   : > { %140 = sbr.rel (%p2010_p8) target bundleno = 934 (0x3a6), region = 28 }
  0x52   : > { %p3983_p6 = scmp.eq.s32.totalorder %s1991_s13, 0 }
  0x54   : > { %1902 = dma.done.wait (%p3983_p6), [#allocation7], 16   ;;  %p3984_p13 = pmov %p3983_p6 }
  0x55   : > { %s2119_s19 = sand.u32 1, %s1919_s10   ;;  %p3987_p4 = scmp.ne.s32.totalorder %s3969_s15, 0 }
  0x56   : > { %1904 = vsyncadd (%p3984_p13), [#allocation7], 4294967280  ;;  %3985 = sst [smem:[#allocation22_spill]] %s2119_s19  ;;  %s3871_s21 = sshll.u32 %s2119_s19, 3 }
  0x57   : > { %s147_s20 = scalar_lea.sflag [#allocation5], %s2119_s19  ;;  %s2125_s23 = scalar_lea.vmem [#allocation8], %s3871_s21 }
  0x58   : > { %3986 = sst [smem:[#allocation23_spill]] %s2125_s23 }
  0x59   : > { %1906 = dma.done.wait (%p3987_p4), %s147_s20, 128  }
  0x5a   : > { %1908 = vsyncadd (%p3987_p4), %s147_s20, 4294967168 }
  0x5b   : > { %155 = sfence }
  0x5c   : > { %v172_v0 = vld [vmem:[%s2125_s23] sm:$0xff]  ;;  %vm176_vm0 = vcmask 1043456   ;;  %v1931_v3 = vmov 0.0   ;;  %s1932_s15 = smov 115   ;;  %s1933_s17 = smov 3   ;;  %vm218_vm1 = vcmask 147480  }
  0x5d   : > { %v194_v1 = vsel %vm176_vm0, %v172_v0, -inf  ;;  %v177_v2 = vsel %vm176_vm0, %v172_v0, 0.0  ;;  %211 = vst [vmem:[#allocation2 + $0x18] sm:$0xff] %v1931_v3  ;;  %208 = vst [vmem:[#allocation2] sm:$0xff] %v1931_v3  ;;  %v174_v14 = vcombine.high %v172_v0, %v172_v0  ;;  %s1934_s22 = smov 99   ;;  %s1935_s24 = smov 83  }
  0x5e   : > { %209 = vst [vmem:[#allocation2 + $0x8] sm:$0xff] %v1931_v3  ;;  %210 = vst [vmem:[#allocation2 + $0x10] sm:$0x3f] %v1931_v3  ;;  %v195_v4 = vrot.slane %v194_v1, 4  ;;  %v178_v5 = vrot.slane %v177_v2, 4  ;;  %s1936_s25 = smov 67  }
  0x5f   : > { %212 = vst [vmem:[#allocation2 + $0x20] sm:$0xff] %v1931_v3  ;;  %213 = vst [vmem:[#allocation2 + $0x28] sm:$0x3f] %v1931_v3  ;;  %v184_v18 = vsel %vm176_vm0, %v174_v14, 0.0  ;;  %v201_v20 = vsel %vm176_vm0, %v174_v14, -inf  ;;  %s1937_s26 = smov 51  }
  0x60   : > { %v196_v6 = vmax.f32 %v194_v1, %v195_v4  ;;  %v179_v7 = vadd.f32 %v178_v5, %v177_v2  ;;  %v185_v19 = vrot.slane %v184_v18, 4  ;;  %v202_v21 = vrot.slane %v201_v20, 4  ;;  %s1938_s27 = smov 35   ;;  %s1939_s28 = smov 19  }
  0x61   : > { %s3880_s29 = smov 127   ;;  %s3878_s30 = smov 126  }
  0x62   : > { %v197_v8 = vrot.slane %v196_v6, 2  ;;  %v180_v9 = vrot.slane %v179_v7, 2  ;;  %v186_v22 = vadd.f32 %v185_v19, %v184_v18  ;;  %v203_v23 = vmax.f32 %v201_v20, %v202_v21  ;;  %s3882_s3 = smov 125   ;;  %s3876_s4 = smov 124  }
  0x63   : > { %s3874_s7 = smov 123   ;;  %s3872_s8 = smov 122  }
  0x64   : > { %v198_v10 = vmax.f32 %v196_v6, %v197_v8  ;;  %v181_v11 = vadd.f32 %v180_v9, %v179_v7  ;;  %v187_v24 = vrot.slane %v186_v22, 2  ;;  %v204_v25 = vrot.slane %v203_v23, 2  ;;  %s2557_s14 = sld [smem:[#allocation4 + $0x6]]  ;;  %s2562_s20 = sld [smem:[#allocation4 + $0x31]] }
  0x65   : > { %s2590_s21 = sld [smem:[#allocation4 + $0x3]]  ;;  %s2609_s0 = sld [smem:[#allocation4 + $0x12]] }
  0x66   : > { %v199_v12 = vrot.slane %v198_v10, 1  ;;  %v182_v13 = vrot.slane %v181_v11, 1  ;;  %v188_v26 = vadd.f32 %v187_v24, %v186_v22  ;;  %v205_v27 = vmax.f32 %v203_v23, %v204_v25  ;;  %s4031_s1 = smov 126   ;;  %s4032_s5 = smov 124  }
  0x67   : > { %s2615_s11 = sld [smem:[#allocation4 + $0xc]]  ;;  %s2617_s10 = sld [smem:[#allocation4 + $0xf]] }
  0x68   : > { %v200_v15 = vmax.f32 %v198_v10, %v199_v12  ;;  %v183_v16 = vadd.f32 %v182_v13, %v181_v11  ;;  %v189_v28 = vrot.slane %v188_v26, 1  ;;  %v206_v29 = vrot.slane %v205_v27, 1  ;;  %s2621_s18 = sld [smem:[#allocation4 + $0x10]]  ;;  %s2623_s12 = sld [smem:[#allocation4 + $0x16]] }
  0x69   : > { %s2636_s16 = sld [smem:[#allocation4 + $0x13]]  ;;  %s2638_s9 = sld [smem:[#allocation4 + $0x14]] }
  0x6a   : > { %230 = vrot.lane.b32.xlu1 %v200_v15, %s1932_s15  ;;  %221 = vrot.lane.b32.xlu0 %v200_v15, %s1933_s17  ;;  %v192_v17 = vmul.f32 0.25, %v183_v16  ;;  %v190_v30 = vadd.f32 %v189_v28, %v188_v26  ;;  %v207_v31 = vmax.f32 %v205_v27, %v206_v29  ;;  %4016 = sst [smem:[#allocation52_spill]] %s2557_s14  ;;  %s2640_s2 = sld [smem:[#allocation4 + $0x17]] }
  0x6b   : > { %4017 = sst [smem:[#allocation53_spill]] %s2562_s20  ;;  %s2643_s6 = sld [smem:[#allocation4 + $0x1a]] }
  0x6c   : > { %v193_v32 = vmul.f32 0.25, %v190_v30  ;;  %4025 = sst [smem:[#allocation61_spill]] %s2590_s21  ;;  %s4043_s19 = smov 125  }
  0x6d   : > { %4030 = sst [smem:[#allocation66_spill]] %s2609_s0  ;;  %s4044_s13 = smov 123  }
  0x6e   : > { %238 = vrot.lane.b32.xlu1 %v200_v15, %s1934_s22  ;;  %215 = vrot.lane.b32.xlu0 %v192_v17, %s1933_s17  ;;  %4033 = sst [smem:[#allocation67_spill]] %s2617_s10  ;;  %s2660_s23 = sld [smem:[#allocation4 + $0x1b]] }
  0x6f   : > { %4034 = sst [smem:[#allocation68_spill]] %s2621_s18 }
  0x70   : > { %4035 = sst [smem:[#allocation69_spill]] %s2623_s12 }
  0x71   : > { %4039 = sst [smem:[#allocation72_spill]] %s2636_s16 }
  0x72   : > { %246 = vrot.lane.b32.xlu1 %v200_v15, %s1935_s24  ;;  %234 = vrot.lane.b32.xlu0 %v192_v17, %s1934_s22  ;;  %4040 = sst [smem:[#allocation73_spill]] %s2638_s9 }
  0x73   : > { %4041 = sst [smem:[#allocation74_spill]] %s2640_s2 }
  0x74   : > { %4042 = sst [smem:[#allocation75_spill]] %s2643_s6 }
  0x75   : > { %4047 = sst [smem:[#allocation76_spill]] %s2660_s23 }
  0x76   : > { %254 = vrot.lane.b32.xlu1 %v200_v15, %s1936_s25  ;;  %242 = vrot.lane.b32.xlu0 %v192_v17, %s1935_s24 }
  0x7a   : > { %226 = vrot.lane.b32.xlu1 %v192_v17, %s1932_s15  ;;  %250 = vrot.lane.b32.xlu0 %v192_v17, %s1936_s25 }
  0x7e   : > { %262 = vrot.lane.b32.xlu1 %v200_v15, %s1937_s26  ;;  %258 = vrot.lane.b32.xlu0 %v192_v17, %s1937_s26 }
  0x82   : > { %270 = vrot.lane.b32.xlu1 %v200_v15, %s1938_s27  ;;  %266 = vrot.lane.b32.xlu0 %v192_v17, %s1938_s27 }
  0x86   : > { %278 = vrot.lane.b32.xlu1 %v200_v15, %s1939_s28  ;;  %274 = vrot.lane.b32.xlu0 %v192_v17, %s1939_s28 }
  0x8a   : > { %288 = vrot.lane.b32.xlu1 %v207_v31, %s1933_s17  ;;  %283 = vrot.lane.b32.xlu0 %v193_v32, %s1933_s17  ;;  %s2566_s17 = sld [smem:[#allocation4]] }
  0x8e   : > { %296 = vrot.lane.b32.xlu1 %v207_v31, %s1932_s15  ;;  %292 = vrot.lane.b32.xlu0 %v193_v32, %s1932_s15  ;;  %s2564_s15 = sld [smem:[#allocation4 + $0x7]] }
  0x92   : > { %304 = vrot.lane.b32.xlu1 %v207_v31, %s1934_s22  ;;  %300 = vrot.lane.b32.xlu0 %v193_v32, %s1934_s22  ;;  %s2568_s22 = sld [smem:[#allocation4 + $0x2]] }
  0x94   : > { %4018 = sst [smem:[#allocation54_spill]] %s2564_s15 }
  0x96   : > { %308 = vrot.lane.b32.xlu0 %v193_v32, %s1935_s24  ;;  %312 = vrot.lane.b32.xlu1 %v207_v31, %s1935_s24  ;;  %s2570_s24 = sld [smem:[#allocation4 + $0xa]] }
  0x98   : > { %4019 = sst [smem:[#allocation55_spill]] %s2568_s22 }
  0x9a   : > { %316 = vrot.lane.b32.xlu0 %v193_v32, %s1936_s25  ;;  %320 = vrot.lane.b32.xlu1 %v207_v31, %s1936_s25  ;;  %s2576_s25 = sld [smem:[#allocation4 + $0xe]] }
  0x9c   : > { %4020 = sst [smem:[#allocation56_spill]] %s2570_s24 }
  0x9e   : > { %324 = vrot.lane.b32.xlu0 %v193_v32, %s1937_s26  ;;  %328 = vrot.lane.b32.xlu1 %v207_v31, %s1937_s26  ;;  %s2578_s26 = sld [smem:[#allocation4 + $0x15]] }
  0xa2   : > { %332 = vrot.lane.b32.xlu0 %v193_v32, %s1938_s27  ;;  %336 = vrot.lane.b32.xlu1 %v207_v31, %s1938_s27  ;;  %s2582_s27 = sld [smem:[#allocation4 + $0x1c]] }
  0xa4   : > { %4022 = sst [smem:[#allocation58_spill]] %s2578_s26 }
  0xa6   : > { %340 = vrot.lane.b32.xlu0 %v193_v32, %s1939_s28  ;;  %344 = vrot.lane.b32.xlu1 %v207_v31, %s1939_s28  ;;  %s2584_s28 = sld [smem:[#allocation4 + $0x23]] }
  0xa8   : > { %4023 = sst [smem:[#allocation59_spill]] %s2582_s27 }
  0xac   : > { %4024 = sst [smem:[#allocation60_spill]] %s2584_s28 }
  0xdc   : > { %v231_v33 = vpop.permute.xlu1 %230  ;;  %v222_v34 = vpop.permute.xlu0 %221 }
  0xdd   : > { %233 = vst.msk [vmem:[#allocation2 + $0x1c] sm:$0x1] %vm218_vm1, %v231_v33  ;;  %225 = vst.msk [vmem:[#allocation2 + $0x1b] sm:$0x1] %vm218_vm1, %v222_v34 }
  0xe0   : > { %v239_v35 = vpop.permute.xlu1 %238  ;;  %v216_v36 = vpop.permute.xlu0 %215 }
  0xe1   : > { %241 = vst.msk [vmem:[#allocation2 + $0x1d] sm:$0x1] %vm218_vm1, %v239_v35  ;;  %219 = vst.msk [vmem:[#allocation2 + $0x3] sm:$0x1] %vm218_vm1, %v216_v36 }
  0xe4   : > { %v247_v37 = vpop.permute.xlu1 %246  ;;  %v235_v38 = vpop.permute.xlu0 %234 }
  0xe5   : > { %249 = vst.msk [vmem:[#allocation2 + $0x1e] sm:$0x1] %vm218_vm1, %v247_v37  ;;  %237 = vst.msk [vmem:[#allocation2 + $0x5] sm:$0x1] %vm218_vm1, %v235_v38 }
  0xe8   : > { %v255_v39 = vpop.permute.xlu1 %254  ;;  %v243_v40 = vpop.permute.xlu0 %242 }
  0xe9   : > { %257 = vst.msk [vmem:[#allocation2 + $0x1f] sm:$0x1] %vm218_vm1, %v255_v39  ;;  %245 = vst.msk [vmem:[#allocation2 + $0x6] sm:$0x1] %vm218_vm1, %v243_v40 }
  0xec   : > { %v227_v41 = vpop.permute.xlu1 %226  ;;  %v251_v42 = vpop.permute.xlu0 %250 }
  0xed   : > { %229 = vst.msk [vmem:[#allocation2 + $0x4] sm:$0x1] %vm218_vm1, %v227_v41  ;;  %253 = vst.msk [vmem:[#allocation2 + $0x7] sm:$0x1] %vm218_vm1, %v251_v42 }
  0xf0   : > { %v263_v43 = vpop.permute.xlu1 %262  ;;  %v259_v44 = vpop.permute.xlu0 %258  ;;  %v2398_v34 = vld [vmem:[#allocation2 + $0x18] sm:$0xff] }
  0xf1   : > { %265 = vst.msk [vmem:[#allocation2 + $0x20] sm:$0x1] %vm218_vm1, %v263_v43  ;;  %261 = vst.msk [vmem:[#allocation2 + $0x8] sm:$0x1] %vm218_vm1, %v259_v44 }
  0xf4   : > { %v271_v45 = vpop.permute.xlu1 %270  ;;  %v267_v46 = vpop.permute.xlu0 %266  ;;  %v2168_v47 = vld [vmem:[#allocation2] sm:$0xff] }
  0xf5   : > { %273 = vst.msk [vmem:[#allocation2 + $0x21] sm:$0x1] %vm218_vm1, %v271_v45  ;;  %269 = vst.msk [vmem:[#allocation2 + $0x9] sm:$0x1] %vm218_vm1, %v267_v46  ;;  %357 = vrot.lane.b32.xlu0 %v2168_v47, %s3880_s29 }
  0xf8   : > { %v279_v48 = vpop.permute.xlu1 %278  ;;  %v275_v49 = vpop.permute.xlu0 %274  ;;  %v2194_v59 = vld [vmem:[#allocation2 + $0x1] sm:$0xff] }
  0xf9   : > { %281 = vst.msk [vmem:[#allocation2 + $0x22] sm:$0x1] %vm218_vm1, %v279_v48  ;;  %277 = vst.msk [vmem:[#allocation2 + $0xa] sm:$0x1] %vm218_vm1, %v275_v49  ;;  %367 = vrot.lane.b32.xlu0 %v2168_v47, %s3878_s30  ;;  %v2450_v49 = vld [vmem:[#allocation2 + $0x19] sm:$0xff] }
  0xfa   : > { %3999 = vst [vmem:[#allocation35_spill] sm:$0xff] %v2450_v49 }
  0xfc   : > { %v289_v50 = vpop.permute.xlu1 %288  ;;  %v284_v51 = vpop.permute.xlu0 %283  ;;  %v2226_v4 = vld [vmem:[#allocation2 + $0x2] sm:$0xff] }
  0xfd   : > { %291 = vst.msk [vmem:[#allocation2 + $0x23] sm:$0x1] %vm218_vm1, %v289_v50  ;;  %286 = vst.msk [vmem:[#allocation2 + $0xb] sm:$0x1] %vm218_vm1, %v284_v51  ;;  %377 = vrot.lane.b32.xlu0 %v2168_v47, %s3882_s3 }
 0x100   : > { %v297_v52 = vpop.permute.xlu1 %296  ;;  %v293_v53 = vpop.permute.xlu0 %292  ;;  %v2254_v6 = vld [vmem:[#allocation2 + $0x3] sm:$0xff] }
 0x101   : > { %299 = vst.msk [vmem:[#allocation2 + $0x24] sm:$0x1] %vm218_vm1, %v297_v52  ;;  %295 = vst.msk [vmem:[#allocation2 + $0xc] sm:$0x1] %vm218_vm1, %v293_v53  ;;  %387 = vrot.lane.b32.xlu0 %v2168_v47, %s3876_s4 }
 0x104   : > { %v305_v54 = vpop.permute.xlu1 %304  ;;  %v301_v55 = vpop.permute.xlu0 %300  ;;  %v2282_v8 = vld [vmem:[#allocation2 + $0x4] sm:$0xff] }
 0x105   : > { %307 = vst.msk [vmem:[#allocation2 + $0x25] sm:$0x1] %vm218_vm1, %v305_v54  ;;  %303 = vst.msk [vmem:[#allocation2 + $0xd] sm:$0x1] %vm218_vm1, %v301_v55  ;;  %397 = vrot.lane.b32.xlu0 %v2168_v47, %s3874_s7 }
 0x108   : > { %v309_v56 = vpop.permute.xlu0 %308  ;;  %v313_v57 = vpop.permute.xlu1 %312  ;;  %v2308_v12 = vld [vmem:[#allocation2 + $0x5] sm:$0xff] }
 0x109   : > { %311 = vst.msk [vmem:[#allocation2 + $0xe] sm:$0x1] %vm218_vm1, %v309_v56  ;;  %407 = vrot.lane.b32.xlu0 %v2168_v47, %s3872_s8  ;;  %315 = vst.msk [vmem:[#allocation2 + $0x26] sm:$0x1] %vm218_vm1, %v313_v57 }
 0x10c   : > { %v317_v58 = vpop.permute.xlu0 %316  ;;  %v321_v60 = vpop.permute.xlu1 %320  ;;  %v2346_v20 = vld [vmem:[#allocation2 + $0x6] sm:$0xff] }
 0x10d   : > { %319 = vst.msk [vmem:[#allocation2 + $0xf] sm:$0x1] %vm218_vm1, %v317_v58  ;;  %425 = vrot.lane.b32.xlu0 %v2194_v59, %s3880_s29  ;;  %323 = vst.msk [vmem:[#allocation2 + $0x27] sm:$0x1] %vm218_vm1, %v321_v60 }
 0x110   : > { %v325_v61 = vpop.permute.xlu0 %324  ;;  %v329_v62 = vpop.permute.xlu1 %328 }
 0x111   : > { %327 = vst.msk [vmem:[#allocation2 + $0x10] sm:$0x1] %vm218_vm1, %v325_v61  ;;  %435 = vrot.lane.b32.xlu0 %v2194_v59, %s3878_s30  ;;  %331 = vst.msk [vmem:[#allocation2 + $0x28] sm:$0x1] %vm218_vm1, %v329_v62 }
 0x114   : > { %v333_v63 = vpop.permute.xlu0 %332  ;;  %v2204_v0 = vld [vmem:[#allocation2 + $0x8] sm:$0xff]  ;;  %v337_v1 = vpop.permute.xlu1 %336  ;;  %v2468_v54 = vld [vmem:[#allocation2 + $0x20] sm:$0xff] }
 0x115   : > { %335 = vst.msk [vmem:[#allocation2 + $0x11] sm:$0x1] %vm218_vm1, %v333_v63  ;;  %445 = vrot.lane.b32.xlu0 %v2194_v59, %s3882_s3  ;;  %359 = vrot.lane.b32.xlu1 %v2204_v0, %s3880_s29  ;;  %339 = vst.msk [vmem:[#allocation2 + $0x29] sm:$0x1] %vm218_vm1, %v337_v1  ;;  %v2502_v1 = vld [vmem:[#allocation2 + $0x1a] sm:$0xff] }
 0x116   : > { %4002 = vst [vmem:[#allocation38_spill] sm:$0xff] %v2468_v54  ;;  %4007 = vst [vmem:[#allocation43_spill] sm:$0xff] %v2502_v1 }
 0x118   : > { %v341_v2 = vpop.permute.xlu0 %340  ;;  %v345_v3 = vpop.permute.xlu1 %344  ;;  %v2236_v5 = vld [vmem:[#allocation2 + $0x9] sm:$0xff] }
 0x119   : > { %343 = vst.msk [vmem:[#allocation2 + $0x12] sm:$0x1] %vm218_vm1, %v341_v2  ;;  %455 = vrot.lane.b32.xlu0 %v2194_v59, %s3876_s4  ;;  %369 = vrot.lane.b32.xlu1 %v2204_v0, %s3878_s30  ;;  %347 = vst.msk [vmem:[#allocation2 + $0x2a] sm:$0x1] %vm218_vm1, %v345_v3 }
 0x11c   : > { %v2264_v7 = vld [vmem:[#allocation2 + $0xa] sm:$0xff] }
 0x11d   : > { %465 = vrot.lane.b32.xlu0 %v2194_v59, %s3874_s7  ;;  %379 = vrot.lane.b32.xlu1 %v2204_v0, %s3882_s3  ;;  %3988 = vst [vmem:[#allocation24_spill] sm:$0xff] %v2264_v7 }
 0x120   : > { %v553_v9 = vld [vmem:[#allocation2 + $0xb] sm:$0xff] }
 0x121   : > { %475 = vrot.lane.b32.xlu0 %v2194_v59, %s3872_s8  ;;  %389 = vrot.lane.b32.xlu1 %v2204_v0, %s3876_s4  ;;  %v2320_v15 = vld [vmem:[#allocation2 + $0xc] sm:$0xff] }
 0x122   : > { %3989 = vst [vmem:[#allocation25_spill] sm:$0xff] %v2320_v15  ;;  %v2364_v25 = vld [vmem:[#allocation2 + $0xd] sm:$0xff] }
 0x123   : > { %3991 = vst [vmem:[#allocation27_spill] sm:$0xff] %v2364_v25  ;;  %v2416_v39 = vld [vmem:[#allocation2 + $0xe] sm:$0xff] }
 0x124   : > { %3995 = vst [vmem:[#allocation31_spill] sm:$0xff] %v2416_v39 }
 0x125   : > { %493 = vrot.lane.b32.xlu0 %v2226_v4, %s3880_s29  ;;  %399 = vrot.lane.b32.xlu1 %v2204_v0, %s3874_s7 }
 0x129   : > { %503 = vrot.lane.b32.xlu0 %v2226_v4, %s3878_s30  ;;  %409 = vrot.lane.b32.xlu1 %v2204_v0, %s3872_s8 }
 0x12d   : > { %513 = vrot.lane.b32.xlu0 %v2226_v4, %s3882_s3  ;;  %427 = vrot.lane.b32.xlu1 %v2236_v5, %s3880_s29 }
 0x131   : > { %523 = vrot.lane.b32.xlu0 %v2226_v4, %s3876_s4  ;;  %437 = vrot.lane.b32.xlu1 %v2236_v5, %s3878_s30 }
 0x135   : > { %533 = vrot.lane.b32.xlu0 %v2226_v4, %s3874_s7  ;;  %447 = vrot.lane.b32.xlu1 %v2236_v5, %s3882_s3 }
 0x139   : > { %543 = vrot.lane.b32.xlu0 %v2226_v4, %s3872_s8  ;;  %457 = vrot.lane.b32.xlu1 %v2236_v5, %s3876_s4 }
 0x13d   : > { %561 = vrot.lane.b32.xlu0 %v2254_v6, %s3880_s29  ;;  %467 = vrot.lane.b32.xlu1 %v2236_v5, %s3874_s7 }
 0x141   : > { %571 = vrot.lane.b32.xlu0 %v2254_v6, %s3878_s30  ;;  %477 = vrot.lane.b32.xlu1 %v2236_v5, %s3872_s8 }
 0x145   : > { %581 = vrot.lane.b32.xlu0 %v2254_v6, %s3882_s3  ;;  %495 = vrot.lane.b32.xlu1 %v2264_v7, %s3880_s29 }
 0x149   : > { %591 = vrot.lane.b32.xlu0 %v2254_v6, %s3876_s4  ;;  %505 = vrot.lane.b32.xlu1 %v2264_v7, %s3878_s30 }
 0x14d   : > { %601 = vrot.lane.b32.xlu0 %v2254_v6, %s3874_s7  ;;  %515 = vrot.lane.b32.xlu1 %v2264_v7, %s3882_s3 }
 0x151   : > { %611 = vrot.lane.b32.xlu0 %v2254_v6, %s3872_s8  ;;  %525 = vrot.lane.b32.xlu1 %v2264_v7, %s3876_s4 }
 0x155   : > { %629 = vrot.lane.b32.xlu0 %v2282_v8, %s3880_s29  ;;  %535 = vrot.lane.b32.xlu1 %v2264_v7, %s3874_s7 }
 0x159   : > { %639 = vrot.lane.b32.xlu0 %v2282_v8, %s3878_s30  ;;  %545 = vrot.lane.b32.xlu1 %v2264_v7, %s3872_s8 }
 0x15d   : > { %649 = vrot.lane.b32.xlu0 %v2282_v8, %s3882_s3  ;;  %563 = vrot.lane.b32.xlu1 %v553_v9, %s3880_s29 }
 0x161   : > { %659 = vrot.lane.b32.xlu0 %v2282_v8, %s3876_s4  ;;  %573 = vrot.lane.b32.xlu1 %v553_v9, %s3878_s30 }
 0x165   : > { %669 = vrot.lane.b32.xlu0 %v2282_v8, %s3874_s7  ;;  %583 = vrot.lane.b32.xlu1 %v553_v9, %s3882_s3 }
 0x167   : > { %v2301_v10 = vpop.permute.xlu0 %357 }
 0x169   : > { %679 = vrot.lane.b32.xlu0 %v2282_v8, %s3872_s8  ;;  %593 = vrot.lane.b32.xlu1 %v553_v9, %s3876_s4 }
 0x16b   : > { %v2306_v11 = vpop.permute.xlu0 %367 }
 0x16d   : > { %697 = vrot.lane.b32.xlu0 %v2308_v12, %s3880_s29  ;;  %603 = vrot.lane.b32.xlu1 %v553_v9, %s3874_s7 }
 0x16f   : > { %v2313_v13 = vpop.permute.xlu0 %377 }
 0x171   : > { %707 = vrot.lane.b32.xlu0 %v2308_v12, %s3878_s30  ;;  %613 = vrot.lane.b32.xlu1 %v553_v9, %s3872_s8 }
 0x173   : > { %v2318_v14 = vpop.permute.xlu0 %387 }
 0x175   : > { %717 = vrot.lane.b32.xlu0 %v2308_v12, %s3882_s3  ;;  %631 = vrot.lane.b32.xlu1 %v2320_v15, %s3880_s29 }
 0x177   : > { %v2326_v16 = vpop.permute.xlu0 %397 }
 0x179   : > { %727 = vrot.lane.b32.xlu0 %v2308_v12, %s3876_s4  ;;  %641 = vrot.lane.b32.xlu1 %v2320_v15, %s3878_s30 }
 0x17b   : > { %v2332_v17 = vpop.permute.xlu0 %407 }
 0x17d   : > { %737 = vrot.lane.b32.xlu0 %v2308_v12, %s3874_s7  ;;  %651 = vrot.lane.b32.xlu1 %v2320_v15, %s3882_s3 }
 0x17f   : > { %v2338_v18 = vpop.permute.xlu0 %425 }
 0x181   : > { %747 = vrot.lane.b32.xlu0 %v2308_v12, %s3872_s8  ;;  %661 = vrot.lane.b32.xlu1 %v2320_v15, %s3876_s4 }
 0x183   : > { %v2344_v19 = vpop.permute.xlu0 %435 }
 0x185   : > { %765 = vrot.lane.b32.xlu0 %v2346_v20, %s3880_s29  ;;  %671 = vrot.lane.b32.xlu1 %v2320_v15, %s3874_s7 }
 0x187   : > { %v2352_v21 = vpop.permute.xlu1 %359  ;;  %v2354_v22 = vpop.permute.xlu0 %445 }
 0x188   : > { %3990 = vst [vmem:[#allocation26_spill] sm:$0xff] %v2352_v21 }
 0x189   : > { %775 = vrot.lane.b32.xlu0 %v2346_v20, %s3878_s30  ;;  %681 = vrot.lane.b32.xlu1 %v2320_v15, %s3872_s8 }
 0x18b   : > { %v2360_v23 = vpop.permute.xlu1 %369  ;;  %v2362_v24 = vpop.permute.xlu0 %455 }
 0x18d   : > { %785 = vrot.lane.b32.xlu0 %v2346_v20, %s3882_s3  ;;  %699 = vrot.lane.b32.xlu1 %v2364_v25, %s3880_s29 }
 0x18f   : > { %v2370_v26 = vpop.permute.xlu1 %379  ;;  %v2372_v27 = vpop.permute.xlu0 %465 }
 0x191   : > { %795 = vrot.lane.b32.xlu0 %v2346_v20, %s3876_s4  ;;  %709 = vrot.lane.b32.xlu1 %v2364_v25, %s3878_s30 }
 0x193   : > { %v2378_v28 = vpop.permute.xlu1 %389  ;;  %v2380_v29 = vpop.permute.xlu0 %475 }
 0x195   : > { %805 = vrot.lane.b32.xlu0 %v2346_v20, %s3874_s7  ;;  %719 = vrot.lane.b32.xlu1 %v2364_v25, %s3882_s3 }
 0x197   : > { %v2386_v30 = vpop.permute.xlu1 %399  ;;  %v2388_v31 = vpop.permute.xlu0 %493 }
 0x198   : > { %3992 = vst [vmem:[#allocation28_spill] sm:$0xff] %v2386_v30 }
 0x199   : > { %815 = vrot.lane.b32.xlu0 %v2346_v20, %s3872_s8  ;;  %729 = vrot.lane.b32.xlu1 %v2364_v25, %s3876_s4 }
 0x19b   : > { %v2394_v32 = vpop.permute.xlu1 %409  ;;  %v2396_v33 = vpop.permute.xlu0 %503 }
 0x19d   : > { %833 = vrot.lane.b32.xlu0 %v2398_v34, %s3880_s29  ;;  %739 = vrot.lane.b32.xlu1 %v2364_v25, %s3874_s7 }
 0x19f   : > { %v2404_v35 = vpop.permute.xlu1 %427  ;;  %v2406_v36 = vpop.permute.xlu0 %513 }
 0x1a0   : > { %3993 = vst [vmem:[#allocation29_spill] sm:$0xff] %v2404_v35 }
 0x1a1   : > { %843 = vrot.lane.b32.xlu0 %v2398_v34, %s3878_s30  ;;  %749 = vrot.lane.b32.xlu1 %v2364_v25, %s3872_s8 }
 0x1a3   : > { %v2412_v37 = vpop.permute.xlu1 %437  ;;  %v2414_v38 = vpop.permute.xlu0 %523 }
 0x1a4   : > { %3994 = vst [vmem:[#allocation30_spill] sm:$0xff] %v2412_v37 }
 0x1a5   : > { %853 = vrot.lane.b32.xlu0 %v2398_v34, %s3882_s3  ;;  %767 = vrot.lane.b32.xlu1 %v2416_v39, %s3880_s29 }
 0x1a7   : > { %v2422_v40 = vpop.permute.xlu1 %447  ;;  %v2424_v41 = vpop.permute.xlu0 %533 }
 0x1a9   : > { %863 = vrot.lane.b32.xlu0 %v2398_v34, %s3876_s4  ;;  %777 = vrot.lane.b32.xlu1 %v2416_v39, %s3878_s30 }
 0x1ab   : > { %v2430_v42 = vpop.permute.xlu1 %457  ;;  %v2432_v43 = vpop.permute.xlu0 %543 }
 0x1ac   : > { %3996 = vst [vmem:[#allocation32_spill] sm:$0xff] %v2430_v42 }
 0x1ad   : > { %873 = vrot.lane.b32.xlu0 %v2398_v34, %s3874_s7  ;;  %787 = vrot.lane.b32.xlu1 %v2416_v39, %s3882_s3 }
 0x1af   : > { %v2438_v44 = vpop.permute.xlu1 %467  ;;  %v2440_v45 = vpop.permute.xlu0 %561 }
 0x1b0   : > { %3997 = vst [vmem:[#allocation33_spill] sm:$0xff] %v2438_v44 }
 0x1b1   : > { %883 = vrot.lane.b32.xlu0 %v2398_v34, %s3872_s8  ;;  %797 = vrot.lane.b32.xlu1 %v2416_v39, %s3876_s4 }
 0x1b3   : > { %v2446_v46 = vpop.permute.xlu1 %477  ;;  %v2448_v48 = vpop.permute.xlu0 %571 }
 0x1b4   : > { %3998 = vst [vmem:[#allocation34_spill] sm:$0xff] %v2446_v46 }
 0x1b5   : > { %807 = vrot.lane.b32.xlu1 %v2416_v39, %s3874_s7  ;;  %901 = vrot.lane.b32.xlu0 %v2450_v49, %s3880_s29 }
 0x1b7   : > { %v2456_v50 = vpop.permute.xlu1 %495  ;;  %v2458_v51 = vpop.permute.xlu0 %581 }
 0x1b8   : > { %4000 = vst [vmem:[#allocation36_spill] sm:$0xff] %v2456_v50 }
 0x1b9   : > { %817 = vrot.lane.b32.xlu1 %v2416_v39, %s3872_s8  ;;  %911 = vrot.lane.b32.xlu0 %v2450_v49, %s3878_s30 }
 0x1bb   : > { %v2464_v52 = vpop.permute.xlu1 %505  ;;  %v2466_v53 = vpop.permute.xlu0 %591 }
 0x1bc   : > { %4001 = vst [vmem:[#allocation37_spill] sm:$0xff] %v2464_v52 }
 0x1bd   : > { %835 = vrot.lane.b32.xlu1 %v2468_v54, %s3880_s29  ;;  %921 = vrot.lane.b32.xlu0 %v2450_v49, %s3882_s3 }
 0x1bf   : > { %v2474_v55 = vpop.permute.xlu1 %515  ;;  %v2476_v56 = vpop.permute.xlu0 %601 }
 0x1c0   : > { %4003 = vst [vmem:[#allocation39_spill] sm:$0xff] %v2474_v55  ;;  %v893_v55 = vld [vmem:[#allocation2 + $0x21] sm:$0xff] }
 0x1c1   : > { %845 = vrot.lane.b32.xlu1 %v2468_v54, %s3878_s30  ;;  %931 = vrot.lane.b32.xlu0 %v2450_v49, %s3876_s4 }
 0x1c3   : > { %v2482_v57 = vpop.permute.xlu1 %525  ;;  %v2484_v58 = vpop.permute.xlu0 %611 }
 0x1c4   : > { %4004 = vst [vmem:[#allocation40_spill] sm:$0xff] %v2482_v57 }
 0x1c5   : > { %855 = vrot.lane.b32.xlu1 %v2468_v54, %s3882_s3  ;;  %941 = vrot.lane.b32.xlu0 %v2450_v49, %s3874_s7 }
 0x1c7   : > { %v2490_v60 = vpop.permute.xlu1 %535  ;;  %v2492_v61 = vpop.permute.xlu0 %629 }
 0x1c8   : > { %4005 = vst [vmem:[#allocation41_spill] sm:$0xff] %v2490_v60 }
 0x1c9   : > { %865 = vrot.lane.b32.xlu1 %v2468_v54, %s3876_s4  ;;  %951 = vrot.lane.b32.xlu0 %v2450_v49, %s3872_s8 }
 0x1cb   : > { %v2498_v62 = vpop.permute.xlu1 %545  ;;  %v2500_v63 = vpop.permute.xlu0 %639 }
 0x1cc   : > { %4006 = vst [vmem:[#allocation42_spill] sm:$0xff] %v2498_v62 }
 0x1cd   : > { %875 = vrot.lane.b32.xlu1 %v2468_v54, %s3874_s7  ;;  %969 = vrot.lane.b32.xlu0 %v2502_v1, %s3880_s29 }
 0x1cf   : > { %v2508_v2 = vpop.permute.xlu1 %563  ;;  %v2510_v3 = vpop.permute.xlu0 %649 }
 0x1d0   : > { %4008 = vst [vmem:[#allocation44_spill] sm:$0xff] %v2508_v2 }
 0x1d1   : > { %885 = vrot.lane.b32.xlu1 %v2468_v54, %s3872_s8  ;;  %979 = vrot.lane.b32.xlu0 %v2502_v1, %s3878_s30 }
 0x1d3   : > { %v2516_v9 = vpop.permute.xlu1 %573  ;;  %v2518_v49 = vpop.permute.xlu0 %659 }
 0x1d4   : > { %4009 = vst [vmem:[#allocation45_spill] sm:$0xff] %v2516_v9 }
 0x1d5   : > { %903 = vrot.lane.b32.xlu1 %v893_v55, %s3880_s29  ;;  %989 = vrot.lane.b32.xlu0 %v2502_v1, %s3882_s3 }
 0x1d7   : > { %v2523_v39 = vpop.permute.xlu1 %583  ;;  %v2525_v46 = vpop.permute.xlu0 %669 }
 0x1d8   : > { %4010 = vst [vmem:[#allocation46_spill] sm:$0xff] %v2523_v39 }
 0x1d9   : > { %913 = vrot.lane.b32.xlu1 %v893_v55, %s3878_s30  ;;  %999 = vrot.lane.b32.xlu0 %v2502_v1, %s3876_s4 }
 0x1db   : > { %v2530_v54 = vpop.permute.xlu1 %593  ;;  %v2532_v25 = vpop.permute.xlu0 %679 }
 0x1dc   : > { %4011 = vst [vmem:[#allocation47_spill] sm:$0xff] %v2530_v54  ;;  %v2548_v54 = vld [vmem:[#allocation2 + $0x1b] sm:$0xff] }
 0x1dd   : > { %923 = vrot.lane.b32.xlu1 %v893_v55, %s3882_s3  ;;  %1009 = vrot.lane.b32.xlu0 %v2502_v1, %s3874_s7 }
 0x1df   : > { %v2537_v15 = vpop.permute.xlu1 %603  ;;  %v2539_v37 = vpop.permute.xlu0 %697 }
 0x1e0   : > { %4012 = vst [vmem:[#allocation48_spill] sm:$0xff] %v2537_v15 }
 0x1e1   : > { %933 = vrot.lane.b32.xlu1 %v893_v55, %s3876_s4  ;;  %1019 = vrot.lane.b32.xlu0 %v2502_v1, %s3872_s8  ;;  %s2596_s4 = sld [smem:[#allocation4 + $0x4]] }
 0x1e3   : > { %v2544_v21 = vpop.permute.xlu1 %613  ;;  %v2546_v39 = vpop.permute.xlu0 %707 }
 0x1e4   : > { %4013 = vst [vmem:[#allocation49_spill] sm:$0xff] %v2544_v21  ;;  %4014 = vst [vmem:[#allocation50_spill] sm:$0xff] %v2546_v39 }
 0x1e5   : > { %943 = vrot.lane.b32.xlu1 %v893_v55, %s3874_s7  ;;  %1037 = vrot.lane.b32.xlu0 %v2548_v54, %s3880_s29  ;;  %s2594_s7 = sld [smem:[#allocation4 + $0x1]] }
 0x1e7   : > { %v2553_v62 = vpop.permute.xlu1 %631  ;;  %v2555_v9 = vpop.permute.xlu0 %717 }
 0x1e8   : > { %4015 = vst [vmem:[#allocation51_spill] sm:$0xff] %v2553_v62 }
 0x1e9   : > { %953 = vrot.lane.b32.xlu1 %v893_v55, %s3872_s8  ;;  %1047 = vrot.lane.b32.xlu0 %v2548_v54, %s3878_s30  ;;  %v2580_v55 = vld [vmem:[#allocation2 + $0x22] sm:$0xff]  ;;  %s2592_s8 = sld [smem:[#allocation4 + $0x2a]]  ;;  %s2602_s30 = sld [smem:[#allocation4 + $0x5]] }
 0x1eb   : > { %v2572_v1 = vpop.permute.xlu1 %641  ;;  %v2574_v62 = vpop.permute.xlu0 %727 }
 0x1ec   : > { %4021 = vst [vmem:[#allocation57_spill] sm:$0xff] %v2572_v1 }
 0x1ed   : > { %971 = vrot.lane.b32.xlu1 %v2580_v55, %s3880_s29  ;;  %1057 = vrot.lane.b32.xlu0 %v2548_v54, %s3882_s3  ;;  %s2604_s29 = sld [smem:[#allocation4 + $0xb]]  ;;  %s2607_s3 = sld [smem:[#allocation4 + $0x8]] }
 0x1ef   : > { %4026 = sst [smem:[#allocation62_spill]] %s2592_s8  ;;  %v2598_v21 = vpop.permute.xlu1 %651  ;;  %v2600_v1 = vpop.permute.xlu0 %737 }
 0x1f0   : > { %4027 = vst [vmem:[#allocation63_spill] sm:$0xff] %v2598_v21  ;;  %v4038_v21 = vstv %s2557_s14  ;;  %s2662_s14 = sld [smem:[#allocation4 + $0x1e]] }
 0x1f1   : > { %981 = vrot.lane.b32.xlu1 %v2580_v55, %s4031_s1  ;;  %1067 = vrot.lane.b32.xlu0 %v2548_v54, %s4032_s5  ;;  %v412_v15 = vmul.f32 %v4038_v21, %v2332_v17  ;;  %v4045_v17 = vstv %s2568_s22  ;;  %s4054_s22 = smov 122  }
 0x1f2   : > { %v372_v21 = vmul.f32 %v4045_v17, %v2306_v11  ;;  %v4049_v17 = vstv %s2562_s20  ;;  %v4052_v11 = vstv %s2590_s21  ;;  %s2687_s20 = sld [smem:[#allocation4 + $0x18]]  ;;  %s2710_s21 = sld [smem:[#allocation4 + $0x26]] }
 0x1f3   : > { %4028 = sst [smem:[#allocation64_spill]] %s2604_s29  ;;  %v2625_v60 = vpop.permute.xlu1 %661  ;;  %v2627_v52 = vpop.permute.xlu0 %747  ;;  %v2672_v57 = vmul.f32 %v4049_v17, %v2398_v34  ;;  %v382_v39 = vmul.f32 %v4052_v11, %v2313_v13  ;;  %v3911_v7 = vstv %s2607_s3  ;;  %v3908_v34 = vstv %s2609_s0  ;;  %s4059_s0 = smov 127  }
 0x1f4   : > { %4029 = sst [smem:[#allocation65_spill]] %s2607_s3  ;;  %4036 = vst [vmem:[#allocation70_spill] sm:$0xff] %v2625_v60  ;;  %4037 = vst [vmem:[#allocation71_spill] sm:$0xff] %v2627_v52  ;;  %v4046_v60 = vstv %s2570_s24  ;;  %v414_v2 = vadd.f32 %v412_v15, %v372_v21  ;;  %v3905_v52 = vstv %s2604_s29  ;;  %s2689_s24 = sld [smem:[#allocation4 + $0x22]]  ;;  %v3910_v15 = vstv %s2617_s10 }
 0x1f5   : > { %991 = vrot.lane.b32.xlu1 %v2580_v55, %s4043_s19  ;;  %1077 = vrot.lane.b32.xlu0 %v2548_v54, %s4044_s13  ;;  %v450_v44 = vmul.f32 %v4046_v60, %v2354_v22  ;;  %v4050_v22 = vstv %s2566_s17  ;;  %v460_v11 = vmul.f32 %v3905_v52, %v2362_v24  ;;  %v469_v17 = vstv %s2615_s11  ;;  %s2726_s29 = sld [smem:[#allocation4 + $0x9]]  ;;  %s2743_s10 = sld [smem:[#allocation4 + $0xd]] }
 0x1f6   : > { %v352_v60 = vmul.f32 %v4050_v22, %v2168_v47  ;;  %v4055_v47 = vstv %s2596_s4  ;;  %v498_v50 = vmul.f32 %v3910_v15, %v2388_v31  ;;  %v575_v22 = vstv %s2640_s2  ;;  %s2750_s3 = sld [smem:[#allocation4 + $0x20]]  ;;  %s2781_s2 = sld [smem:[#allocation4 + $0x24]] }
 0x1f7   : > { %v2664_v30 = vpop.permute.xlu1 %671  ;;  %v2666_v42 = vpop.permute.xlu0 %765  ;;  %v452_v13 = vadd.f32 %v450_v44, %v414_v2  ;;  %v528_v2 = vmul.f32 %v3908_v34, %v2414_v38  ;;  %v470_v38 = vmul.f32 %v469_v17, %v2372_v27  ;;  %v643_v24 = vstv %s2662_s14  ;;  %s4135_s11 = sld [smem:[#allocation59_spill]]  ;;  %s3117_s14 = sld [smem:[#allocation4 + $0x3c]] }
 0x1f8   : > { %4048 = vst [vmem:[#allocation77_spill] sm:$0xff] %v2664_v30  ;;  %v4051_v30 = vstv %s2564_s15  ;;  %s2702_s15 = sld [smem:[#allocation4 + $0x1f]] }
 0x1f9   : > { %v420_v35 = vmul.f32 %v4051_v30, %v2194_v59  ;;  %1001 = vrot.lane.b32.xlu1 %v2580_v55, %s4032_s5  ;;  %1087 = vrot.lane.b32.xlu0 %v2548_v54, %s4054_s22  ;;  %v392_v59 = vmul.f32 %v4055_v47, %v2318_v14  ;;  %v4056_v30 = vstv %s2576_s25  ;;  %v3914_v47 = vstv %s2636_s16  ;;  %s2762_s16 = sld [smem:[#allocation4 + $0x27]] }
 0x1fa   : > { %4053 = sst [smem:[#allocation78_spill]] %s2689_s24  ;;  %v488_v21 = vmul.f32 %v4056_v30, %v2226_v4  ;;  %v430_v4 = vmul.f32 %v3911_v7, %v2338_v18  ;;  %v2724_v30 = vld [vmem:[#allocation2 + $0x1c] sm:$0xff]  ;;  %v605_v54 = vstv %s2643_s6  ;;  %v538_v15 = vmul.f32 %v3914_v47, %v2424_v41  ;;  %s2775_s6 = sld [smem:[#allocation4 + $0x11]] }
 0x1fb   : > { %v2712_v14 = vpop.permute.xlu1 %681  ;;  %v2714_v44 = vpop.permute.xlu0 %775  ;;  %v422_v52 = vadd.f32 %v420_v35, %v382_v39  ;;  %4058 = sst [smem:[#allocation80_spill]] %s2726_s29  ;;  %v394_v18 = vadd.f32 %v392_v59, %v352_v60  ;;  %v4060_v39 = vstv %s2623_s12  ;;  %v615_v7 = vstv %s2660_s23  ;;  %s2790_s12 = sld [smem:[#allocation4 + $0x2b]] }
 0x1fc   : > { %v490_v35 = vadd.f32 %v488_v21, %v452_v13  ;;  %v566_v34 = vmul.f32 %v4060_v39, %v2440_v45  ;;  %4061 = sst [smem:[#allocation81_spill]] %s2750_s3  ;;  %v4062_v45 = vstv %s2621_s18  ;;  %v606_v21 = vmul.f32 %v605_v54, %v2476_v56  ;;  %s2773_s18 = sld [smem:[#allocation4 + $0x2e]] }
 0x1fd   : > { %1011 = vrot.lane.b32.xlu1 %v2580_v55, %s4044_s13  ;;  %1105 = vrot.lane.b32.xlu0 %v2724_v30, %s4059_s0  ;;  %v462_v31 = vadd.f32 %v460_v11, %v422_v52  ;;  %v432_v59 = vadd.f32 %v430_v4, %v394_v18  ;;  %v508_v52 = vmul.f32 %v4062_v45, %v2396_v33  ;;  %v585_v39 = vstv %s2687_s20  ;;  %4066 = sst [smem:[#allocation85_spill]] %s2781_s2  ;;  %s2800_s23 = sld [smem:[#allocation4 + $0x28]] }
 0x1fe   : > { %4057 = sst [smem:[#allocation79_spill]] %s2702_s15  ;;  %v530_v13 = vadd.f32 %v528_v2, %v490_v35  ;;  %v576_v11 = vmul.f32 %v575_v22, %v2448_v48  ;;  %v683_v47 = vstv %s2689_s24  ;;  %v644_v56 = vmul.f32 %v643_v24, %v2500_v63  ;;  %s3099_s20 = sld [smem:[#allocation4 + $0x38]] }
 0x1ff   : > { %v2752_v60 = vpop.permute.xlu1 %699  ;;  %v2754_v27 = vpop.permute.xlu0 %785  ;;  %4063 = sst [smem:[#allocation82_spill]] %s2762_s16  ;;  %v500_v41 = vadd.f32 %v498_v50, %v462_v31  ;;  %v472_v33 = vadd.f32 %v470_v38, %v432_v59  ;;  %v653_v48 = vstv %s2702_s15  ;;  %v616_v18 = vmul.f32 %v615_v7, %v2484_v58  ;;  %v2802_v58 = vld [vmem:[#allocation2 + $0x23] sm:$0xff]  ;;  %s2822_s24 = sld [smem:[#allocation4 + $0x19]] }
 0x200   : > { %4065 = sst [smem:[#allocation84_spill]] %s2775_s6  ;;  %v568_v50 = vadd.f32 %v566_v34, %v530_v13  ;;  %v721_v38 = vstv %s2710_s21  ;;  %v4069_v59 = vstv %s2582_s27  ;;  %v439_v45 = vstv %s2726_s29  ;;  %s2817_s27 = sld [smem:[#allocation4 + $0x32]] }
 0x201   : > { %1021 = vrot.lane.b32.xlu1 %v2580_v55, %s4054_s22  ;;  %1115 = vrot.lane.b32.xlu0 %v2724_v30, %s4031_s1  ;;  %v540_v4 = vadd.f32 %v538_v15, %v500_v41  ;;  %v4067_v55 = vstv %s2638_s9  ;;  %4068 = sst [smem:[#allocation86_spill]] %s2790_s12  ;;  %v510_v35 = vadd.f32 %v508_v52, %v472_v33  ;;  %v624_v15 = vmul.f32 %v4069_v59, %v2282_v8  ;;  %s2804_s9 = sld [smem:[#allocation4 + $0x2f]] }
 0x202   : > { %4064 = sst [smem:[#allocation83_spill]] %s2773_s18  ;;  %v548_v2 = vmul.f32 %v4067_v55, %v2432_v43  ;;  %v608_v31 = vadd.f32 %v606_v21, %v568_v50  ;;  %v684_v43 = vmul.f32 %v683_v47, %v2532_v25  ;;  %v586_v52 = vmul.f32 %v585_v39, %v2458_v51  ;;  %s2832_s15 = sld [smem:[#allocation4 + $0x2c]] }
 0x203   : > { %v2792_v34 = vpop.permute.xlu1 %709  ;;  %v796_v63 = vpop.permute.xlu0 %795  ;;  %v578_v13 = vadd.f32 %v576_v11, %v540_v4  ;;  %v654_v8 = vmul.f32 %v653_v48, %v2510_v3  ;;  %v4071_v25 = vstv %s2602_s30  ;;  %v722_v3 = vmul.f32 %v721_v38, %v2555_v9  ;;  %s2853_s29 = sld [smem:[#allocation4 + $0x33]]  ;;  %s4162_s21 = sld [smem:[#allocation58_spill]] }
 0x204   : > { %v402_v21 = vmul.f32 %v4071_v25, %v2326_v16  ;;  %v646_v51 = vadd.f32 %v644_v56, %v608_v31  ;;  %v4072_v41 = vstv %s2584_s28  ;;  %v479_v33 = vstv %s2743_s10  ;;  %s2851_s28 = sld [smem:[#allocation4 + $0x30]] }
 0x205   : > { %1039 = vrot.lane.b32.xlu1 %v2802_v58, %s4059_s0  ;;  %1125 = vrot.lane.b32.xlu0 %v2724_v30, %s4043_s19  ;;  %v692_v11 = vmul.f32 %v4072_v41, %v2308_v12  ;;  %v550_v50 = vadd.f32 %v548_v2, %v510_v35  ;;  %v618_v4 = vadd.f32 %v616_v18, %v578_v13  ;;  %v663_v55 = vstv %s2750_s3  ;;  %s2878_s3 = sld [smem:[#allocation4 + $0x21]] }
 0x206   : > { %4070 = sst [smem:[#allocation87_spill]] %s2817_s27  ;;  %v4074_v56 = vstv %s2594_s7  ;;  %v440_v9 = vmul.f32 %v439_v45, %v2344_v19  ;;  %v686_v25 = vadd.f32 %v684_v43, %v646_v51  ;;  %v3932_v12 = vstv %s2762_s16  ;;  %s2911_s16 = sld [smem:[#allocation4 + $0x2d]] }
 0x207   : > { %v2834_v59 = vpop.permute.xlu1 %719  ;;  %v806_v16 = vpop.permute.xlu0 %805  ;;  %v362_v31 = vmul.f32 %v4074_v56, %v2301_v10  ;;  %v588_v2 = vadd.f32 %v586_v52, %v550_v50  ;;  %v656_v18 = vadd.f32 %v654_v8, %v618_v4  ;;  %v4075_v35 = vstv %s2592_s8  ;;  %s2860_s8 = sld [smem:[#allocation4 + $0x1d]]  ;;  %s4159_s10 = sld [smem:[#allocation87_spill]] }
 0x208   : > { %4073 = sst [smem:[#allocation88_spill]] %s2832_s15  ;;  %v760_v13 = vmul.f32 %v4075_v35, %v2346_v20  ;;  %v3930_v41 = vstv %s2773_s18  ;;  %v3931_v19 = vstv %s2775_s6  ;;  %v701_v43 = vstv %s2781_s2  ;;  %s2885_s18 = sld [smem:[#allocation4 + $0x34]] }
 0x209   : > { %1049 = vrot.lane.b32.xlu1 %v2802_v58, %s4031_s1  ;;  %1135 = vrot.lane.b32.xlu0 %v2724_v30, %s4032_s5  ;;  %4076 = sst [smem:[#allocation89_spill]] %s2853_s29  ;;  %v404_v10 = vadd.f32 %v402_v21, %v362_v31  ;;  %v724_v52 = vadd.f32 %v722_v3, %v686_v25  ;;  %v480_v20 = vmul.f32 %v479_v33, %v2380_v29  ;;  %v769_v50 = vstv %s2790_s12  ;;  %s2894_s6 = sld [smem:[#allocation4 + $0x25]] }
 0x20a   : > { %v664_v8 = vmul.f32 %v663_v55, %v2518_v49  ;;  %v732_v51 = vmul.f32 %v3932_v12, %v2574_v62  ;;  %v741_v56 = vstv %s2800_s23  ;;  %v800_v29 = vmul.f32 %v3930_v41, %v796_v63  ;;  %s4078_s12 = sld [smem:[#allocation52_spill]]  ;;  %s2909_s2 = sld [smem:[#allocation4 + $0x29]] }
 0x20b   : > { %v2869_v4 = vpop.permute.xlu1 %729  ;;  %v816_v21 = vpop.permute.xlu0 %815  ;;  %v442_v3 = vadd.f32 %v440_v9, %v404_v10  ;;  %v3951_v31 = vstv %s2804_s9  ;;  %v518_v25 = vmul.f32 %v3931_v19, %v2406_v36  ;;  %v626_v49 = vadd.f32 %v624_v15, %v588_v2  ;;  %s3180_s23 = sld [smem:[#allocation4 + $0x3e]] }
 0x20c   : > { %v694_v62 = vadd.f32 %v692_v11, %v656_v18  ;;  %v3950_v9 = vstv %s2817_s27  ;;  %v3948_v63 = vstv %s2822_s24  ;;  %v702_v36 = vmul.f32 %v701_v43, %v2539_v37  ;;  %s4080_s27 = sld [smem:[#allocation55_spill]] }
 0x20d   : > { %1059 = vrot.lane.b32.xlu1 %v2802_v58, %s4043_s19  ;;  %1145 = vrot.lane.b32.xlu0 %v2724_v30, %s4044_s13  ;;  %v770_v15 = vmul.f32 %v769_v50, %v2666_v42  ;;  %v762_v11 = vadd.f32 %v760_v13, %v724_v52  ;;  %v482_v2 = vadd.f32 %v480_v20, %v442_v3  ;;  %v3949_v10 = vstv %s2832_s15  ;;  %s4084_s15 = sld [smem:[#allocation61_spill]] }
 0x20e   : > { %v666_v18 = vadd.f32 %v664_v8, %v626_v49  ;;  %v734_v35 = vadd.f32 %v732_v51, %v694_v62  ;;  %v742_v12 = vmul.f32 %v741_v56, %v2600_v1  ;;  %v810_v42 = vmul.f32 %v3951_v31, %v806_v16  ;;  %v4122_v31 = vld [vmem:[#allocation48_spill] sm:$0xff] }
 0x20f   : > { %4077 = sst [smem:[#allocation90_spill]] %s2894_s6  ;;  %v2897_v41 = vpop.permute.xlu1 %739  ;;  %v834_v19 = vpop.permute.xlu0 %833  ;;  %v802_v37 = vadd.f32 %v800_v29, %v762_v11  ;;  %v520_v52 = vadd.f32 %v518_v25, %v482_v2  ;;  %v4079_v20 = vstv %s2578_s26  ;;  %v3947_v51 = vstv %s2851_s28  ;;  %s4083_s26 = sld [smem:[#allocation56_spill]] }
 0x210   : > { %v838_v13 = vmul.f32 %v3950_v9, %v834_v19  ;;  %v556_v8 = vmul.f32 %v4079_v20, %v2254_v6  ;;  %v3945_v1 = vstv %s2853_s29  ;;  %v704_v16 = vadd.f32 %v702_v36, %v666_v18  ;;  %s2953_s29 = sld [smem:[#allocation4 + $0x36]] }
 0x211   : > { %1069 = vrot.lane.b32.xlu1 %v2802_v58, %s4032_s5  ;;  %1155 = vrot.lane.b32.xlu0 %v2724_v30, %s4054_s22  ;;  %v772_v19 = vadd.f32 %v770_v15, %v734_v35  ;;  %v780_v6 = vmul.f32 %v3949_v10, %v2714_v44  ;;  %v4081_v29 = vstv %s2566_s17  ;;  %v4082_v49 = vstv %s4078_s12  ;;  %v2940_v35 = vld [vmem:[#allocation2 + $0x1d] sm:$0xff]  ;;  %s2951_s12 = sld [smem:[#allocation4 + $0x35]] }
 0x212   : > { %v2922_v3 = vadd.f32 %v838_v13, %v802_v37  ;;  %v353_v25 = vmul.f32 %v4081_v29, %v2204_v0  ;;  %v413_v62 = vmul.f32 %v4082_v49, %v2394_v32  ;;  %v596_v30 = vmul.f32 %v3948_v63, %v2466_v53  ;;  %s4086_s17 = sld [smem:[#allocation54_spill]] }
 0x213   : > { %v3942_v11 = vstv %s2860_s8  ;;  %v2934_v36 = vpop.permute.xlu1 %749  ;;  %v844_v15 = vpop.permute.xlu0 %843  ;;  %v744_v2 = vadd.f32 %v742_v12, %v704_v16  ;;  %v812_v44 = vadd.f32 %v810_v42, %v772_v19  ;;  %v820_v18 = vmul.f32 %v3947_v51, %v816_v21  ;;  %v4120_v51 = vld [vmem:[#allocation41_spill] sm:$0xff] }
 0x214   : > { %v848_v0 = vmul.f32 %v3945_v1, %v844_v15  ;;  %v4085_v32 = vstv %s4080_s27  ;;  %v558_v37 = vadd.f32 %v556_v8, %v520_v52  ;;  %v3941_v13 = vstv %s2878_s3  ;;  %s4091_s27 = sld [smem:[#allocation64_spill]] }
 0x215   : > { %v373_v53 = vmul.f32 %v4085_v32, %v2360_v23  ;;  %1079 = vrot.lane.b32.xlu1 %v2802_v58, %s4044_s13  ;;  %1173 = vrot.lane.b32.xlu0 %v2940_v35, %s4059_s0  ;;  %v3940_v12 = vstv %s2885_s18  ;;  %v4087_v21 = vstv %s4083_s26  ;;  %v634_v42 = vmul.f32 %v3942_v11, %v2492_v61  ;;  %s4090_s26 = sld [smem:[#allocation65_spill]] }
 0x216   : > { %v451_v23 = vmul.f32 %v4087_v21, %v2422_v40  ;;  %v782_v52 = vadd.f32 %v780_v6, %v744_v2  ;;  %v2961_v20 = vadd.f32 %v848_v0, %v812_v44  ;;  %v4088_v8 = vstv %s4084_s15  ;;  %v4093_v0 = vld [vmem:[#allocation24_spill] sm:$0xff]  ;;  %s2989_s15 = sld [smem:[#allocation4 + $0x37]] }
 0x217   : > { %v383_v16 = vmul.f32 %v4088_v8, %v2370_v26  ;;  %v4089_v19 = vstv %s2596_s4  ;;  %v415_v49 = vadd.f32 %v413_v62, %v373_v53  ;;  %v3944_v15 = vstv %s2894_s6  ;;  %v2970_v32 = vpop.permute.xlu1 %767  ;;  %v854_v40 = vpop.permute.xlu0 %853  ;;  %s4095_s4 = sld [smem:[#allocation66_spill]]  ;;  %s4109_s6 = sld [smem:[#allocation72_spill]] }
 0x218   : > { %v393_v29 = vmul.f32 %v4089_v19, %v2378_v28  ;;  %v598_v21 = vadd.f32 %v596_v30, %v558_v37  ;;  %v674_v61 = vmul.f32 %v3941_v13, %v2525_v46  ;;  %v822_v6 = vadd.f32 %v820_v18, %v782_v52  ;;  %v4097_v30 = vld [vmem:[#allocation50_spill] sm:$0xff] }
 0x219   : > { %v858_v2 = vmul.f32 %v3940_v12, %v854_v40  ;;  %v4092_v26 = vstv %s4086_s17  ;;  %v4094_v28 = vstv %s2576_s25  ;;  %v3946_v53 = vstv %s2909_s2  ;;  %1089 = vrot.lane.b32.xlu1 %v2802_v58, %s4054_s22  ;;  %s4096_s17 = sld [smem:[#allocation67_spill]]  ;;  %v4098_v40 = vld [vmem:[#allocation29_spill] sm:$0xff]  ;;  %s4102_s25 = sld [smem:[#allocation69_spill]] }
 0x21a   : > { %v421_v44 = vmul.f32 %v4092_v26, %v2236_v5  ;;  %v489_v62 = vmul.f32 %v4094_v28, %v4093_v0  ;;  %v789_v8 = vstv %s2911_s16  ;;  %1183 = vrot.lane.b32.xlu0 %v2940_v35, %s4031_s1  ;;  %v453_v46 = vadd.f32 %v451_v23, %v415_v49  ;;  %v4100_v28 = vld [vmem:[#allocation32_spill] sm:$0xff]  ;;  %s3259_s16 = sld [smem:[#allocation4 + $0x43]] }
 0x21b   : > { %v636_v5 = vadd.f32 %v634_v42, %v598_v21  ;;  %v712_v18 = vmul.f32 %v3944_v15, %v4097_v30  ;;  %v2994_v37 = vadd.f32 %v858_v2, %v822_v6  ;;  %v395_v19 = vadd.f32 %v393_v29, %v353_v25  ;;  %v3002_v11 = vpop.permute.xlu1 %777  ;;  %v864_v23 = vpop.permute.xlu0 %863  ;;  %v4103_v42 = vld [vmem:[#allocation28_spill] sm:$0xff]  ;;  %v4107_v25 = vld [vmem:[#allocation71_spill] sm:$0xff] }
 0x21c   : > { %v423_v52 = vadd.f32 %v421_v44, %v383_v16  ;;  %v4099_v26 = vstv %s4090_s26  ;;  %v4101_v12 = vstv %s4091_s27  ;;  %v4104_v49 = vstv %s2602_s30  ;;  %v4105_v6 = vld [vmem:[#allocation40_spill] sm:$0xff]  ;;  %s4108_s26 = sld [smem:[#allocation68_spill]]  ;;  %v3015_v30 = vld [vmem:[#allocation2 + $0x24] sm:$0xff]  ;;  %s3090_s30 = sld [smem:[#allocation4 + $0x3b]] }
 0x21d   : > { %v431_v0 = vmul.f32 %v4099_v26, %v4098_v40  ;;  %v461_v13 = vmul.f32 %v4101_v12, %v4100_v28  ;;  %v3007_v21 = vmul.f32 %v4104_v49, %v4103_v42  ;;  %v4106_v2 = vstv %s4095_s4  ;;  %v4110_v12 = vld [vmem:[#allocation33_spill] sm:$0xff]  ;;  %v4111_v26 = vld [vmem:[#allocation36_spill] sm:$0xff]  ;;  %1107 = vrot.lane.b32.xlu1 %v3015_v30, %s4059_s0  ;;  %s3029_s27 = sld [smem:[#allocation4 + $0x39]]  ;;  %s4123_s4 = sld [smem:[#allocation73_spill]] }
 0x21e   : > { %v529_v16 = vmul.f32 %v4106_v2, %v4105_v6  ;;  %v676_v44 = vadd.f32 %v674_v61, %v636_v5  ;;  %v752_v29 = vmul.f32 %v3946_v53, %v4107_v25  ;;  %v471_v40 = vmul.f32 %v469_v17, %v4110_v12  ;;  %1193 = vrot.lane.b32.xlu0 %v2940_v35, %s4043_s19  ;;  %v4115_v42 = vld [vmem:[#allocation44_spill] sm:$0xff] }
 0x21f   : > { %v4112_v28 = vstv %s4096_s17  ;;  %v867_v1 = vstv %s2951_s12  ;;  %v877_v61 = vstv %s2953_s29  ;;  %v491_v5 = vadd.f32 %v489_v62, %v453_v46  ;;  %v3043_v9 = vpop.permute.xlu1 %787  ;;  %v874_v62 = vpop.permute.xlu0 %873  ;;  %s4141_s17 = sld [smem:[#allocation82_spill]]  ;;  %s3283_s12 = sld [smem:[#allocation4 + $0x45]] }
 0x220   : > { %v499_v15 = vmul.f32 %v4112_v28, %v4111_v26  ;;  %v4116_v49 = vstv %s4102_s25  ;;  %v714_v6 = vadd.f32 %v712_v18, %v676_v44  ;;  %v790_v2 = vmul.f32 %v789_v8, %v2754_v27  ;;  %v4118_v26 = vld [vmem:[#allocation37_spill] sm:$0xff]  ;;  %s3058_s25 = sld [smem:[#allocation4 + $0x3a]]  ;;  %s3273_s29 = sld [smem:[#allocation4 + $0x44]] }
 0x221   : > { %v567_v17 = vmul.f32 %v4116_v49, %v4115_v42  ;;  %v433_v25 = vadd.f32 %v431_v0, %v395_v19  ;;  %v463_v12 = vadd.f32 %v461_v13, %v423_v52  ;;  %v4121_v63 = vstv %s4109_s6  ;;  %v4125_v19 = vld [vmem:[#allocation45_spill] sm:$0xff]  ;;  %1117 = vrot.lane.b32.xlu1 %v3015_v30, %s4031_s1  ;;  %s4142_s6 = sld [smem:[#allocation62_spill]] }
 0x222   : > { %v4119_v28 = vstv %s4108_s26  ;;  %v539_v10 = vmul.f32 %v4121_v63, %v4120_v51  ;;  %v531_v46 = vadd.f32 %v529_v16, %v491_v5  ;;  %v607_v18 = vmul.f32 %v605_v54, %v4122_v31  ;;  %1203 = vrot.lane.b32.xlu0 %v2940_v35, %s4032_s5  ;;  %v4127_v63 = vld [vmem:[#allocation57_spill] sm:$0xff]  ;;  %v4131_v49 = vld [vmem:[#allocation49_spill] sm:$0xff]  ;;  %s4146_s26 = sld [smem:[#allocation83_spill]] }
 0x223   : > { %4114 = sst [smem:[#allocation52_spill]] %s3029_s27  ;;  %v509_v53 = vmul.f32 %v4119_v28, %v4118_v26  ;;  %v754_v44 = vadd.f32 %v752_v29, %v714_v6  ;;  %v878_v27 = vmul.f32 %v877_v61, %v874_v62  ;;  %v473_v13 = vadd.f32 %v471_v40, %v433_v25  ;;  %v4129_v40 = vld [vmem:[#allocation42_spill] sm:$0xff]  ;;  %v798_v25 = vpop.permute.xlu1 %797  ;;  %v4133_v28 = vld [vmem:[#allocation63_spill] sm:$0xff] }
 0x224   : > { %v501_v52 = vadd.f32 %v499_v15, %v463_v12  ;;  %v577_v0 = vmul.f32 %v575_v22, %v4125_v19  ;;  %v887_v54 = vstv %s2989_s15  ;;  %v569_v31 = vadd.f32 %v567_v17, %v531_v46  ;;  %v884_v17 = vpop.permute.xlu0 %883  ;;  %v4139_v19 = vld [vmem:[#allocation30_spill] sm:$0xff]  ;;  %s3300_s15 = sld [smem:[#allocation4 + $0x47]] }
 0x225   : > { %v645_v51 = vmul.f32 %v643_v24, %v4127_v63  ;;  %v792_v15 = vadd.f32 %v790_v2, %v754_v44  ;;  %v3064_v22 = vadd.f32 %v878_v27, %v2922_v3  ;;  %v511_v16 = vadd.f32 %v509_v53, %v473_v13  ;;  %1127 = vrot.lane.b32.xlu1 %v3015_v30, %s4043_s19  ;;  %v4143_v63 = vld [vmem:[#allocation25_spill] sm:$0xff] }
 0x226   : > { %v541_v29 = vadd.f32 %v539_v10, %v501_v52  ;;  %v4130_v5 = vstv %s4123_s4  ;;  %v617_v6 = vmul.f32 %v615_v7, %v4131_v49  ;;  %v609_v12 = vadd.f32 %v607_v18, %v569_v31  ;;  %v4132_v10 = vld [vmem:[#allocation46_spill] sm:$0xff]  ;;  %1213 = vrot.lane.b32.xlu0 %v2940_v35, %s4044_s13  ;;  %s4138_s4 = sld [smem:[#allocation60_spill]] }
 0x227   : > { %v549_v42 = vmul.f32 %v4130_v5, %v4129_v40  ;;  %v685_v24 = vmul.f32 %v683_v47, %v2712_v14  ;;  %v868_v3 = vmul.f32 %v867_v1, %v864_v23  ;;  %v888_v2 = vmul.f32 %v887_v54, %v884_v17  ;;  %v808_v13 = vpop.permute.xlu1 %807  ;;  %v4148_v40 = vld [vmem:[#allocation27_spill] sm:$0xff] }
 0x228   : > { %v579_v53 = vadd.f32 %v577_v0, %v541_v29  ;;  %v587_v26 = vmul.f32 %v585_v39, %v4132_v10  ;;  %v655_v62 = vmul.f32 %v653_v48, %v4133_v28  ;;  %v905_v7 = vstv %s3029_s27  ;;  %v4136_v48 = vld [vmem:[#allocation26_spill] sm:$0xff]  ;;  %v902_v52 = vpop.permute.xlu0 %901  ;;  %s4160_s27 = sld [smem:[#allocation88_spill]] }
 0x229   : > { %v647_v14 = vadd.f32 %v645_v51, %v609_v12  ;;  %v723_v47 = vmul.f32 %v721_v38, %v2834_v59  ;;  %v830_v39 = vadd.f32 %v2672_v57, %v792_v15  ;;  %v3097_v23 = vadd.f32 %v888_v2, %v2961_v20  ;;  %1137 = vrot.lane.b32.xlu1 %v3015_v30, %s4032_s5  ;;  %v4151_v12 = vld [vmem:[#allocation70_spill] sm:$0xff] }
 0x22a   : > { %v4137_v46 = vstv %s2594_s7  ;;  %v551_v44 = vadd.f32 %v549_v42, %v511_v16  ;;  %v619_v27 = vadd.f32 %v617_v6, %v579_v53  ;;  %v441_v38 = vmul.f32 %v439_v45, %v4139_v19  ;;  %s4145_s7 = sld [smem:[#allocation84_spill]]  ;;  %1223 = vrot.lane.b32.xlu0 %v2940_v35, %s4054_s22  ;;  %v4150_v6 = vld [vmem:[#allocation34_spill] sm:$0xff]  ;;  %v4153_v53 = vld [vmem:[#allocation31_spill] sm:$0xff] }
 0x22b   : > { %v363_v18 = vmul.f32 %v4137_v46, %v4136_v48  ;;  %v687_v57 = vadd.f32 %v685_v24, %v647_v14  ;;  %v870_v59 = vadd.f32 %v868_v3, %v830_v39  ;;  %v906_v20 = vmul.f32 %v905_v7, %v902_v52  ;;  %v4156_v14 = vld [vmem:[#allocation39_spill] sm:$0xff] }
 0x22c   : > { %v589_v0 = vadd.f32 %v587_v26, %v551_v44  ;;  %v657_v31 = vadd.f32 %v655_v62, %v619_v27  ;;  %v4144_v51 = vstv %s4135_s11  ;;  %v915_v45 = vstv %s3058_s25  ;;  %v818_v26 = vpop.permute.xlu1 %817  ;;  %v912_v28 = vpop.permute.xlu0 %911  ;;  %s3309_s25 = sld [smem:[#allocation4 + $0x48]]  ;;  %s3421_s11 = sld [smem:[#allocation4 + $0x4d]] }
 0x22d   : > { %v625_v15 = vmul.f32 %v4144_v51, %v4143_v63  ;;  %v405_v16 = vadd.f32 %v3007_v21, %v363_v18  ;;  %v725_v29 = vadd.f32 %v723_v47, %v687_v57  ;;  %v4149_v5 = vstv %s4138_s4  ;;  %1147 = vrot.lane.b32.xlu1 %v3015_v30, %s4044_s13  ;;  %s3154_s4 = sld [smem:[#allocation4 + $0x3d]] }
 0x22e   : > { %v693_v42 = vmul.f32 %v4149_v5, %v4148_v40  ;;  %v3123_v49 = vadd.f32 %v906_v20, %v870_v59  ;;  %v481_v17 = vmul.f32 %v479_v33, %v4150_v6  ;;  %v665_v24 = vmul.f32 %v663_v55, %v4151_v12  ;;  %v3144_v55 = vld [vmem:[#allocation2 + $0x1e] sm:$0xff] }
 0x22f   : > { %v4152_v3 = vstv %s4141_s17  ;;  %v4154_v10 = vstv %s4142_s6  ;;  %v443_v62 = vadd.f32 %v441_v38, %v405_v16  ;;  %v4158_v48 = vstv %s4146_s26  ;;  %1241 = vrot.lane.b32.xlu0 %v3144_v55, %s4059_s0  ;;  %s3410_s6 = sld [smem:[#allocation4 + $0x57]]  ;;  %s3414_s26 = sld [smem:[#allocation4 + $0x56]] }
 0x230   : > { %v733_v2 = vmul.f32 %v4152_v3, %v2869_v4  ;;  %v761_v21 = vmul.f32 %v4154_v10, %v4153_v53  ;;  %v4157_v47 = vstv %s4145_s7  ;;  %v801_v33 = vmul.f32 %v4158_v48, %v798_v25  ;;  %v836_v20 = vpop.permute.xlu1 %835  ;;  %v4168_v3 = vld [vmem:[#allocation47_spill] sm:$0xff]  ;;  %s3412_s7 = sld [smem:[#allocation4 + $0x4c]]  ;;  %s1947_s17 = smov 16  }
 0x231   : > { %v519_v39 = vmul.f32 %v4157_v47, %v4156_v14  ;;  %v916_v46 = vmul.f32 %v915_v45, %v912_v28  ;;  %v627_v18 = vadd.f32 %v625_v15, %v589_v0  ;;  %v703_v4 = vmul.f32 %v701_v43, %v2752_v60  ;;  %v922_v0 = vpop.permute.xlu0 %921  ;;  %1157 = vrot.lane.b32.xlu1 %v3015_v30, %s4054_s22 }
 0x232   : > { %v695_v44 = vadd.f32 %v693_v42, %v657_v31  ;;  %v925_v25 = vstv %s3090_s30  ;;  %v771_v27 = vmul.f32 %v769_v50, %v2970_v32  ;;  %v763_v52 = vadd.f32 %v761_v21, %v725_v29  ;;  %s3339_s30 = sld [smem:[#allocation4 + $0x4b]] }
 0x233   : > { %v3160_v19 = vadd.f32 %v916_v46, %v3064_v22  ;;  %v895_v60 = vstv %s3099_s20  ;;  %v483_v43 = vadd.f32 %v481_v17, %v443_v62  ;;  %v667_v38 = vadd.f32 %v665_v24, %v627_v18  ;;  %1251 = vrot.lane.b32.xlu0 %v3144_v55, %s4031_s1  ;;  %v1809_v17 = vld [vmem:[#allocation2 + $0xb] sm:$0xff]  ;;  %s3408_s20 = sld [smem:[#allocation4 + $0x52]] }
 0x234   : > { %v735_v57 = vadd.f32 %v733_v2, %v695_v44  ;;  %v743_v59 = vmul.f32 %v741_v56, %v2897_v41  ;;  %v803_v31 = vadd.f32 %v801_v33, %v763_v52  ;;  %v4161_v63 = vstv %s2804_s9  ;;  %v4164_v41 = vld [vmem:[#allocation35_spill] sm:$0xff]  ;;  %s4165_s9 = sld [smem:[#allocation89_spill]]  ;;  %v846_v21 = vpop.permute.xlu1 %845 }
 0x235   : > { %v811_v50 = vmul.f32 %v4161_v63, %v808_v13  ;;  %v4163_v32 = vstv %s4159_s10  ;;  %v926_v51 = vmul.f32 %v925_v25, %v922_v0  ;;  %v521_v15 = vadd.f32 %v519_v39, %v483_v43  ;;  %v932_v62 = vpop.permute.xlu0 %931  ;;  %v3200_v33 = vld [vmem:[#allocation2 + $0x25] sm:$0xff]  ;;  %s3423_s10 = sld [smem:[#allocation4 + $0x5a]] }
 0x236   : > { %v839_v22 = vmul.f32 %v4163_v32, %v836_v20  ;;  %v705_v16 = vadd.f32 %v703_v4, %v667_v38  ;;  %v896_v56 = vmul.f32 %v895_v60, %v4164_v41  ;;  %v935_v29 = vstv %s3117_s14  ;;  %1175 = vrot.lane.b32.xlu1 %v3200_v33, %s4059_s0  ;;  %s3418_s14 = sld [smem:[#allocation4 + $0x50]] }
 0x237   : > { %v773_v13 = vadd.f32 %v771_v27, %v735_v57  ;;  %v4166_v40 = vstv %s4160_s27  ;;  %v3186_v6 = vadd.f32 %v926_v51, %v3097_v23  ;;  %v4167_v12 = vstv %s4162_s21  ;;  %1261 = vrot.lane.b32.xlu0 %v3144_v55, %s4043_s19  ;;  %s3427_s27 = sld [smem:[#allocation4 + $0x54]]  ;;  %s3435_s21 = sld [smem:[#allocation4 + $0x5e]] }
 0x238   : > { %v781_v5 = vmul.f32 %v4166_v40, %v3002_v11  ;;  %v841_v42 = vadd.f32 %v839_v22, %v803_v31  ;;  %v557_v24 = vmul.f32 %v1809_v17, %v4167_v12  ;;  %v4169_v2 = vstv %s2822_s24  ;;  %s3207_s24 = sld [smem:[#allocation4 + $0x40]]  ;;  %v856_v38 = vpop.permute.xlu1 %855 }
 0x239   : > { %v597_v53 = vmul.f32 %v4169_v2, %v4168_v3  ;;  %v745_v10 = vadd.f32 %v743_v59, %v705_v16  ;;  %v898_v28 = vadd.f32 %v896_v56, %v2994_v37  ;;  %v813_v14 = vadd.f32 %v811_v50, %v773_v13  ;;  %v942_v57 = vpop.permute.xlu0 %941  ;;  %v4175_v59 = vld [vmem:[#allocation77_spill] sm:$0xff] }
 0x23a   : > { %v4170_v47 = vstv %s2851_s28  ;;  %v4171_v39 = vstv %s4165_s9  ;;  %v936_v48 = vmul.f32 %v935_v29, %v932_v62  ;;  %v559_v46 = vadd.f32 %v557_v24, %v521_v15  ;;  %s4174_s28 = sld [smem:[#allocation90_spill]]  ;;  %1185 = vrot.lane.b32.xlu1 %v3200_v33, %s4031_s1  ;;  %s3437_s9 = sld [smem:[#allocation4 + $0x5b]] }
 0x23b   : > { %v821_v11 = vmul.f32 %v4170_v47, %v818_v26  ;;  %v849_v23 = vmul.f32 %v4171_v39, %v846_v21  ;;  %v945_v37 = vstv %s3154_s4  ;;  %v4172_v26 = vld [vmem:[#allocation51_spill] sm:$0xff]  ;;  %v4173_v18 = vstv %s2860_s8  ;;  %1271 = vrot.lane.b32.xlu0 %v3144_v55, %s4032_s5  ;;  %s3224_s8 = sld [smem:[#allocation4 + $0x41]] }
 0x23c   : > { %v635_v4 = vmul.f32 %v4173_v18, %v4172_v26  ;;  %v783_v44 = vadd.f32 %v781_v5, %v745_v10  ;;  %v938_v52 = vadd.f32 %v936_v48, %v898_v28  ;;  %v599_v43 = vadd.f32 %v597_v53, %v559_v46  ;;  %v866_v13 = vpop.permute.xlu1 %865  ;;  %s3425_s4 = sld [smem:[#allocation4 + $0x51]] }
 0x23d   : > { %v851_v27 = vadd.f32 %v849_v23, %v813_v14  ;;  %v4176_v20 = vstv %s2878_s3  ;;  %v4177_v63 = vstv %s2885_s18  ;;  %v946_v32 = vmul.f32 %v945_v37, %v942_v57  ;;  %v952_v40 = vpop.permute.xlu0 %951  ;;  %s3242_s18 = sld [smem:[#allocation4 + $0x42]]  ;;  %s3248_s3 = sld [smem:[#allocation4 + $0x3f]] }
 0x23e   : > { %v675_v0 = vmul.f32 %v4176_v20, %v4175_v59  ;;  %v823_v31 = vadd.f32 %v821_v11, %v783_v44  ;;  %v859_v50 = vmul.f32 %v4177_v63, %v856_v38  ;;  %v955_v22 = vstv %s3180_s23  ;;  %1195 = vrot.lane.b32.xlu1 %v3200_v33, %s4043_s19  ;;  %v4184_v20 = vld [vmem:[#allocation43_spill] sm:$0xff]  ;;  %s3442_s23 = sld [smem:[#allocation4 + $0x55]] }
 0x23f   : > { %v637_v51 = vadd.f32 %v635_v4, %v599_v43  ;;  %v948_v56 = vadd.f32 %v946_v32, %v3123_v49  ;;  %v4179_v17 = vstv %s2909_s2  ;;  %v956_v24 = vmul.f32 %v955_v22, %v952_v40  ;;  %1281 = vrot.lane.b32.xlu0 %v3144_v55, %s4044_s13  ;;  %s4180_s2 = sld [smem:[#allocation53_spill]] }
 0x240   : > { %v4178_v15 = vstv %s4174_s28  ;;  %v3229_v41 = vadd.f32 %v859_v50, %v823_v31  ;;  %v753_v12 = vmul.f32 %v4179_v17, %v2934_v36  ;;  %v791_v3 = vmul.f32 %v789_v8, %v3043_v9  ;;  %v876_v36 = vpop.permute.xlu1 %875  ;;  %s3453_s28 = sld [smem:[#allocation4 + $0x58]] }
 0x241   : > { %v713_v16 = vmul.f32 %v4178_v15, %v2792_v34  ;;  %v677_v5 = vadd.f32 %v675_v0, %v637_v51  ;;  %v973_v34 = vstv %s3207_s24  ;;  %v958_v2 = vadd.f32 %v956_v24, %v3160_v19  ;;  %v970_v53 = vpop.permute.xlu0 %969  ;;  %v3295_v51 = vld [vmem:[#allocation2 + $0x26] sm:$0xff]  ;;  %s3445_s24 = sld [smem:[#allocation4 + $0x5f]] }
 0x242   : > { %v879_v21 = vmul.f32 %v877_v61, %v876_v36  ;;  %v974_v28 = vmul.f32 %v973_v34, %v970_v53  ;;  %1205 = vrot.lane.b32.xlu1 %v3200_v33, %s4032_s5  ;;  %v983_v9 = vstv %s3224_s8  ;;  %v4182_v61 = vld [vmem:[#allocation38_spill] sm:$0xff]  ;;  %v869_v23 = vmul.f32 %v867_v1, %v866_v13  ;;  %s3456_s8 = sld [smem:[#allocation4 + $0x59]] }
 0x243   : > { %v715_v49 = vadd.f32 %v713_v16, %v677_v5  ;;  %1291 = vrot.lane.b32.xlu0 %v3144_v55, %s4054_s22  ;;  %v963_v1 = vstv %s3248_s3  ;;  %v1003_v57 = vstv %s3259_s16  ;;  %v1013_v15 = vstv %s3273_s29  ;;  %v1810_v24 = vld [vmem:[#allocation2 + $0x21] sm:$0xff]  ;;  %s3487_s3 = sld [smem:[#allocation4 + $0x60]]  ;;  %s3499_s16 = sld [smem:[#allocation4 + $0x61]] }
 0x244   : > { %v881_v19 = vadd.f32 %v879_v21, %v841_v42  ;;  %v976_v62 = vadd.f32 %v974_v28, %v938_v52  ;;  %v886_v14 = vpop.permute.xlu1 %885  ;;  %v993_v42 = vstv %s3242_s18  ;;  %v964_v0 = vmul.f32 %v963_v1, %v4184_v20  ;;  %s3471_s18 = sld [smem:[#allocation4 + $0x5c]]  ;;  %s1948_s29 = smov 32  }
 0x245   : > { %v755_v10 = vadd.f32 %v753_v12, %v715_v49  ;;  %v980_v47 = vpop.permute.xlu0 %979  ;;  %v4183_v11 = vstv %s4180_s2  ;;  %v889_v48 = vmul.f32 %v887_v54, %v886_v14  ;;  %v1023_v5 = vstv %s3283_s12  ;;  %s3473_s2 = sld [smem:[#allocation4 + $0x5d]]  ;;  %s1949_s12 = smov 48  }
 0x246   : > { %v829_v39 = vmul.f32 %v4183_v11, %v4182_v61  ;;  %v984_v46 = vmul.f32 %v983_v9, %v980_v47  ;;  %1215 = vrot.lane.b32.xlu1 %v3200_v33, %s4044_s13  ;;  %v966_v50 = vadd.f32 %v964_v0, %v3186_v6  ;;  %v897_v49 = vmul.f32 %v1810_v24, %v895_v60 }
 0x247   : > { %v793_v8 = vadd.f32 %v791_v3, %v755_v10  ;;  %v891_v18 = vadd.f32 %v889_v48, %v851_v27  ;;  %v1041_v10 = vstv %s3300_s15  ;;  %s1950_s15 = smov 64  }
 0x248   : > { %v986_v4 = vadd.f32 %v984_v46, %v948_v56  ;;  %v904_v44 = vpop.permute.xlu1 %903 }
 0x249   : > { %v831_v26 = vadd.f32 %v829_v39, %v793_v8  ;;  %v990_v52 = vpop.permute.xlu0 %989  ;;  %v907_v54 = vmul.f32 %v905_v7, %v904_v44 }
 0x24a   : > { %v994_v38 = vmul.f32 %v993_v42, %v990_v52  ;;  %1225 = vrot.lane.b32.xlu1 %v3200_v33, %s4054_s22 }
 0x24b   : > { %v871_v43 = vadd.f32 %v869_v23, %v831_v26 }
 0x24c   : > { %v3285_v27 = vadd.f32 %v994_v38, %v958_v2  ;;  %v914_v31 = vpop.permute.xlu1 %913 }
 0x24d   : > { %v909_v59 = vadd.f32 %v907_v54, %v871_v43  ;;  %v1000_v63 = vpop.permute.xlu0 %999  ;;  %v917_v7 = vmul.f32 %v915_v45, %v914_v31  ;;  %v1811_v54 = vld [vmem:[#allocation2 + $0x1b] sm:$0xff] }
 0x24e   : > { %v1004_v32 = vmul.f32 %v1003_v57, %v1000_v63  ;;  %1243 = vrot.lane.b32.xlu1 %v3295_v51, %s4059_s0  ;;  %s3321_s0 = sld [smem:[#allocation4 + $0x49]]  ;;  %v1081_v63 = vstv %s3339_s30  ;;  %s4223_s30 = sld [smem:[#allocation17_spill]] }
 0x24f   : > { %v919_v16 = vadd.f32 %v917_v7, %v881_v19  ;;  %v1051_v19 = vstv %s3309_s25  ;;  %s1951_s25 = smov 80  }
 0x250   : > { %v1006_v56 = vadd.f32 %v1004_v32, %v966_v50  ;;  %v924_v13 = vpop.permute.xlu1 %923 }
 0x251   : > { %v1010_v40 = vpop.permute.xlu0 %1009  ;;  %v927_v45 = vmul.f32 %v925_v25, %v924_v13  ;;  %v899_v25 = vadd.f32 %v897_v49, %v3229_v41 }
 0x252   : > { %v1014_v6 = vmul.f32 %v1013_v15, %v1010_v40  ;;  %1253 = vrot.lane.b32.xlu1 %v3295_v51, %s4031_s1  ;;  %s3323_s1 = sld [smem:[#allocation4 + $0x46]] }
 0x253   : > { %v929_v17 = vadd.f32 %v927_v45, %v891_v18 }
 0x254   : > { %v1016_v12 = vadd.f32 %v1014_v6, %v976_v62  ;;  %v934_v3 = vpop.permute.xlu1 %933  ;;  %v1812_v6 = vld [vmem:[#allocation2 + $0x22] sm:$0xff] }
 0x255   : > { %v1020_v2 = vpop.permute.xlu0 %1019  ;;  %v937_v36 = vmul.f32 %v935_v29, %v934_v3 }
 0x256   : > { %v1024_v53 = vmul.f32 %v1023_v5, %v1020_v2  ;;  %1263 = vrot.lane.b32.xlu1 %v3295_v51, %s4043_s19  ;;  %s3332_s19 = sld [smem:[#allocation4 + $0x4a]] }
 0x257   : > { %v939_v21 = vadd.f32 %v937_v36, %v899_v25 }
 0x258   : > { %v1026_v28 = vadd.f32 %v1024_v53, %v986_v4  ;;  %v944_v60 = vpop.permute.xlu1 %943  ;;  %v1031_v18 = vstv %s3323_s1  ;;  %s1953_s1 = smov 112  }
 0x259   : > { %v1038_v8 = vpop.permute.xlu0 %1037  ;;  %v947_v41 = vmul.f32 %v945_v37, %v944_v60  ;;  %v1061_v37 = vstv %s3321_s0  ;;  %v1032_v38 = vmul.f32 %v1811_v54, %v1031_v18  ;;  %s1952_s0 = smov 96  }
 0x25a   : > { %v1042_v29 = vmul.f32 %v1041_v10, %v1038_v8  ;;  %1273 = vrot.lane.b32.xlu1 %v3295_v51, %s4032_s5  ;;  %s3400_s5 = sld [smem:[#allocation4 + $0x4e]] }
 0x25b   : > { %v949_v62 = vadd.f32 %v947_v41, %v909_v59  ;;  %v1034_v31 = vadd.f32 %v1032_v38, %v3285_v27 }
 0x25c   : > { %v1044_v14 = vadd.f32 %v1042_v29, %v1006_v56  ;;  %v954_v47 = vpop.permute.xlu1 %953 }
 0x25d   : > { %v1048_v61 = vpop.permute.xlu0 %1047  ;;  %v957_v11 = vmul.f32 %v955_v22, %v954_v47  ;;  %v1071_v22 = vstv %s3332_s19  ;;  %s4222_s19 = sld [smem:[#allocation23_spill]] }
 0x25e   : > { %v1052_v39 = vmul.f32 %v1051_v19, %v1048_v61  ;;  %1283 = vrot.lane.b32.xlu1 %v3295_v51, %s4044_s13  ;;  %s3398_s13 = sld [smem:[#allocation4 + $0x4f]] }
 0x25f   : > { %v959_v23 = vadd.f32 %v957_v11, %v919_v16 }
 0x260   : > { %v3341_v48 = vadd.f32 %v1052_v39, %v1016_v12  ;;  %v972_v46 = vpop.permute.xlu1 %971 }
 0x261   : > { %v1058_v26 = vpop.permute.xlu0 %1057  ;;  %v975_v4 = vmul.f32 %v973_v34, %v972_v46 }
 0x262   : > { %v1062_v44 = vmul.f32 %v1061_v37, %v1058_v26  ;;  %1293 = vrot.lane.b32.xlu1 %v3295_v51, %s4054_s22  ;;  %s3402_s22 = sld [smem:[#allocation4 + $0x53]] }
 0x263   : > { %v977_v52 = vadd.f32 %v975_v4, %v939_v21 }
 0x264   : > { %v3349_v43 = vadd.f32 %v1062_v44, %v1026_v28  ;;  %v982_v59 = vpop.permute.xlu1 %981 }
 0x265   : > { %v1068_v20 = vpop.permute.xlu0 %1067  ;;  %v985_v0 = vmul.f32 %v983_v9, %v982_v59  ;;  %v965_v9 = vmul.f32 %v1812_v6, %v963_v1  ;;  %v1091_v6 = vstv %s3412_s7 }
 0x266   : > { %v1072_v34 = vmul.f32 %v1071_v22, %v1068_v20 }
 0x267   : > { %v987_v7 = vadd.f32 %v985_v0, %v949_v62  ;;  %v967_v24 = vadd.f32 %v965_v9, %v929_v17 }
 0x268   : > { %v3355_v50 = vadd.f32 %v1072_v34, %v1034_v31  ;;  %v992_v32 = vpop.permute.xlu1 %991  ;;  %v1119_v34 = vstv %s3398_s13  ;;  %s4225_s13 = sld [smem:[#allocation22_spill]] }
 0x269   : > { %v1078_v16 = vpop.permute.xlu0 %1077  ;;  %v995_v56 = vmul.f32 %v993_v42, %v992_v32 }
 0x26a   : > { %v1082_v13 = vmul.f32 %v1081_v63, %v1078_v16 }
 0x26b   : > { %v997_v40 = vadd.f32 %v995_v56, %v959_v23 }
 0x26c   : > { %v3359_v45 = vadd.f32 %v1082_v13, %v1044_v14  ;;  %v1002_v27 = vpop.permute.xlu1 %1001  ;;  %v1149_v13 = vstv %s3408_s20 }
 0x26d   : > { %v3363_v12 = vpop.permute.xlu0 %1087  ;;  %v1005_v49 = vmul.f32 %v1003_v57, %v1002_v27 }
 0x26e   : > { %s4227_s20 = sshll.u32 %s4225_s13, 3 }
 0x26f   : > { %v1007_v3 = vadd.f32 %v1005_v49, %v967_v24  ;;  %v1187_v24 = vstv %s3414_s26 }
 0x270   : > { %v1012_v2 = vpop.permute.xlu1 %1011 }
 0x271   : > { %v3367_v25 = vpop.permute.xlu0 %1105  ;;  %v1015_v42 = vmul.f32 %v1013_v15, %v1012_v2 }
 0x273   : > { %v1017_v36 = vadd.f32 %v1015_v42, %v977_v52  ;;  %v1129_v42 = vstv %s3418_s14 }
 0x274   : > { %v1022_v53 = vpop.permute.xlu1 %1021 }
 0x275   : > { %v1116_v21 = vpop.permute.xlu0 %1115  ;;  %v1025_v28 = vmul.f32 %v1023_v5, %v1022_v53  ;;  %v1033_v5 = vmul.f32 %v1031_v18, %v2802_v58  ;;  %v1092_v53 = vmul.f32 %v1091_v6, %v3363_v12 }
 0x276   : > { %v1120_v56 = vmul.f32 %v1119_v34, %v1116_v21  ;;  %v1099_v21 = vstv %s3421_s11  ;;  %s4228_s11 = sld [smem:[#allocation93_spill]] }
 0x277   : > { %v1027_v60 = vadd.f32 %v1025_v28, %v987_v7  ;;  %v1035_v46 = vadd.f32 %v1033_v5, %v997_v40  ;;  %v1159_v7 = vstv %s3402_s22  ;;  %v1197_v40 = vstv %s3410_s6  ;;  %s1723_s22 = sshll.u32 %s4223_s30, 7  ;;  %s171_s6 = scalar_lea.vmem [#allocation9], %s4227_s20 }
 0x278   : > { %v1040_v1 = vpop.permute.xlu1 %1039  ;;  %v1122_v2 = vadd.f32 %v1120_v56, %v3359_v45  ;;  %v1227_v28 = vstv %s3423_s10  ;;  %v1217_v56 = vstv %s3456_s8  ;;  %s1526_s7 = sshll.u32 %s171_s6, 4  ;;  %s3817_s7 = int_to_ptr.vmem [resolvable:$true] %s1526_s7 }
 0x279   : > { %v3373_v8 = vpop.permute.xlu0 %1125  ;;  %v1043_v41 = vmul.f32 %v1041_v10, %v1040_v1 }
 0x27a   : > { %v1130_v12 = vmul.f32 %v1129_v42, %v3373_v8 }
 0x27b   : > { %v1045_v17 = vadd.f32 %v1043_v41, %v1007_v3 }
 0x27c   : > { %v1050_v29 = vpop.permute.xlu1 %1049  ;;  %s3815_s10 = scalar_lea.hbm %s4228_s11, %s1723_s22 }
 0x27d   : > { %v3377_v57 = vpop.permute.xlu0 %1135  ;;  %v1053_v62 = vmul.f32 %v1051_v19, %v1050_v29 }
 0x27f   : > { %v3379_v14 = vadd.f32 %v1053_v62, %v1017_v36  ;;  %v1265_v62 = vstv %s3435_s21  ;;  %s1857_s21 = scalar_lea.vmem %s3817_s7, 128 }
 0x280   : > { %v1060_v47 = vpop.permute.xlu1 %1059  ;;  %p1858_p8 = scmp.ne.s32.totalorder %s3817_s7, %s1857_s21 }
 0x281   : > { %v1146_v15 = vpop.permute.xlu0 %1145  ;;  %v1063_v61 = vmul.f32 %v1061_v37, %v1060_v47 }
 0x283   : > { %v3381_v11 = vadd.f32 %v1063_v61, %v1027_v60  ;;  %v1139_v60 = vstv %s3425_s4  ;;  %s4229_s4 = smov %s4228_s11 }
 0x284   : > { %v1070_v39 = vpop.permute.xlu1 %1069 }
 0x285   : > { %v1156_v23 = vpop.permute.xlu0 %1155  ;;  %v1073_v26 = vmul.f32 %v1071_v22, %v1070_v39 }
 0x286   : > { %v1160_v27 = vmul.f32 %v1159_v7, %v1156_v23  ;;  %v1094_v23 = vadd.f32 %v1092_v53, %v3341_v48 }
 0x287   : > { %v3384_v4 = vadd.f32 %v1073_v26, %v1035_v46  ;;  %v1140_v46 = vmul.f32 %v1139_v60, %v3377_v57  ;;  %v1177_v26 = vstv %s3442_s23 }
 0x288   : > { %v1080_v10 = vpop.permute.xlu1 %1079  ;;  %v1162_v1 = vadd.f32 %v1160_v27, %v1122_v2 }
 0x289   : > { %v3386_v44 = vpop.permute.xlu0 %1173  ;;  %v1083_v52 = vmul.f32 %v1081_v63, %v1080_v10  ;;  %v1109_v63 = vstv %s3400_s5  ;;  %v1275_v10 = vstv %s3445_s24  ;;  %s4226_s5 = sld [smem:[#allocation21_spill]] }
 0x28a   : > { %v1110_v9 = vmul.f32 %v1109_v63, %v3367_v25  ;;  %v1150_v25 = vmul.f32 %v1149_v13, %v1146_v15  ;;  %v1235_v15 = vstv %s3437_s9  ;;  %v1178_v2 = vmul.f32 %v1177_v26, %v3386_v44  ;;  %s1954_s9 = smov [#allocation9]  }
 0x28b   : > { %v3388_v19 = vadd.f32 %v1083_v52, %v1045_v17  ;;  %v1167_v17 = vstv %s3427_s27  ;;  %v1236_v48 = vmul.f32 %v1235_v15, %v3144_v55  ;;  %s1512_s27 = scalar_lea.sflag [#allocation6], %s4225_s13  ;;  %s1861_s23 = sshll.u32 %s1954_s9, 4  ;;  %s1862_s23 = int_to_ptr.vmem [resolvable:$false] %s1861_s23 }
 0x28c   : > { %v3390_v54 = vpop.permute.xlu1 %1089  ;;  %v1112_v45 = vadd.f32 %v1110_v9, %v3355_v50  ;;  %v1813_v50 = vld [vmem:[#allocation2 + $0x1c] sm:$0xff]  ;;  %v1168_v55 = vmul.f32 %v1167_v17, %v2940_v35  ;;  %s1863_s24 = scalar_lea.vmem %s1862_s23, 256  ;;  %p1864_p1 = scmp.lt.s32.totalorder %s3817_s7, %s1862_s23 }
 0x28d   : > { %v1184_v38 = vpop.permute.xlu0 %1183  ;;  %v1100_v61 = vmul.f32 %v1813_v50, %v1099_v21  ;;  %p1865_p2 = scmp.lt.s32.totalorder %s1863_s24, %s1857_s21 }
 0x28e   : > { %v1188_v41 = vmul.f32 %v1187_v24, %v1184_v38  ;;  %v1152_v5 = vadd.f32 %v1150_v25, %v1112_v45  ;;  %v1207_v38 = vstv %s3453_s28 }
 0x28f   : > { %v1102_v57 = vadd.f32 %v1100_v61, %v3349_v43  ;;  %v1255_v43 = vstv %s3473_s2  ;;  %p4230_p9 = scmp.ne.s32.totalorder %s4226_s5, 0  ;;  %p1866_p12 = por %p1865_p2, %p1864_p1 }
 0x290   : > { %v3392_v37 = vpop.permute.xlu1 %1107  ;;  %v1190_v52 = vadd.f32 %v1188_v41, %v1152_v5  ;;  %v1285_v5 = vstv %s3487_s3 }
 0x291   : > { %v1194_v59 = vpop.permute.xlu0 %1193  ;;  %v1142_v45 = vadd.f32 %v1140_v46, %v1102_v57  ;;  %v1295_v57 = vstv %s3499_s16  ;;  %p1859_p11 = pnand %p1858_p8, %p4230_p9 }
 0x292   : > { %v1198_v36 = vmul.f32 %v1197_v40, %v1194_v59 }
 0x293   : > { %v1180_v46 = vadd.f32 %v1178_v2, %v1142_v45  ;;  %p1860_p5 = pneg %p1859_p11 }
 0x294   : > { %v3394_v20 = vpop.permute.xlu1 %1117  ;;  %v1200_v39 = vadd.f32 %v1198_v36, %v1162_v1  ;;  %v1245_v1 = vstv %s3471_s18 }
 0x295   : > { %v3396_v58 = vpop.permute.xlu0 %1203  ;;  %p1867_p0 = pnand %p1866_p12, %p1860_p5 }
 0x296   : > { %v1238_v36 = vadd.f32 %v1236_v48, %v1200_v39  ;;  %v1208_v41 = vmul.f32 %v1207_v38, %v3396_v58 }
 0x298   : > { %v3404_v18 = vpop.permute.xlu1 %1127 }
 0x299   : > { %v3406_v22 = vpop.permute.xlu0 %1213 }
 0x29c   : > { %v3416_v0 = vpop.permute.xlu1 %1137 }
 0x29d   : > { %v1224_v31 = vpop.permute.xlu0 %1223 }
 0x29e   : > { %v1228_v8 = vmul.f32 %v1227_v28, %v1224_v31  ;;  %v1132_v31 = vadd.f32 %v1130_v12, %v1094_v23  ;;  %v1218_v12 = vmul.f32 %v1217_v56, %v3406_v22  ;;  %v1946_v23 = vmov 1966171168  }
 0x29f   : > { %v1313_v35 = vunpack.c.l.s4 %v1946_v23 }
 0x2a0   : > { %v3431_v32 = vpop.permute.xlu1 %1147  ;;  %v1230_v25 = vadd.f32 %v1228_v8, %v1190_v52  ;;  %v1170_v50 = vadd.f32 %v1168_v55, %v1132_v31  ;;  %v1306_v8 = vlaneseq }
 0x2a1   : > { %v3433_v16 = vpop.permute.xlu0 %1241  ;;  %v1314_v45 = vunpack.c.0.s8 %v1313_v35 }
 0x2a2   : > { %v1246_v52 = vmul.f32 %v1245_v1, %v3433_v16  ;;  %v1210_v22 = vadd.f32 %v1208_v41, %v1170_v50  ;;  %vm3547_vm2 = vcmp.lt.s32.totalorder %v1306_v8, 16  ;;  %vm3639_vm3 = vcmp.ge.s32.totalorder %v1306_v8, 16 }
 0x2a3   : > { %vm3644_vm4 = vcmp.lt.s32.totalorder %v1306_v8, 32  ;;  %vm3653_vm6 = vcmp.ge.s32.totalorder %v1306_v8, 32  ;;  %vm3658_vm7 = vcmp.lt.s32.totalorder %v1306_v8, 48  ;;  %vm3672_vm9 = vcmp.ge.s32.totalorder %v1306_v8, 48 }
 0x2a4   : > { %v3458_v49 = vpop.permute.xlu1 %1157  ;;  %vm3956_vm5 = vmand %vm3639_vm3, %vm3644_vm4  ;;  %vm3677_vm10 = vcmp.lt.s32.totalorder %v1306_v8, 64  ;;  %vm3691_vm12 = vcmp.ge.s32.totalorder %v1306_v8, 64  ;;  %vm3696_vm13 = vcmp.lt.s32.totalorder %v1306_v8, 80  ;;  %vm3710_vm15 = vcmp.ge.s32.totalorder %v1306_v8, 80 }
 0x2a5   : > { %v1252_v3 = vpop.permute.xlu0 %1251  ;;  %vm3955_vm8 = vmand %vm3653_vm6, %vm3658_vm7  ;;  %vm3715_vm0 = vcmp.lt.s32.totalorder %v1306_v8, 96 }
 0x2a6   : > { %v1256_v58 = vmul.f32 %v1255_v43, %v1252_v3  ;;  %vm3953_vm11 = vmand %vm3672_vm9, %vm3677_vm10 }
 0x2a7   : > { %vm3954_vm14 = vmand %vm3691_vm12, %vm3696_vm13 }
 0x2a8   : > { %v3483_v29 = vpop.permute.xlu1 %1175  ;;  %vm3957_vm1 = vmand %vm3710_vm15, %vm3715_vm0 }
 0x2a9   : > { %v1262_v47 = vpop.permute.xlu0 %1261 }
 0x2aa   : > { %v1266_v59 = vmul.f32 %v1265_v62, %v1262_v47 }
 0x2ac   : > { %v3509_v9 = vpop.permute.xlu1 %1185  ;;  %v1268_v44 = vadd.f32 %v1266_v59, %v1230_v25  ;;  %v1220_v59 = vadd.f32 %v1218_v12, %v1180_v46  ;;  %v3539_v25 = vshrl.u32 %v1306_v8, 7  ;;  %v1121_v46 = vmul.f32 %v1119_v34, %v3394_v20 }
 0x2ad   : > { %v1272_v27 = vpop.permute.xlu0 %1271 }
 0x2ae   : > { %v1276_v53 = vmul.f32 %v1275_v10, %v1272_v27  ;;  %v1258_v2 = vadd.f32 %v1256_v58, %v1220_v59  ;;  %v3544_v12 = vsub.s32 %v1314_v45, %v3539_v25  ;;  %v1111_v59 = vmul.f32 %v1109_v63, %v3392_v37 }
 0x2b0   : > { %v1278_v47 = vadd.f32 %v1276_v53, %v1238_v36  ;;  %v1196_v61 = vpop.permute.xlu1 %1195  ;;  %v1248_v53 = vadd.f32 %v1246_v52, %v1210_v22  ;;  %v1113_v63 = vadd.f32 %v1111_v59, %v3384_v4 }
 0x2b1   : > { %v1282_v39 = vpop.permute.xlu0 %1281  ;;  %v1199_v20 = vmul.f32 %v1197_v40, %v1196_v61 }
 0x2b2   : > { %v1302_v48 = vadd.f32 %v1278_v47, %v1268_v44  ;;  %v1286_v27 = vmul.f32 %v1285_v5, %v1282_v39 }
 0x2b4   : > { %v3536_v31 = vpop.permute.xlu1 %1205  ;;  %v1288_v3 = vadd.f32 %v1286_v27, %v1248_v53  ;;  %v1123_v27 = vadd.f32 %v1121_v46, %v3388_v19  ;;  %v1189_v19 = vmul.f32 %v1187_v24, %v3509_v9  ;;  %v1101_v24 = vmul.f32 %v1099_v21, %v3015_v30 }
 0x2b5   : > { %v1292_v36 = vpop.permute.xlu0 %1291  ;;  %v1141_v9 = vmul.f32 %v1139_v60, %v3416_v0  ;;  %v1179_v30 = vmul.f32 %v1177_v26, %v3483_v29 }
 0x2b6   : > { %v1296_v16 = vmul.f32 %v1295_v57, %v1292_v36  ;;  %v1151_v36 = vmul.f32 %v1149_v13, %v3431_v32  ;;  %v1131_v32 = vmul.f32 %v1129_v42, %v3404_v18  ;;  %v1237_v18 = vmul.f32 %v1235_v15, %v3295_v51 }
 0x2b8   : > { %v1298_v55 = vadd.f32 %v1296_v16, %v1258_v2  ;;  %v1216_v41 = vpop.permute.xlu1 %1215 }
 0x2b9   : > { %v1219_v29 = vmul.f32 %v1217_v56, %v1216_v41 }
 0x2ba   : > { %v1300_v44 = vadd.f32 %v1298_v55, %v1288_v3  ;;  %v1169_v3 = vmul.f32 %v1167_v17, %v3200_v33 }
 0x2bc   : > { %v1304_v50 = vadd.f32 %v1302_v48, %v1300_v44  ;;  %v1226_v39 = vpop.permute.xlu1 %1225  ;;  %v1161_v48 = vmul.f32 %v1159_v7, %v3458_v49  ;;  %v1093_v7 = vmul.f32 %v1091_v6, %v3390_v54  ;;  %v1153_v49 = vadd.f32 %v1151_v36, %v1113_v63 }
 0x2bd   : > { %v1229_v54 = vmul.f32 %v1227_v28, %v1226_v39 }
 0x2be   : > { %v1318_v23 = vrot.slane %v1304_v50, %v3544_v12  ;;  %1310 = vst.msk [vmem:[#allocation3] sm:$0x1] %vm3547_vm2, %v1304_v50  ;;  %v1357_v53 = vcombine.high %v1304_v50, %v1304_v50  ;;  %v1163_v37 = vadd.f32 %v1161_v48, %v1123_v27  ;;  %v1095_v61 = vadd.f32 %v1093_v7, %v3379_v14 }
 0x2bf   : > { %v1191_v42 = vadd.f32 %v1189_v19, %v1153_v49  ;;  %v1103_v14 = vadd.f32 %v1101_v24, %v3381_v11  ;;  %v1209_v11 = vmul.f32 %v1207_v38, %v3536_v31 }
 0x2c0   : > { %v1319_v35 = vcombine.high %v1318_v23, %v1318_v23  ;;  %v1244_v52 = vpop.permute.xlu1 %1243  ;;  %v1326_v22 = vrot.slane %v1318_v23, %v3544_v12  ;;  %v1201_v13 = vadd.f32 %v1199_v20, %v1163_v37  ;;  %v1364_v4 = vrot.slane %v1357_v53, %v3544_v12 }
 0x2c1   : > { %v1133_v45 = vadd.f32 %v1131_v32, %v1095_v61  ;;  %v1231_v60 = vadd.f32 %v1229_v54, %v1191_v42  ;;  %v1247_v39 = vmul.f32 %v1245_v1, %v1244_v52  ;;  %v4205_v42 = vmov 0 }
 0x2c2   : > { %v1333_v58 = vrot.slane %v1319_v35, %v3544_v12  ;;  %v1341_v2 = vcombine.high %v1326_v22, %v1326_v22  ;;  %v1239_v21 = vadd.f32 %v1237_v18, %v1201_v13  ;;  %v1371_v15 = vrot.slane %v1364_v4, %v3544_v12 }
 0x2c3   : > { %v1379_v16 = vcombine.high %v1364_v4, %v1364_v4  ;;  %v1171_v44 = vadd.f32 %v1169_v3, %v1133_v45  ;;  %v4206_v42 = vsel %vm3715_vm0, 4294967295, %v4205_v42  ;;  %vm4215_vm0 = vmand %vm3639_vm3, %vm3644_vm4 }
 0x2c4   : > { %1334 = vrot.lane.b32.xlu0 %v1333_v58, %s1947_s17  ;;  %v1254_v34 = vpop.permute.xlu1 %1253  ;;  %v1349_v6 = vcombine.high %v1333_v58, %v1333_v58  ;;  %v1394_v22 = vcombine.high %v1371_v15, %v1371_v15  ;;  %vm4218_vm3 = vmand %vm3691_vm12, %vm3696_vm13  ;;  %vm4219_vm4 = vnez %v4206_v42 }
 0x2c5   : > { %v1257_v23 = vmul.f32 %v1255_v43, %v1254_v34  ;;  %v1386_v17 = vrot.slane %v1379_v16, %v3544_v12  ;;  %v1211_v35 = vadd.f32 %v1209_v11, %v1171_v44 }
 0x2c7   : > { %v1249_v41 = vadd.f32 %v1247_v39, %v1211_v35  ;;  %v1402_v52 = vcombine.high %v1386_v17, %v1386_v17  ;;  %v1505_v39 = vsub.s32 1, %v3539_v25 }
 0x2c8   : > { %1342 = vrot.lane.b32.xlu0 %v1341_v2, %s1948_s29  ;;  %v1264_v40 = vpop.permute.xlu1 %1263 }
 0x2c9   : > { %v1267_v28 = vmul.f32 %v1265_v62, %v1264_v40  ;;  %v1143_v62 = vadd.f32 %v1141_v9, %v1103_v14 }
 0x2cb   : > { %v1269_v26 = vadd.f32 %v1267_v28, %v1231_v60 }
 0x2cc   : > { %1350 = vrot.lane.b32.xlu0 %v1349_v6, %s1949_s12  ;;  %v1274_v0 = vpop.permute.xlu1 %1273 }
 0x2cd   : > { %v1277_v51 = vmul.f32 %v1275_v10, %v1274_v0  ;;  %v1181_v10 = vadd.f32 %v1179_v30, %v1143_v62 }
 0x2cf   : > { %v1279_v55 = vadd.f32 %v1277_v51, %v1239_v21  ;;  %v1221_v38 = vadd.f32 %v1219_v29, %v1181_v10 }
 0x2d0   : > { %1372 = vrot.lane.b32.xlu0 %v1371_v15, %s1950_s15  ;;  %v1284_v50 = vpop.permute.xlu1 %1283 }
 0x2d1   : > { %v1303_v33 = vadd.f32 %v1279_v55, %v1269_v26  ;;  %v1287_v56 = vmul.f32 %v1285_v5, %v1284_v50  ;;  %v1259_v46 = vadd.f32 %v1257_v23, %v1221_v38  ;;  %v1501_v50 = vsub.s32 0, %v3539_v25  ;;  %v1497_v38 = vld [vmem:[%s4222_s19] sm:$0xff] }
 0x2d3   : > { %v1289_v48 = vadd.f32 %v1287_v56, %v1249_v41 }
 0x2d4   : > { %1387 = vrot.lane.b32.xlu0 %v1386_v17, %s1951_s25  ;;  %v1294_v31 = vpop.permute.xlu1 %1293 }
 0x2d5   : > { %v1297_v58 = vmul.f32 %v1295_v57, %v1294_v31 }
 0x2d7   : > { %v1299_v1 = vadd.f32 %v1297_v58, %v1259_v46 }
 0x2d8   : > { %1395 = vrot.lane.b32.xlu0 %v1394_v22, %s1952_s0 }
 0x2d9   : > { %v1301_v43 = vadd.f32 %v1299_v1, %v1289_v48 }
 0x2db   : > { %v1305_v59 = vadd.f32 %v1303_v33, %v1301_v43 }
 0x2dc   : > { %1403 = vrot.lane.b32.xlu0 %v1402_v52, %s1953_s1 }
 0x2dd   : > { %v1418_v5 = vrot.slane %v1305_v59, %v3544_v12  ;;  %1410 = vst.msk [vmem:[#allocation3 + $0x1] sm:$0x1] %vm3547_vm2, %v1305_v59  ;;  %v1448_v34 = vcombine.high %v1305_v59, %v1305_v59  ;;  %vm3729_vm2 = vcmp.ge.s32.totalorder %v1306_v8, 96 }
 0x2df   : > { %v1419_v27 = vcombine.high %v1418_v5, %v1418_v5  ;;  %v1426_v57 = vrot.slane %v1418_v5, %v3544_v12  ;;  %v1455_v2 = vrot.slane %v1448_v34, %v3544_v12 }
 0x2e1   : > { %v1433_v20 = vrot.slane %v1419_v27, %v3544_v12  ;;  %v1438_v36 = vcombine.high %v1426_v57, %v1426_v57  ;;  %v1462_v7 = vrot.slane %v1455_v2, %v3544_v12  ;;  %v1467_v47 = vcombine.high %v1455_v2, %v1455_v2 }
 0x2e3   : > { %1434 = vrot.lane.b32.xlu1 %v1433_v20, %s1947_s17  ;;  %v1443_v53 = vcombine.high %v1433_v20, %v1433_v20  ;;  %v1474_v37 = vrot.slane %v1467_v47, %v3544_v12  ;;  %v1479_v63 = vcombine.high %v1462_v7, %v1462_v7 }
 0x2e5   : > { %v1484_v19 = vcombine.high %v1474_v37, %v1474_v37 }
 0x2e7   : > { %1439 = vrot.lane.b32.xlu1 %v1438_v36, %s1948_s29 }
 0x2eb   : > { %1444 = vrot.lane.b32.xlu1 %v1443_v53, %s1949_s12 }
 0x2ef   : > { %1463 = vrot.lane.b32.xlu1 %v1462_v7, %s1950_s15 }
 0x2f3   : > { %1475 = vrot.lane.b32.xlu1 %v1474_v37, %s1951_s25 }
 0x2f7   : > { %1480 = vrot.lane.b32.xlu1 %v1479_v63, %s1952_s0 }
 0x2fb   : > { %1485 = vrot.lane.b32.xlu1 %v1484_v19, %s1953_s1 }
 0x336   : > { %v1335_v49 = vpop.permute.xlu0 %1334 }
 0x337   : > { %1340 = vst.msk [vmem:[#allocation3] sm:$0x1] %vm3956_vm5, %v1335_v49  ;;  %vm3753_vm5 = vcmp.lt.s32.totalorder %v1306_v8, 128 }
 0x33a   : > { %v1343_v4 = vpop.permute.xlu0 %1342 }
 0x33b   : > { %1348 = vst.msk [vmem:[#allocation3] sm:$0x1] %vm3955_vm8, %v1343_v4  ;;  %vm3748_vm8 = vcmp.ge.s32.totalorder %v1306_v8, 112 }
 0x33e   : > { %v1351_v9 = vpop.permute.xlu0 %1350 }
 0x33f   : > { %1356 = vst.msk [vmem:[#allocation3] sm:$0x1] %vm3953_vm11, %v1351_v9  ;;  %vm3734_vm11 = vcmp.lt.s32.totalorder %v1306_v8, 112 }
 0x342   : > { %v1373_v28 = vpop.permute.xlu0 %1372 }
 0x343   : > { %1378 = vst.msk [vmem:[#allocation3] sm:$0x1] %vm3954_vm14, %v1373_v28  ;;  %vm3959_vm14 = vmand %vm3729_vm2, %vm3734_vm11 }
 0x346   : > { %v1388_v30 = vpop.permute.xlu0 %1387 }
 0x347   : > { %1393 = vst.msk [vmem:[#allocation3] sm:$0x1] %vm3957_vm1, %v1388_v30  ;;  %vm3960_vm1 = vmand %vm3748_vm8, %vm3753_vm5 }
 0x34a   : > { %v1396_v60 = vpop.permute.xlu0 %1395 }
 0x34b   : > { %1401 = vst.msk [vmem:[#allocation3] sm:$0x1] %vm3959_vm14, %v1396_v60  ;;  %vm4216_vm14 = vmand %vm3653_vm6, %vm3658_vm7 }
 0x34c   : > { %vm4220_vm6 = vmand %vm3710_vm15, %vm4219_vm4 }
 0x34d   : > { %vm4221_vm7 = vmand %vm3729_vm2, %vm3734_vm11 }
 0x34e   : > { %v1404_v51 = vpop.permute.xlu0 %1403 }
 0x34f   : > { %1409 = vst.msk [vmem:[#allocation3] sm:$0x1] %vm3960_vm1, %v1404_v51  ;;  %vm4217_vm1 = vmand %vm3672_vm9, %vm3677_vm10 }
 0x350   : > { %vm4224_vm9 = vmand %vm3748_vm8, %vm3753_vm5 }
 0x355   : > { %v1435_v8 = vpop.permute.xlu1 %1434 }
 0x356   : > { %1437 = vst.msk [vmem:[#allocation3 + $0x1] sm:$0x1] %vm4215_vm0, %v1435_v8 }
 0x359   : > { %v1440_v15 = vpop.permute.xlu1 %1439 }
 0x35a   : > { %1442 = vst.msk [vmem:[#allocation3 + $0x1] sm:$0x1] %vm4216_vm14, %v1440_v15 }
 0x35d   : > { %v1445_v16 = vpop.permute.xlu1 %1444 }
 0x35e   : > { %1447 = vst.msk [vmem:[#allocation3 + $0x1] sm:$0x1] %vm4217_vm1, %v1445_v16 }
 0x361   : > { %v1464_v62 = vpop.permute.xlu1 %1463 }
 0x362   : > { %1466 = vst.msk [vmem:[#allocation3 + $0x1] sm:$0x1] %vm4218_vm3, %v1464_v62 }
 0x365   : > { %v1476_v3 = vpop.permute.xlu1 %1475 }
 0x366   : > { %1478 = vst.msk [vmem:[#allocation3 + $0x1] sm:$0x1] %vm4220_vm6, %v1476_v3 }
 0x369   : > { %v1481_v11 = vpop.permute.xlu1 %1480 }
 0x36a   : > { %1483 = vst.msk [vmem:[#allocation3 + $0x1] sm:$0x1] %vm4221_vm7, %v1481_v11 }
 0x36d   : > { %v1486_v29 = vpop.permute.xlu1 %1485 }
 0x36e   : > { %1488 = vst.msk [vmem:[#allocation3 + $0x1] sm:$0x1] %vm4224_vm9, %v1486_v29 }
 0x375   : > { %v1489_v26 = vld [vmem:[#allocation3] sm:$0x3] }
 0x376   : > { %v1716_v55 = vmul.f32 -1.442695, %v1489_v26 }
 0x378   : > { %1805 = vpow2.f32 %v1716_v55 }
 0x382   : > { %v1806_v10 = vpop.eup %1805 }
 0x383   : > { %v1493_v44 = vadd.f32 1.0, %v1806_v10 }
 0x385   : > { %1807 = vrcp.f32 %v1493_v44 }
 0x38f   : > { %v1808_v23 = vpop.eup %1807 }
 0x390   : > { %v1496_v33 = vadd.f32 1.0, %v1808_v23 }
 0x392   : > { %v1502_v17 = vrot.slane %v1496_v33, %v1501_v50  ;;  %v1506_v35 = vrot.slane %v1496_v33, %v1505_v39 }
 0x394   : > { %v1507_v56 = vcombine.low %v1502_v17, %v1506_v35 }
 0x396   : > { %v1509_v31 = vmul.f32 %v1507_v56, %v1497_v38 }
 0x398   : > { %1510 = vst [vmem:[%s171_s6] sm:$0xff] %v1509_v31 }
 0x399   : > { %1870 = shalt.err (!%p1867_p0)
}
 0x39a   : > { %s1871_s28 = scalar_lea.hbm %s3815_s10, 128  ;;  %s1875_s2 = scalar_lea.hbm %s4229_s4, 256 }
 0x39b   : > { %p1872_p3 = scmp.ne.s32.totalorder %s3815_s10, %s1871_s28  ;;  %p1876_p6 = scmp.lt.u32.totalorder %s3815_s10, %s4229_s4 }
 0x39c   : > { %p1877_p13 = scmp.lt.u32.totalorder %s1875_s2, %s1871_s28  ;;  %p1879_p8 = scmp.lt.u32.totalorder %s1871_s28, %s3815_s10 }
 0x39d   : > { %p1873_p7 = pnand %p1872_p3, %p4230_p9 }
 0x39e   : > { %p1878_p4 = por %p1877_p13, %p1876_p6 }
 0x39f   : > { %p1874_p10 = pneg %p1873_p7 }
 0x3a0   : > { %p1880_p11 = por %p1879_p8, %p1878_p4 }
 0x3a2   : > { %p1881_p5 = pnand %p1880_p11, %p1874_p10 }
 0x3a4   : > { %1884 = shalt.err (!%p1881_p5)
}
 0x3a5   : > { %1730 = dma.vmem_to_hbm [thread:$0]  (%p4230_p9), %s3817_s7, 128, %s3815_s10, %s1512_s27  }
 0x3a6 PF: > { %s4231_s17 = sld [smem:[#allocation13_spill]]  ;;  %s4232_s29 = sld [smem:[#allocation18_spill]] }
 0x3a7   : > { %s4233_s12 = sld [smem:[#allocation16_spill]] }
 0x3ac   : > { %s1538_s15 = sand.u32 1, %s4231_s17   ;;  %p4234_p1 = scmp.ne.s32.totalorder %s4232_s29, 0 }
 0x3ad   : > { %p4235_p2 = scmp.ge.s32.totalorder %s4233_s12, 2  ;;  %s1539_s25 = scalar_lea.sflag [#allocation6], %s1538_s15 }
 0x3af   : > { %p1741_p12 = pnand %p4235_p2, %p4234_p1 }
 0x3b1   : > { %1910 = dma.done.wait (!%p1741_p12), %s1539_s25, 128  }
 0x3b2   : > { %1912 = vsyncadd (!%p1741_p12), %s1539_s25, 4294967168  ;;  %s4236_s12 = sld [smem:[#allocation19_spill]]  ;;  %s4237_s9 = sld [smem:[#allocation14_spill]] }
 0x3b3   : > { %s4238_s10 = sld [smem:[#allocation15_spill]]  ;;  %s4239_s11 = sld [smem:[#allocation20_spill]] }
 0x3b8   : > { %p16_p0 = scmp.ge.s32.totalorder %s4236_s12, 4  }
 0x3ba   :  { %18 = sbr.rel (!%p16_p0) target bundleno = 10 (0xa), region = 79 }
 0x3c1   :  { %1544 = vsyncpa [#allocation5], 1 }
 0x3c2   :  { %1546 = vsyncpa [#allocation5 + $0x1], 1 }
 0x3c3   :  { %1547 = vsyncpa [#allocation6], 1 }
 0x3c4   :  { %1549 = vsyncpa [#allocation6 + $0x1], 1 }
 0x3c5   :  { %1550 = vsyncpa [#allocation7], 1 }
 0x3c6   :  { %1552 = vsyncpa [#allocation7 + $0x1], 1 }

</bundles_post_ra>
